<compile_context>
chip_gen: v6e
topology: v6e:2x2x1
jax: 0.10.0
libtpu: 0.0.40
codegen_flags: <defaults>
</compile_context>

<pallas_src>
import numpy as np

import jax
import jax.numpy as jnp
from jax import lax
from jax.experimental import pallas as pl
from jax.experimental.pallas import tpu as pltpu

EPS = 1e-5


def _lska15_kernel(x_ref, a0h_ref, b0h_ref, s0v_ref, w0v_ref, b0v_ref,
                   ash_ref, bsh_ref, ssv_ref, wsv_ref, bsv_ref,
                   a1_ref, b1_ref, pool_ref, gamma_ref, beta_ref, out_ref):
  """Fused LSKA15 forward on a lane-dense (N*H, W*C) f32 slab."""
  pool = pool_ref[...]       # (WC, WC) per-channel pooling matrix (includes 1/M)
  gamma = gamma_ref[...]     # (1, WC)  gamma tiled across W
  beta = beta_ref[...]       # (1, WC)  beta  tiled across W

  def relu_bn(z):
    # ReLU -> BatchNorm with training-mode batch stats (biased variance).
    # One-pass stats: sublane-sum (XLU) of y and y*y, then one tiny MXU dot
    # with `pool` does the per-channel reduce across W AND the tile-back
    # broadcast at once.  Normalization is a single FMA per element.
    y = jnp.maximum(z, 0.0)
    rs = jnp.sum(y, axis=0, keepdims=True)                       # (1, WC)
    rss = jnp.sum(y * y, axis=0, keepdims=True)                  # (1, WC)
    mean = jnp.dot(rs, pool, preferred_element_type=jnp.float32)   # per-chan mean
    ey2 = jnp.dot(rss, pool, preferred_element_type=jnp.float32)   # per-chan E[y^2]
    var = ey2 - mean * mean
    s = gamma * lax.rsqrt(var + EPS)        # rsqrt -> EUP slot (free-ish)
    o = beta - mean * s
    return y * s + o

  def w_conv(y, a_ref, b_ref):
    # Depthwise conv along W == right-multiply by a banded block matrix that
    # bakes taps, dilation and zero padding.  Single MXU matmul, no VPU work.
    return jnp.dot(y, a_ref[...], preferred_element_type=jnp.float32) + b_ref[...]

  def h_conv(y, s_ref, w_ref, b_ref):
    # Depthwise conv along H: per tap, a (N*H, N*H) 0/1 row-shift matrix from
    # the left (exact zero padding, no cross-batch leakage) then one
    # per-channel tiled-weight FMA.  Accumulator initialized with tap 0.
    taps = s_ref.shape[0]
    w_rows = w_ref[...]                                           # (taps, WC)
    acc = jnp.dot(s_ref[0], y, preferred_element_type=jnp.float32) * w_rows[0:1, :]
    for t in range(1, taps):                                      # static unroll
      acc = acc + (jnp.dot(s_ref[t], y, preferred_element_type=jnp.float32)
                   * w_rows[t:t + 1, :])
    return acc + b_ref[...]

  attn = relu_bn(w_conv(x_ref[...], a0h_ref, b0h_ref))            # conv0h (1,3)
  attn = relu_bn(h_conv(attn, s0v_ref, w0v_ref, b0v_ref))         # conv0v (3,1)
  attn = relu_bn(w_conv(attn, ash_ref, bsh_ref))                  # (1,7), dil 2
  attn = relu_bn(h_conv(attn, ssv_ref, wsv_ref, bsv_ref))         # (7,1), dil 2
  # conv1: pointwise 1x1 as one block-diagonal MXU matmul (stays lane-dense).
  attn = relu_bn(jnp.dot(attn, a1_ref[...],
                         preferred_element_type=jnp.float32) + b1_ref[...])
  # y = bn(relu(u * attn)); re-read x_ref here instead of keeping a copy live.
  out_ref[...] = relu_bn(x_ref[...] * attn)


# --------------------- wrapper-side operator construction --------------------
def _shift_matrix(n_rows, period, off):
  """S[r, r+off] = 1 where r = b*period + h and 0 <= h+off < period (numpy)."""
  s = np.zeros((n_rows, n_rows), np.float32)
  for r in range(n_rows):
    h = r % period
    if 0 <= h + off < period:
      s[r, r + off] = 1.0
  return s


def _wconv_matrix(w_pt, dil, w_dim, c_dim):
  """Banded (W*C, W*C) matrix for a depthwise (1,K) conv.  w_pt: (C,1,1,K)."""
  k = w_pt.shape[-1]
  p = (k - 1) // 2 * dil
  a = jnp.zeros((w_dim * c_dim, w_dim * c_dim), jnp.float32)
  for t in range(k):
    off = t * dil - p
    sw = _shift_matrix(w_dim, w_dim, off).T          # sw[w+off, w] = 1 (valid)
    a = a + jnp.kron(jnp.asarray(sw),
                     jnp.diag(w_pt[:, 0, 0, t].astype(jnp.float32)))
  return a


def _hconv_params(w_pt, dil, n, h_dim, w_dim, c_dim):
  """Shift matrices (K, NH, NH) and tiled weight rows (K, WC).  w_pt: (C,1,K,1)."""
  k = w_pt.shape[2]
  p = (k - 1) // 2 * dil
  s = np.stack([_shift_matrix(n * h_dim, h_dim, t * dil - p) for t in range(k)])
  w_rows = jnp.tile(w_pt[:, 0, :, 0].T.astype(jnp.float32), (1, w_dim))
  return jnp.asarray(s), w_rows


@jax.jit
def lska15_forward(x_nchw, params):
  """x_nchw: (N, C, H, W); params: dict of PyTorch-layout weights."""
  N, C, H, W = x_nchw.shape
  NH, WC = N * H, W * C
  # NCHW -> lane-dense (N*H, W*C) slab (W*C = 256 is a multiple of 128 here).
  x2d = jnp.transpose(x_nchw, (0, 2, 3, 1)).astype(jnp.float32).reshape(NH, WC)

  def row(v):                              # (C,) -> (1, W*C) tiled lane row
    return jnp.tile(v.reshape(1, C).astype(jnp.float32), (1, W))

  a0h = _wconv_matrix(params['w0h'], 1, W, C)                   # (WC, WC)
  ash = _wconv_matrix(params['wsh'], 2, W, C)                   # (WC, WC)
  s0v, w0v = _hconv_params(params['w0v'], 1, N, H, W, C)        # (3,NH,NH),(3,WC)
  ssv, wsv = _hconv_params(params['wsv'], 2, N, H, W, C)        # (7,NH,NH),(7,WC)
  a1 = jnp.kron(jnp.eye(W, dtype=jnp.float32),
                params['w1'][:, :, 0, 0].T.astype(jnp.float32))  # block-diag 1x1
  cid = np.arange(WC) % C
  pool = jnp.asarray((cid[:, None] == cid[None, :]).astype(np.float32)
                     / (N * H * W))                              # (WC, WC)

  vmem = pl.BlockSpec(memory_space=pltpu.MemorySpace.VMEM)
  out2d = pl.pallas_call(
      _lska15_kernel,
      out_shape=jax.ShapeDtypeStruct((NH, WC), jnp.float32),     # lane-dense out
      in_specs=[vmem] * 16,
      out_specs=vmem,
      compiler_params=pltpu.CompilerParams(
          vmem_limit_bytes=32 * 1024 * 1024),
  )(x2d, a0h, row(params['b0h']), s0v, w0v, row(params['b0v']),
    ash, row(params['bsh']), ssv, wsv, row(params['bsv']),
    a1, row(params['b1']), pool, row(params['gamma']), row(params['beta']))

  return jnp.transpose(out2d.reshape(N, H, W, C), (0, 3, 1, 2))  # slab -> NCHW


# ------------------------- pure-JAX reference --------------------------------
def _relu_bn_ref(y, gamma, beta):
  y = jnp.maximum(y, 0.0)
  mean = y.mean((0, 1, 2), keepdims=True)
  var = ((y - mean) ** 2).mean((0, 1, 2), keepdims=True)
  return gamma * (y - mean) * lax.rsqrt(var + EPS) + beta


def _dw_ref(x_nhwc, w_pt, b, dil, pad):
  C = x_nhwc.shape[-1]
  w_hwio = jnp.transpose(w_pt, (2, 3, 1, 0))        # (kh, kw, 1, C)
  y = lax.conv_general_dilated(
      x_nhwc, w_hwio, window_strides=(1, 1),
      padding=[(pad[0], pad[0]), (pad[1], pad[1])],
      rhs_dilation=dil,
      dimension_numbers=('NHWC', 'HWIO', 'NHWC'),
      feature_group_count=C,
      precision=lax.Precision.HIGHEST)
  return y + b


def lska15_ref(x_nchw, p):
  x = jnp.transpose(x_nchw, (0, 2, 3, 1)).astype(jnp.float32)
  g, bt = p['gamma'], p['beta']
  u = x
  a = _relu_bn_ref(_dw_ref(x, p['w0h'], p['b0h'], (1, 1), (0, 1)), g, bt)
  a = _relu_bn_ref(_dw_ref(a, p['w0v'], p['b0v'], (1, 1), (1, 0)), g, bt)
  a = _relu_bn_ref(_dw_ref(a, p['wsh'], p['bsh'], (1, 2), (0, 6)), g, bt)
  a = _relu_bn_ref(_dw_ref(a, p['wsv'], p['bsv'], (2, 1), (6, 0)), g, bt)
  a = _relu_bn_ref(jnp.einsum('nhwi,oi->nhwo', a, p['w1'][:, :, 0, 0],
                              precision=lax.Precision.HIGHEST) + p['b1'], g, bt)
  y = _relu_bn_ref(u * a, g, bt)
  return jnp.transpose(y, (0, 3, 1, 2))


# ------------------------------- main -----------------------------------------
if __name__ == "__main__":
  dim = 16               # in_channel == dim (required by groups=dim and u*attn)
  N, H, W = 2, 16, 16

  key = jax.random.PRNGKey(0)
  ks = jax.random.split(key, 13)

  def nrm(k, shape, s):
    return s * jax.random.normal(k, shape, jnp.float32)

  params = {
      'w0h': nrm(ks[0], (dim, 1, 1, 3), 0.3), 'b0h': nrm(ks[1], (dim,), 0.05),
      'w0v': nrm(ks[2], (dim, 1, 3, 1), 0.3), 'b0v': nrm(ks[3], (dim,), 0.05),
      'wsh': nrm(ks[4], (dim, 1, 1, 7), 0.2), 'bsh': nrm(ks[5], (dim,), 0.05),
      'wsv': nrm(ks[6], (dim, 1, 7, 1), 0.2), 'bsv': nrm(ks[7], (dim,), 0.05),
      'w1':  nrm(ks[8], (dim, dim, 1, 1), 0.2), 'b1': nrm(ks[9], (dim,), 0.05),
      'gamma': 1.0 + nrm(ks[10], (dim,), 0.1),
      'beta': nrm(ks[11], (dim,), 0.1),
  }
  x = jax.random.normal(ks[12], (N, dim, H, W), jnp.float32)

  out = jax.block_until_ready(lska15_forward(x, params))
  ref = jax.block_until_ready(lska15_ref(x, params))

  assert out.shape == (N, dim, H, W), out.shape
  max_err = float(jnp.max(jnp.abs(out - ref)))
  assert max_err < 1e-3, f"mismatch vs reference: {max_err}"
  print("KERNEL_OK")
</pallas_src>

<mosaic_0001>
module attributes {stable_mosaic.version = 11 : i64} {
  func.func @_lska15_kernel(%arg0: memref<32x256xf32, #tpu.memory_space<vmem>>, %arg1: memref<256x256xf32, #tpu.memory_space<vmem>>, %arg2: memref<1x256xf32, #tpu.memory_space<vmem>>, %arg3: memref<3x32x32xf32, #tpu.memory_space<vmem>>, %arg4: memref<3x256xf32, #tpu.memory_space<vmem>>, %arg5: memref<1x256xf32, #tpu.memory_space<vmem>>, %arg6: memref<256x256xf32, #tpu.memory_space<vmem>>, %arg7: memref<1x256xf32, #tpu.memory_space<vmem>>, %arg8: memref<7x32x32xf32, #tpu.memory_space<vmem>>, %arg9: memref<7x256xf32, #tpu.memory_space<vmem>>, %arg10: memref<1x256xf32, #tpu.memory_space<vmem>>, %arg11: memref<256x256xf32, #tpu.memory_space<vmem>>, %arg12: memref<1x256xf32, #tpu.memory_space<vmem>>, %arg13: memref<256x256xf32, #tpu.memory_space<vmem>>, %arg14: memref<1x256xf32, #tpu.memory_space<vmem>>, %arg15: memref<1x256xf32, #tpu.memory_space<vmem>>, %arg16: memref<32x256xf32, #tpu.memory_space<vmem>>) attributes {dimension_semantics = [], scalar_prefetch = 0 : i64, scratch_operands = 0 : i64, tpu.core_type = #tpu.core_type<tc>} {
    %c0 = arith.constant 0 : index
    %c0_0 = arith.constant 0 : index
    %0 = vector.load %arg13[%c0, %c0_0] : memref<256x256xf32, #tpu.memory_space<vmem>>, vector<256x256xf32>
    %c0_1 = arith.constant 0 : index
    %c0_2 = arith.constant 0 : index
    %1 = vector.load %arg14[%c0_1, %c0_2] : memref<1x256xf32, #tpu.memory_space<vmem>>, vector<1x256xf32>
    %c0_3 = arith.constant 0 : index
    %c0_4 = arith.constant 0 : index
    %2 = vector.load %arg15[%c0_3, %c0_4] : memref<1x256xf32, #tpu.memory_space<vmem>>, vector<1x256xf32>
    %c0_5 = arith.constant 0 : index
    %c0_6 = arith.constant 0 : index
    %3 = vector.load %arg0[%c0_5, %c0_6] : memref<32x256xf32, #tpu.memory_space<vmem>>, vector<32x256xf32>
    %c0_7 = arith.constant 0 : index
    %c0_8 = arith.constant 0 : index
    %4 = vector.load %arg1[%c0_7, %c0_8] : memref<256x256xf32, #tpu.memory_space<vmem>>, vector<256x256xf32>
    %cst = arith.constant dense<0.000000e+00> : vector<32x256xf32>
    %5 = tpu.matmul %3, %4, %cst {dimension_numbers = #tpu.dot_dimension_numbers<[1], [0], [0], [1], [0, 0, 1, 1], [], []>} : vector<32x256xf32>, vector<256x256xf32>, vector<32x256xf32> -> vector<32x256xf32>
    %c0_9 = arith.constant 0 : index
    %c0_10 = arith.constant 0 : index
    %6 = vector.load %arg2[%c0_9, %c0_10] : memref<1x256xf32, #tpu.memory_space<vmem>>, vector<1x256xf32>
    %7 = vector.broadcast %6 : vector<1x256xf32> to vector<32x256xf32>
    %8 = arith.addf %5, %7 : vector<32x256xf32>
    %cst_11 = arith.constant 0.000000e+00 : f32
    %9 = vector.broadcast %cst_11 : f32 to vector<32x256xf32>
    %10 = arith.maximumf %8, %9 : vector<32x256xf32>
    %cst_12 = arith.constant dense<0.000000e+00> : vector<256xf32>
    %11 = vector.multi_reduction <add>, %10, %cst_12 [0] : vector<32x256xf32> to vector<256xf32>
    %12 = vector.shape_cast %11 : vector<256xf32> to vector<1x256xf32>
    %13 = arith.mulf %10, %10 : vector<32x256xf32>
    %cst_13 = arith.constant dense<0.000000e+00> : vector<256xf32>
    %14 = vector.multi_reduction <add>, %13, %cst_13 [0] : vector<32x256xf32> to vector<256xf32>
    %15 = vector.shape_cast %14 : vector<256xf32> to vector<1x256xf32>
    %cst_14 = arith.constant dense<0.000000e+00> : vector<1x256xf32>
    %16 = tpu.matmul %12, %0, %cst_14 {dimension_numbers = #tpu.dot_dimension_numbers<[1], [0], [0], [1], [0, 0, 1, 1], [], []>} : vector<1x256xf32>, vector<256x256xf32>, vector<1x256xf32> -> vector<1x256xf32>
    %cst_15 = arith.constant dense<0.000000e+00> : vector<1x256xf32>
    %17 = tpu.matmul %15, %0, %cst_15 {dimension_numbers = #tpu.dot_dimension_numbers<[1], [0], [0], [1], [0, 0, 1, 1], [], []>} : vector<1x256xf32>, vector<256x256xf32>, vector<1x256xf32> -> vector<1x256xf32>
    %18 = arith.mulf %16, %16 : vector<1x256xf32>
    %19 = arith.subf %17, %18 : vector<1x256xf32>
    %cst_16 = arith.constant 9.99999974E-6 : f32
    %20 = vector.broadcast %cst_16 : f32 to vector<1x256xf32>
    %21 = arith.addf %19, %20 : vector<1x256xf32>
    %22 = math.rsqrt %21 : vector<1x256xf32>
    %23 = arith.mulf %1, %22 : vector<1x256xf32>
    %24 = arith.mulf %16, %23 : vector<1x256xf32>
    %25 = arith.subf %2, %24 : vector<1x256xf32>
    %26 = vector.broadcast %23 : vector<1x256xf32> to vector<32x256xf32>
    %27 = arith.mulf %10, %26 : vector<32x256xf32>
    %28 = vector.broadcast %25 : vector<1x256xf32> to vector<32x256xf32>
    %29 = arith.addf %27, %28 : vector<32x256xf32>
    %c0_17 = arith.constant 0 : index
    %c0_18 = arith.constant 0 : index
    %30 = vector.load %arg4[%c0_17, %c0_18] : memref<3x256xf32, #tpu.memory_space<vmem>>, vector<3x256xf32>
    %c0_19 = arith.constant 0 : index
    %c0_20 = arith.constant 0 : index
    %c0_21 = arith.constant 0 : index
    %31 = vector.load %arg3[%c0_19, %c0_20, %c0_21] : memref<3x32x32xf32, #tpu.memory_space<vmem>>, vector<1x32x32xf32>
    %32 = vector.shape_cast %31 : vector<1x32x32xf32> to vector<32x32xf32>
    %cst_22 = arith.constant dense<0.000000e+00> : vector<32x256xf32>
    %33 = tpu.matmul %32, %29, %cst_22 {dimension_numbers = #tpu.dot_dimension_numbers<[1], [0], [0], [1], [0, 0, 1, 1], [], []>} : vector<32x32xf32>, vector<32x256xf32>, vector<32x256xf32> -> vector<32x256xf32>
    %34 = vector.extract_strided_slice %30 {offsets = [0, 0], sizes = [1, 256], strides = [1, 1]} : vector<3x256xf32> to vector<1x256xf32>
    %35 = vector.broadcast %34 : vector<1x256xf32> to vector<32x256xf32>
    %36 = arith.mulf %33, %35 : vector<32x256xf32>
    %c1 = arith.constant 1 : index
    %c0_23 = arith.constant 0 : index
    %c0_24 = arith.constant 0 : index
    %37 = vector.load %arg3[%c1, %c0_23, %c0_24] : memref<3x32x32xf32, #tpu.memory_space<vmem>>, vector<1x32x32xf32>
    %38 = vector.shape_cast %37 : vector<1x32x32xf32> to vector<32x32xf32>
    %cst_25 = arith.constant dense<0.000000e+00> : vector<32x256xf32>
    %39 = tpu.matmul %38, %29, %cst_25 {dimension_numbers = #tpu.dot_dimension_numbers<[1], [0], [0], [1], [0, 0, 1, 1], [], []>} : vector<32x32xf32>, vector<32x256xf32>, vector<32x256xf32> -> vector<32x256xf32>
    %40 = vector.extract_strided_slice %30 {offsets = [1, 0], sizes = [1, 256], strides = [1, 1]} : vector<3x256xf32> to vector<1x256xf32>
    %41 = vector.broadcast %40 : vector<1x256xf32> to vector<32x256xf32>
    %42 = arith.mulf %39, %41 : vector<32x256xf32>
    %43 = arith.addf %36, %42 : vector<32x256xf32>
    %c2 = arith.constant 2 : index
    %c0_26 = arith.constant 0 : index
    %c0_27 = arith.constant 0 : index
    %44 = vector.load %arg3[%c2, %c0_26, %c0_27] : memref<3x32x32xf32, #tpu.memory_space<vmem>>, vector<1x32x32xf32>
    %45 = vector.shape_cast %44 : vector<1x32x32xf32> to vector<32x32xf32>
    %cst_28 = arith.constant dense<0.000000e+00> : vector<32x256xf32>
    %46 = tpu.matmul %45, %29, %cst_28 {dimension_numbers = #tpu.dot_dimension_numbers<[1], [0], [0], [1], [0, 0, 1, 1], [], []>} : vector<32x32xf32>, vector<32x256xf32>, vector<32x256xf32> -> vector<32x256xf32>
    %47 = vector.extract_strided_slice %30 {offsets = [2, 0], sizes = [1, 256], strides = [1, 1]} : vector<3x256xf32> to vector<1x256xf32>
    %48 = vector.broadcast %47 : vector<1x256xf32> to vector<32x256xf32>
    %49 = arith.mulf %46, %48 : vector<32x256xf32>
    %50 = arith.addf %43, %49 : vector<32x256xf32>
    %c0_29 = arith.constant 0 : index
    %c0_30 = arith.constant 0 : index
    %51 = vector.load %arg5[%c0_29, %c0_30] : memref<1x256xf32, #tpu.memory_space<vmem>>, vector<1x256xf32>
    %52 = vector.broadcast %51 : vector<1x256xf32> to vector<32x256xf32>
    %53 = arith.addf %50, %52 : vector<32x256xf32>
    %cst_31 = arith.constant 0.000000e+00 : f32
    %54 = vector.broadcast %cst_31 : f32 to vector<32x256xf32>
    %55 = arith.maximumf %53, %54 : vector<32x256xf32>
    %cst_32 = arith.constant dense<0.000000e+00> : vector<256xf32>
    %56 = vector.multi_reduction <add>, %55, %cst_32 [0] : vector<32x256xf32> to vector<256xf32>
    %57 = vector.shape_cast %56 : vector<256xf32> to vector<1x256xf32>
    %58 = arith.mulf %55, %55 : vector<32x256xf32>
    %cst_33 = arith.constant dense<0.000000e+00> : vector<256xf32>
    %59 = vector.multi_reduction <add>, %58, %cst_33 [0] : vector<32x256xf32> to vector<256xf32>
    %60 = vector.shape_cast %59 : vector<256xf32> to vector<1x256xf32>
    %cst_34 = arith.constant dense<0.000000e+00> : vector<1x256xf32>
    %61 = tpu.matmul %57, %0, %cst_34 {dimension_numbers = #tpu.dot_dimension_numbers<[1], [0], [0], [1], [0, 0, 1, 1], [], []>} : vector<1x256xf32>, vector<256x256xf32>, vector<1x256xf32> -> vector<1x256xf32>
    %cst_35 = arith.constant dense<0.000000e+00> : vector<1x256xf32>
    %62 = tpu.matmul %60, %0, %cst_35 {dimension_numbers = #tpu.dot_dimension_numbers<[1], [0], [0], [1], [0, 0, 1, 1], [], []>} : vector<1x256xf32>, vector<256x256xf32>, vector<1x256xf32> -> vector<1x256xf32>
    %63 = arith.mulf %61, %61 : vector<1x256xf32>
    %64 = arith.subf %62, %63 : vector<1x256xf32>
    %cst_36 = arith.constant 9.99999974E-6 : f32
    %65 = vector.broadcast %cst_36 : f32 to vector<1x256xf32>
    %66 = arith.addf %64, %65 : vector<1x256xf32>
    %67 = math.rsqrt %66 : vector<1x256xf32>
    %68 = arith.mulf %1, %67 : vector<1x256xf32>
    %69 = arith.mulf %61, %68 : vector<1x256xf32>
    %70 = arith.subf %2, %69 : vector<1x256xf32>
    %71 = vector.broadcast %68 : vector<1x256xf32> to vector<32x256xf32>
    %72 = arith.mulf %55, %71 : vector<32x256xf32>
    %73 = vector.broadcast %70 : vector<1x256xf32> to vector<32x256xf32>
    %74 = arith.addf %72, %73 : vector<32x256xf32>
    %c0_37 = arith.constant 0 : index
    %c0_38 = arith.constant 0 : index
    %75 = vector.load %arg6[%c0_37, %c0_38] : memref<256x256xf32, #tpu.memory_space<vmem>>, vector<256x256xf32>
    %cst_39 = arith.constant dense<0.000000e+00> : vector<32x256xf32>
    %76 = tpu.matmul %74, %75, %cst_39 {dimension_numbers = #tpu.dot_dimension_numbers<[1], [0], [0], [1], [0, 0, 1, 1], [], []>} : vector<32x256xf32>, vector<256x256xf32>, vector<32x256xf32> -> vector<32x256xf32>
    %c0_40 = arith.constant 0 : index
    %c0_41 = arith.constant 0 : index
    %77 = vector.load %arg7[%c0_40, %c0_41] : memref<1x256xf32, #tpu.memory_space<vmem>>, vector<1x256xf32>
    %78 = vector.broadcast %77 : vector<1x256xf32> to vector<32x256xf32>
    %79 = arith.addf %76, %78 : vector<32x256xf32>
    %cst_42 = arith.constant 0.000000e+00 : f32
    %80 = vector.broadcast %cst_42 : f32 to vector<32x256xf32>
    %81 = arith.maximumf %79, %80 : vector<32x256xf32>
    %cst_43 = arith.constant dense<0.000000e+00> : vector<256xf32>
    %82 = vector.multi_reduction <add>, %81, %cst_43 [0] : vector<32x256xf32> to vector<256xf32>
    %83 = vector.shape_cast %82 : vector<256xf32> to vector<1x256xf32>
    %84 = arith.mulf %81, %81 : vector<32x256xf32>
    %cst_44 = arith.constant dense<0.000000e+00> : vector<256xf32>
    %85 = vector.multi_reduction <add>, %84, %cst_44 [0] : vector<32x256xf32> to vector<256xf32>
    %86 = vector.shape_cast %85 : vector<256xf32> to vector<1x256xf32>
    %cst_45 = arith.constant dense<0.000000e+00> : vector<1x256xf32>
    %87 = tpu.matmul %83, %0, %cst_45 {dimension_numbers = #tpu.dot_dimension_numbers<[1], [0], [0], [1], [0, 0, 1, 1], [], []>} : vector<1x256xf32>, vector<256x256xf32>, vector<1x256xf32> -> vector<1x256xf32>
    %cst_46 = arith.constant dense<0.000000e+00> : vector<1x256xf32>
    %88 = tpu.matmul %86, %0, %cst_46 {dimension_numbers = #tpu.dot_dimension_numbers<[1], [0], [0], [1], [0, 0, 1, 1], [], []>} : vector<1x256xf32>, vector<256x256xf32>, vector<1x256xf32> -> vector<1x256xf32>
    %89 = arith.mulf %87, %87 : vector<1x256xf32>
    %90 = arith.subf %88, %89 : vector<1x256xf32>
    %cst_47 = arith.constant 9.99999974E-6 : f32
    %91 = vector.broadcast %cst_47 : f32 to vector<1x256xf32>
    %92 = arith.addf %90, %91 : vector<1x256xf32>
    %93 = math.rsqrt %92 : vector<1x256xf32>
    %94 = arith.mulf %1, %93 : vector<1x256xf32>
    %95 = arith.mulf %87, %94 : vector<1x256xf32>
    %96 = arith.subf %2, %95 : vector<1x256xf32>
    %97 = vector.broadcast %94 : vector<1x256xf32> to vector<32x256xf32>
    %98 = arith.mulf %81, %97 : vector<32x256xf32>
    %99 = vector.broadcast %96 : vector<1x256xf32> to vector<32x256xf32>
    %100 = arith.addf %98, %99 : vector<32x256xf32>
    %c0_48 = arith.constant 0 : index
    %c0_49 = arith.constant 0 : index
    %101 = vector.load %arg9[%c0_48, %c0_49] : memref<7x256xf32, #tpu.memory_space<vmem>>, vector<7x256xf32>
    %c0_50 = arith.constant 0 : index
    %c0_51 = arith.constant 0 : index
    %c0_52 = arith.constant 0 : index
    %102 = vector.load %arg8[%c0_50, %c0_51, %c0_52] : memref<7x32x32xf32, #tpu.memory_space<vmem>>, vector<1x32x32xf32>
    %103 = vector.shape_cast %102 : vector<1x32x32xf32> to vector<32x32xf32>
    %cst_53 = arith.constant dense<0.000000e+00> : vector<32x256xf32>
    %104 = tpu.matmul %103, %100, %cst_53 {dimension_numbers = #tpu.dot_dimension_numbers<[1], [0], [0], [1], [0, 0, 1, 1], [], []>} : vector<32x32xf32>, vector<32x256xf32>, vector<32x256xf32> -> vector<32x256xf32>
    %105 = vector.extract_strided_slice %101 {offsets = [0, 0], sizes = [1, 256], strides = [1, 1]} : vector<7x256xf32> to vector<1x256xf32>
    %106 = vector.broadcast %105 : vector<1x256xf32> to vector<32x256xf32>
    %107 = arith.mulf %104, %106 : vector<32x256xf32>
    %c1_54 = arith.constant 1 : index
    %c0_55 = arith.constant 0 : index
    %c0_56 = arith.constant 0 : index
    %108 = vector.load %arg8[%c1_54, %c0_55, %c0_56] : memref<7x32x32xf32, #tpu.memory_space<vmem>>, vector<1x32x32xf32>
    %109 = vector.shape_cast %108 : vector<1x32x32xf32> to vector<32x32xf32>
    %cst_57 = arith.constant dense<0.000000e+00> : vector<32x256xf32>
    %110 = tpu.matmul %109, %100, %cst_57 {dimension_numbers = #tpu.dot_dimension_numbers<[1], [0], [0], [1], [0, 0, 1, 1], [], []>} : vector<32x32xf32>, vector<32x256xf32>, vector<32x256xf32> -> vector<32x256xf32>
    %111 = vector.extract_strided_slice %101 {offsets = [1, 0], sizes = [1, 256], strides = [1, 1]} : vector<7x256xf32> to vector<1x256xf32>
    %112 = vector.broadcast %111 : vector<1x256xf32> to vector<32x256xf32>
    %113 = arith.mulf %110, %112 : vector<32x256xf32>
    %114 = arith.addf %107, %113 : vector<32x256xf32>
    %c2_58 = arith.constant 2 : index
    %c0_59 = arith.constant 0 : index
    %c0_60 = arith.constant 0 : index
    %115 = vector.load %arg8[%c2_58, %c0_59, %c0_60] : memref<7x32x32xf32, #tpu.memory_space<vmem>>, vector<1x32x32xf32>
    %116 = vector.shape_cast %115 : vector<1x32x32xf32> to vector<32x32xf32>
    %cst_61 = arith.constant dense<0.000000e+00> : vector<32x256xf32>
    %117 = tpu.matmul %116, %100, %cst_61 {dimension_numbers = #tpu.dot_dimension_numbers<[1], [0], [0], [1], [0, 0, 1, 1], [], []>} : vector<32x32xf32>, vector<32x256xf32>, vector<32x256xf32> -> vector<32x256xf32>
    %118 = vector.extract_strided_slice %101 {offsets = [2, 0], sizes = [1, 256], strides = [1, 1]} : vector<7x256xf32> to vector<1x256xf32>
    %119 = vector.broadcast %118 : vector<1x256xf32> to vector<32x256xf32>
    %120 = arith.mulf %117, %119 : vector<32x256xf32>
    %121 = arith.addf %114, %120 : vector<32x256xf32>
    %c3 = arith.constant 3 : index
    %c0_62 = arith.constant 0 : index
    %c0_63 = arith.constant 0 : index
    %122 = vector.load %arg8[%c3, %c0_62, %c0_63] : memref<7x32x32xf32, #tpu.memory_space<vmem>>, vector<1x32x32xf32>
    %123 = vector.shape_cast %122 : vector<1x32x32xf32> to vector<32x32xf32>
    %cst_64 = arith.constant dense<0.000000e+00> : vector<32x256xf32>
    %124 = tpu.matmul %123, %100, %cst_64 {dimension_numbers = #tpu.dot_dimension_numbers<[1], [0], [0], [1], [0, 0, 1, 1], [], []>} : vector<32x32xf32>, vector<32x256xf32>, vector<32x256xf32> -> vector<32x256xf32>
    %125 = vector.extract_strided_slice %101 {offsets = [3, 0], sizes = [1, 256], strides = [1, 1]} : vector<7x256xf32> to vector<1x256xf32>
    %126 = vector.broadcast %125 : vector<1x256xf32> to vector<32x256xf32>
    %127 = arith.mulf %124, %126 : vector<32x256xf32>
    %128 = arith.addf %121, %127 : vector<32x256xf32>
    %c4 = arith.constant 4 : index
    %c0_65 = arith.constant 0 : index
    %c0_66 = arith.constant 0 : index
    %129 = vector.load %arg8[%c4, %c0_65, %c0_66] : memref<7x32x32xf32, #tpu.memory_space<vmem>>, vector<1x32x32xf32>
    %130 = vector.shape_cast %129 : vector<1x32x32xf32> to vector<32x32xf32>
    %cst_67 = arith.constant dense<0.000000e+00> : vector<32x256xf32>
    %131 = tpu.matmul %130, %100, %cst_67 {dimension_numbers = #tpu.dot_dimension_numbers<[1], [0], [0], [1], [0, 0, 1, 1], [], []>} : vector<32x32xf32>, vector<32x256xf32>, vector<32x256xf32> -> vector<32x256xf32>
    %132 = vector.extract_strided_slice %101 {offsets = [4, 0], sizes = [1, 256], strides = [1, 1]} : vector<7x256xf32> to vector<1x256xf32>
    %133 = vector.broadcast %132 : vector<1x256xf32> to vector<32x256xf32>
    %134 = arith.mulf %131, %133 : vector<32x256xf32>
    %135 = arith.addf %128, %134 : vector<32x256xf32>
    %c5 = arith.constant 5 : index
    %c0_68 = arith.constant 0 : index
    %c0_69 = arith.constant 0 : index
    %136 = vector.load %arg8[%c5, %c0_68, %c0_69] : memref<7x32x32xf32, #tpu.memory_space<vmem>>, vector<1x32x32xf32>
    %137 = vector.shape_cast %136 : vector<1x32x32xf32> to vector<32x32xf32>
    %cst_70 = arith.constant dense<0.000000e+00> : vector<32x256xf32>
    %138 = tpu.matmul %137, %100, %cst_70 {dimension_numbers = #tpu.dot_dimension_numbers<[1], [0], [0], [1], [0, 0, 1, 1], [], []>} : vector<32x32xf32>, vector<32x256xf32>, vector<32x256xf32> -> vector<32x256xf32>
    %139 = vector.extract_strided_slice %101 {offsets = [5, 0], sizes = [1, 256], strides = [1, 1]} : vector<7x256xf32> to vector<1x256xf32>
    %140 = vector.broadcast %139 : vector<1x256xf32> to vector<32x256xf32>
    %141 = arith.mulf %138, %140 : vector<32x256xf32>
    %142 = arith.addf %135, %141 : vector<32x256xf32>
    %c6 = arith.constant 6 : index
    %c0_71 = arith.constant 0 : index
    %c0_72 = arith.constant 0 : index
    %143 = vector.load %arg8[%c6, %c0_71, %c0_72] : memref<7x32x32xf32, #tpu.memory_space<vmem>>, vector<1x32x32xf32>
    %144 = vector.shape_cast %143 : vector<1x32x32xf32> to vector<32x32xf32>
    %cst_73 = arith.constant dense<0.000000e+00> : vector<32x256xf32>
    %145 = tpu.matmul %144, %100, %cst_73 {dimension_numbers = #tpu.dot_dimension_numbers<[1], [0], [0], [1], [0, 0, 1, 1], [], []>} : vector<32x32xf32>, vector<32x256xf32>, vector<32x256xf32> -> vector<32x256xf32>
    %146 = vector.extract_strided_slice %101 {offsets = [6, 0], sizes = [1, 256], strides = [1, 1]} : vector<7x256xf32> to vector<1x256xf32>
    %147 = vector.broadcast %146 : vector<1x256xf32> to vector<32x256xf32>
    %148 = arith.mulf %145, %147 : vector<32x256xf32>
    %149 = arith.addf %142, %148 : vector<32x256xf32>
    %c0_74 = arith.constant 0 : index
    %c0_75 = arith.constant 0 : index
    %150 = vector.load %arg10[%c0_74, %c0_75] : memref<1x256xf32, #tpu.memory_space<vmem>>, vector<1x256xf32>
    %151 = vector.broadcast %150 : vector<1x256xf32> to vector<32x256xf32>
    %152 = arith.addf %149, %151 : vector<32x256xf32>
    %cst_76 = arith.constant 0.000000e+00 : f32
    %153 = vector.broadcast %cst_76 : f32 to vector<32x256xf32>
    %154 = arith.maximumf %152, %153 : vector<32x256xf32>
    %cst_77 = arith.constant dense<0.000000e+00> : vector<256xf32>
    %155 = vector.multi_reduction <add>, %154, %cst_77 [0] : vector<32x256xf32> to vector<256xf32>
    %156 = vector.shape_cast %155 : vector<256xf32> to vector<1x256xf32>
    %157 = arith.mulf %154, %154 : vector<32x256xf32>
    %cst_78 = arith.constant dense<0.000000e+00> : vector<256xf32>
    %158 = vector.multi_reduction <add>, %157, %cst_78 [0] : vector<32x256xf32> to vector<256xf32>
    %159 = vector.shape_cast %158 : vector<256xf32> to vector<1x256xf32>
    %cst_79 = arith.constant dense<0.000000e+00> : vector<1x256xf32>
    %160 = tpu.matmul %156, %0, %cst_79 {dimension_numbers = #tpu.dot_dimension_numbers<[1], [0], [0], [1], [0, 0, 1, 1], [], []>} : vector<1x256xf32>, vector<256x256xf32>, vector<1x256xf32> -> vector<1x256xf32>
    %cst_80 = arith.constant dense<0.000000e+00> : vector<1x256xf32>
    %161 = tpu.matmul %159, %0, %cst_80 {dimension_numbers = #tpu.dot_dimension_numbers<[1], [0], [0], [1], [0, 0, 1, 1], [], []>} : vector<1x256xf32>, vector<256x256xf32>, vector<1x256xf32> -> vector<1x256xf32>
    %162 = arith.mulf %160, %160 : vector<1x256xf32>
    %163 = arith.subf %161, %162 : vector<1x256xf32>
    %cst_81 = arith.constant 9.99999974E-6 : f32
    %164 = vector.broadcast %cst_81 : f32 to vector<1x256xf32>
    %165 = arith.addf %163, %164 : vector<1x256xf32>
    %166 = math.rsqrt %165 : vector<1x256xf32>
    %167 = arith.mulf %1, %166 : vector<1x256xf32>
    %168 = arith.mulf %160, %167 : vector<1x256xf32>
    %169 = arith.subf %2, %168 : vector<1x256xf32>
    %170 = vector.broadcast %167 : vector<1x256xf32> to vector<32x256xf32>
    %171 = arith.mulf %154, %170 : vector<32x256xf32>
    %172 = vector.broadcast %169 : vector<1x256xf32> to vector<32x256xf32>
    %173 = arith.addf %171, %172 : vector<32x256xf32>
    %c0_82 = arith.constant 0 : index
    %c0_83 = arith.constant 0 : index
    %174 = vector.load %arg11[%c0_82, %c0_83] : memref<256x256xf32, #tpu.memory_space<vmem>>, vector<256x256xf32>
    %cst_84 = arith.constant dense<0.000000e+00> : vector<32x256xf32>
    %175 = tpu.matmul %173, %174, %cst_84 {dimension_numbers = #tpu.dot_dimension_numbers<[1], [0], [0], [1], [0, 0, 1, 1], [], []>} : vector<32x256xf32>, vector<256x256xf32>, vector<32x256xf32> -> vector<32x256xf32>
    %c0_85 = arith.constant 0 : index
    %c0_86 = arith.constant 0 : index
    %176 = vector.load %arg12[%c0_85, %c0_86] : memref<1x256xf32, #tpu.memory_space<vmem>>, vector<1x256xf32>
    %177 = vector.broadcast %176 : vector<1x256xf32> to vector<32x256xf32>
    %178 = arith.addf %175, %177 : vector<32x256xf32>
    %cst_87 = arith.constant 0.000000e+00 : f32
    %179 = vector.broadcast %cst_87 : f32 to vector<32x256xf32>
    %180 = arith.maximumf %178, %179 : vector<32x256xf32>
    %cst_88 = arith.constant dense<0.000000e+00> : vector<256xf32>
    %181 = vector.multi_reduction <add>, %180, %cst_88 [0] : vector<32x256xf32> to vector<256xf32>
    %182 = vector.shape_cast %181 : vector<256xf32> to vector<1x256xf32>
    %183 = arith.mulf %180, %180 : vector<32x256xf32>
    %cst_89 = arith.constant dense<0.000000e+00> : vector<256xf32>
    %184 = vector.multi_reduction <add>, %183, %cst_89 [0] : vector<32x256xf32> to vector<256xf32>
    %185 = vector.shape_cast %184 : vector<256xf32> to vector<1x256xf32>
    %cst_90 = arith.constant dense<0.000000e+00> : vector<1x256xf32>
    %186 = tpu.matmul %182, %0, %cst_90 {dimension_numbers = #tpu.dot_dimension_numbers<[1], [0], [0], [1], [0, 0, 1, 1], [], []>} : vector<1x256xf32>, vector<256x256xf32>, vector<1x256xf32> -> vector<1x256xf32>
    %cst_91 = arith.constant dense<0.000000e+00> : vector<1x256xf32>
    %187 = tpu.matmul %185, %0, %cst_91 {dimension_numbers = #tpu.dot_dimension_numbers<[1], [0], [0], [1], [0, 0, 1, 1], [], []>} : vector<1x256xf32>, vector<256x256xf32>, vector<1x256xf32> -> vector<1x256xf32>
    %188 = arith.mulf %186, %186 : vector<1x256xf32>
    %189 = arith.subf %187, %188 : vector<1x256xf32>
    %cst_92 = arith.constant 9.99999974E-6 : f32
    %190 = vector.broadcast %cst_92 : f32 to vector<1x256xf32>
    %191 = arith.addf %189, %190 : vector<1x256xf32>
    %192 = math.rsqrt %191 : vector<1x256xf32>
    %193 = arith.mulf %1, %192 : vector<1x256xf32>
    %194 = arith.mulf %186, %193 : vector<1x256xf32>
    %195 = arith.subf %2, %194 : vector<1x256xf32>
    %196 = vector.broadcast %193 : vector<1x256xf32> to vector<32x256xf32>
    %197 = arith.mulf %180, %196 : vector<32x256xf32>
    %198 = vector.broadcast %195 : vector<1x256xf32> to vector<32x256xf32>
    %199 = arith.addf %197, %198 : vector<32x256xf32>
    %c0_93 = arith.constant 0 : index
    %c0_94 = arith.constant 0 : index
    %200 = vector.load %arg0[%c0_93, %c0_94] : memref<32x256xf32, #tpu.memory_space<vmem>>, vector<32x256xf32>
    %201 = arith.mulf %200, %199 : vector<32x256xf32>
    %cst_95 = arith.constant 0.000000e+00 : f32
    %202 = vector.broadcast %cst_95 : f32 to vector<32x256xf32>
    %203 = arith.maximumf %201, %202 : vector<32x256xf32>
    %cst_96 = arith.constant dense<0.000000e+00> : vector<256xf32>
    %204 = vector.multi_reduction <add>, %203, %cst_96 [0] : vector<32x256xf32> to vector<256xf32>
    %205 = vector.shape_cast %204 : vector<256xf32> to vector<1x256xf32>
    %206 = arith.mulf %203, %203 : vector<32x256xf32>
    %cst_97 = arith.constant dense<0.000000e+00> : vector<256xf32>
    %207 = vector.multi_reduction <add>, %206, %cst_97 [0] : vector<32x256xf32> to vector<256xf32>
    %208 = vector.shape_cast %207 : vector<256xf32> to vector<1x256xf32>
    %cst_98 = arith.constant dense<0.000000e+00> : vector<1x256xf32>
    %209 = tpu.matmul %205, %0, %cst_98 {dimension_numbers = #tpu.dot_dimension_numbers<[1], [0], [0], [1], [0, 0, 1, 1], [], []>} : vector<1x256xf32>, vector<256x256xf32>, vector<1x256xf32> -> vector<1x256xf32>
    %cst_99 = arith.constant dense<0.000000e+00> : vector<1x256xf32>
    %210 = tpu.matmul %208, %0, %cst_99 {dimension_numbers = #tpu.dot_dimension_numbers<[1], [0], [0], [1], [0, 0, 1, 1], [], []>} : vector<1x256xf32>, vector<256x256xf32>, vector<1x256xf32> -> vector<1x256xf32>
    %211 = arith.mulf %209, %209 : vector<1x256xf32>
    %212 = arith.subf %210, %211 : vector<1x256xf32>
    %cst_100 = arith.constant 9.99999974E-6 : f32
    %213 = vector.broadcast %cst_100 : f32 to vector<1x256xf32>
    %214 = arith.addf %212, %213 : vector<1x256xf32>
    %215 = math.rsqrt %214 : vector<1x256xf32>
    %216 = arith.mulf %1, %215 : vector<1x256xf32>
    %217 = arith.mulf %209, %216 : vector<1x256xf32>
    %218 = arith.subf %2, %217 : vector<1x256xf32>
    %219 = vector.broadcast %216 : vector<1x256xf32> to vector<32x256xf32>
    %220 = arith.mulf %203, %219 : vector<32x256xf32>
    %221 = vector.broadcast %218 : vector<1x256xf32> to vector<32x256xf32>
    %222 = arith.addf %220, %221 : vector<32x256xf32>
    %c0_101 = arith.constant 0 : index
    %c0_102 = arith.constant 0 : index
    %223 = vector.load %arg16[%c0_101, %c0_102] : memref<32x256xf32, #tpu.memory_space<vmem>>, vector<32x256xf32>
    tpu.vector_store %arg16[%c0_101, %c0_102], %222 {strides = array<i32>} : memref<32x256xf32, #tpu.memory_space<vmem>>, vector<32x256xf32>,
    return
  }
}

</mosaic_0001>

<bundles_post_ra>
// kernel: tile.47
= control target key start
LH: loop header
LB: loop body
LE: loop exit
PB: predicated region body
PF: predicated region fallthrough
CT: control target
= control target key end

     0   :  { %vm34_vm0 = vcmask 1043458   ;;  %s95_s6 = smov 3  ;;  %vm19_vm1 = vcmask 1045508   ;;  %s98_s9 = smov 12  ;;  %vm44_vm2 = vcmask 1047558   ;;  %vm4_vm3 = vcmask 1047556   ;;  %s696_s0 = inlined_call_operand.vmem [shape: f32[7,16,16], index: 0, kind: input, shape index: {}]   ;;  %s697_s1 = inlined_call_operand.vmem [shape: f32[7,256], index: 1, kind: output, shape index: {}]  }
   0x1   :  { %v344_v0 = vld [vmem:[%s696_s0 + $0x1e] ss:$16 sm:%s95_s6]   ;;  %s103_s10 = smov 48  ;;  %s53_s15 = smov 3  ;;  %vm6_vm4 = vcmask 130048   ;;  %vm48_vm5 = vcmask 1048448  }
   0x2   :  { %v345_v1 = vld [vmem:[%s696_s0 + $0x1e] ss:$16 sm:%s98_s9]   ;;  %v335_v4 = vld [vmem:[%s696_s0 + $0x1f] ss:$16 sm:%s53_s15]   ;;  %s56_s18 = smov 12  ;;  %s61_s19 = smov 48 }
   0x3   :  { %v346_v2 = vld [vmem:[%s696_s0 + $0x1e] ss:$16 sm:%s103_s10]   ;;  %v101_v3 = vsel %vm34_vm0, %v345_v1, %v344_v0  ;;  %v336_v6 = vld [vmem:[%s696_s0 + $0x1f] ss:$16 sm:%s56_s18]   ;;  %s71_s24 = smov 3  ;;  %s74_s25 = smov 12 }
   0x4   :  { %v106_v5 = vsel %vm19_vm1, %v346_v2, %v101_v3  ;;  %v337_v7 = vld [vmem:[%s696_s0 + $0x1f] ss:$16 sm:%s61_s19]   ;;  %s400_s26 = smov 96   ;;  %v59_v8 = vsel %vm34_vm0, %v336_v6, %v335_v4  ;;  %v339_v9 = vld [vmem:[%s696_s0 + $0x6] ss:$16 sm:%s71_s24]   ;;  %s79_s29 = smov 48 }
   0x5   :  { %107 = vrot.lane.b32.xlu1 %v106_v5, %s400_s26  ;;  %s84_s30 = smov 192  ;;  %v64_v10 = vsel %vm19_vm1, %v337_v7, %v59_v8  ;;  %v340_v11 = vld [vmem:[%s696_s0 + $0x6] ss:$16 sm:%s74_s25]   ;;  %s29_s6 = smov 3  ;;  %vm90_vm6 = vcmask 917248   ;;  %vm132_vm7 = vcmask 786048  }
   0x6   :  { %v341_v12 = vld [vmem:[%s696_s0 + $0x6] ss:$16 sm:%s79_s29]   ;;  %s32_s7 = smov 12  ;;  %s401_s8 = smov 112   ;;  %v77_v13 = vsel %vm34_vm0, %v340_v11, %v339_v9  ;;  %v330_v16 = vld [vmem:[%s696_s0 + $0x7] ss:$16 sm:%s29_s6]  }
   0x7   :  { %65 = vrot.lane.b32.xlu0 %v64_v10, %s401_s8  ;;  %v342_v14 = vld [vmem:[%s696_s0 + $0x276] ss:$-88 sm:%s84_s30]   ;;  %s37_s11 = smov 48  ;;  %s42_s12 = smov 192  ;;  %v82_v15 = vsel %vm19_vm1, %v341_v12, %v77_v13  ;;  %vm174_vm8 = vcmask 654848   ;;  %vm216_vm9 = vcmask 523648  }
   0x8   :  { %v331_v17 = vld [vmem:[%s696_s0 + $0x7] ss:$16 sm:%s32_s7]   ;;  %s137_s17 = smov 3  ;;  %v87_v18 = vsel %vm44_vm2, %v342_v14, %v82_v15  ;;  %s140_s22 = smov 12  ;;  %vm258_vm10 = vcmask 392448   ;;  %vm300_vm11 = vcmask 261248  }
   0x9   :  { %v35_v19 = vsel %vm34_vm0, %v331_v17, %v330_v16  ;;  %v332_v20 = vld [vmem:[%s696_s0 + $0x7] ss:$16 sm:%s37_s11]   ;;  %s145_s23 = smov 48  ;;  %88 = vrot.lane.b32.xlu1 %v87_v18, %s400_s26  ;;  %s113_s26 = smov 3 }
   0xa   :  { %v333_v21 = vld [vmem:[%s696_s0 + $0x277] ss:$-88 sm:%s42_s12]   ;;  %v40_v22 = vsel %vm19_vm1, %v332_v20, %v35_v19  ;;  %v353_v23 = vld [vmem:[%s696_s0 + $0x1d] ss:$16 sm:%s137_s17]   ;;  %s116_s27 = smov 12  ;;  %s121_s3 = smov 48 }
   0xb   :  { %v45_v24 = vsel %vm44_vm2, %v333_v21, %v40_v22  ;;  %v354_v25 = vld [vmem:[%s696_s0 + $0x1d] ss:$16 sm:%s140_s22]   ;;  %s126_s4 = smov 192  ;;  %v348_v28 = vld [vmem:[%s696_s0 + $0x5] ss:$16 sm:%s113_s26]   ;;  %s179_s7 = smov 3 }
   0xc   :  { %v355_v26 = vld [vmem:[%s696_s0 + $0x1d] ss:$16 sm:%s145_s23]   ;;  %46 = vrot.lane.b32.xlu0 %v45_v24, %s401_s8  ;;  %v143_v27 = vsel %vm34_vm0, %v354_v25, %v353_v23  ;;  %s182_s12 = smov 12  ;;  %s187_s13 = smov 48 }
   0xd   :  { %v148_v29 = vsel %vm19_vm1, %v355_v26, %v143_v27  ;;  %v349_v30 = vld [vmem:[%s696_s0 + $0x5] ss:$16 sm:%s116_s27]   ;;  %s402_s14 = smov 80   ;;  %s155_s17 = smov 3  ;;  %v362_v35 = vld [vmem:[%s696_s0 + $0x1c] ss:$16 sm:%s179_s7]  }
   0xe   :  { %v350_v31 = vld [vmem:[%s696_s0 + $0x5] ss:$16 sm:%s121_s3]   ;;  %149 = vrot.lane.b32.xlu1 %v148_v29, %s402_s14  ;;  %v119_v32 = vsel %vm34_vm0, %v349_v30, %v348_v28  ;;  %s158_s18 = smov 12  ;;  %s163_s23 = smov 48 }
   0xf   :  { %v351_v33 = vld [vmem:[%s696_s0 + $0x275] ss:$-88 sm:%s126_s4]   ;;  %v124_v34 = vsel %vm19_vm1, %v350_v31, %v119_v32  ;;  %v363_v36 = vld [vmem:[%s696_s0 + $0x1c] ss:$16 sm:%s182_s12]   ;;  %s168_s28 = smov 192  ;;  %s221_s29 = smov 3 }
  0x10   :  { %v129_v37 = vsel %vm44_vm2, %v351_v33, %v124_v34  ;;  %v185_v38 = vsel %vm34_vm0, %v363_v36, %v362_v35  ;;  %v364_v39 = vld [vmem:[%s696_s0 + $0x1c] ss:$16 sm:%s187_s13]   ;;  %v357_v40 = vld [vmem:[%s696_s0 + $0x4] ss:$16 sm:%s155_s17]   ;;  %s224_s3 = smov 12  ;;  %s229_s4 = smov 48 }
  0x11   :  { %130 = vrot.lane.b32.xlu0 %v129_v37, %s402_s14  ;;  %v190_v41 = vsel %vm19_vm1, %v364_v39, %v185_v38  ;;  %v358_v42 = vld [vmem:[%s696_s0 + $0x4] ss:$16 sm:%s158_s18]   ;;  %s403_s5 = smov 64   ;;  %s197_s8 = smov 3 }
  0x12   :  { %191 = vrot.lane.b32.xlu1 %v190_v41, %s403_s5  ;;  %v161_v43 = vsel %vm34_vm0, %v358_v42, %v357_v40  ;;  %v359_v44 = vld [vmem:[%s696_s0 + $0x4] ss:$16 sm:%s163_s23]   ;;  %s200_s13 = smov 12  ;;  %s205_s14 = smov 48 }
  0x13   :  { %v166_v45 = vsel %vm19_vm1, %v359_v44, %v161_v43  ;;  %v360_v46 = vld [vmem:[%s696_s0 + $0x274] ss:$-88 sm:%s168_s28]   ;;  %v371_v47 = vld [vmem:[%s696_s0 + $0x1b] ss:$16 sm:%s221_s29]   ;;  %s210_s19 = smov 192  ;;  %s263_s22 = smov 3 }
  0x14   :  { %v171_v48 = vsel %vm44_vm2, %v360_v46, %v166_v45  ;;  %v372_v49 = vld [vmem:[%s696_s0 + $0x1b] ss:$16 sm:%s224_s3]   ;;  %v366_v52 = vld [vmem:[%s696_s0 + $0x3] ss:$16 sm:%s197_s8]   ;;  %s266_s23 = smov 12  ;;  %s271_s28 = smov 48 }
  0x15   :  { %v373_v50 = vld [vmem:[%s696_s0 + $0x1b] ss:$16 sm:%s229_s4]   ;;  %172 = vrot.lane.b32.xlu0 %v171_v48, %s403_s5  ;;  %v227_v51 = vsel %vm34_vm0, %v372_v49, %v371_v47  ;;  %s239_s29 = smov 3  ;;  %s404_s30 = smov 48  }
  0x16   :  { %v232_v53 = vsel %vm19_vm1, %v373_v50, %v227_v51  ;;  %v367_v54 = vld [vmem:[%s696_s0 + $0x3] ss:$16 sm:%s200_s13]   ;;  %s242_s4 = smov 12  ;;  %v380_v59 = vld [vmem:[%s696_s0 + $0x1a] ss:$16 sm:%s263_s22]   ;;  %s247_s9 = smov 48 }
  0x17   :  { %v368_v55 = vld [vmem:[%s696_s0 + $0x3] ss:$16 sm:%s205_s14]   ;;  %233 = vrot.lane.b32.xlu1 %v232_v53, %s404_s30  ;;  %v203_v56 = vsel %vm34_vm0, %v367_v54, %v366_v52  ;;  %s252_s14 = smov 192  ;;  %s305_s15 = smov 3 }
  0x18   :  { %v369_v57 = vld [vmem:[%s696_s0 + $0x273] ss:$-88 sm:%s210_s19]   ;;  %v208_v58 = vsel %vm19_vm1, %v368_v55, %v203_v56  ;;  %v381_v60 = vld [vmem:[%s696_s0 + $0x1a] ss:$16 sm:%s266_s23]   ;;  %s308_s18 = smov 12  ;;  %s313_s19 = smov 48 }
  0x19   :  { %v213_v61 = vsel %vm44_vm2, %v369_v57, %v208_v58  ;;  %v269_v62 = vsel %vm34_vm0, %v381_v60, %v380_v59  ;;  %v382_v63 = vld [vmem:[%s696_s0 + $0x1a] ss:$16 sm:%s271_s28]   ;;  %v375_v0 = vld [vmem:[%s696_s0 + $0x2] ss:$16 sm:%s239_s29]   ;;  %s405_s20 = smov 32   ;;  %s281_s23 = smov 3 }
  0x1a   :  { %214 = vrot.lane.b32.xlu0 %v213_v61, %s404_s30  ;;  %v274_v1 = vsel %vm19_vm1, %v382_v63, %v269_v62  ;;  %v376_v2 = vld [vmem:[%s696_s0 + $0x2] ss:$16 sm:%s242_s4]   ;;  %s284_s28 = smov 12  ;;  %s289_s29 = smov 48 }
  0x1b   :  { %275 = vrot.lane.b32.xlu1 %v274_v1, %s405_s20  ;;  %v245_v3 = vsel %vm34_vm0, %v376_v2, %v375_v0  ;;  %v377_v4 = vld [vmem:[%s696_s0 + $0x2] ss:$16 sm:%s247_s9]   ;;  %s294_s5 = smov 192  ;;  %s17_s8 = smov 48 }
  0x1c   :  { %v250_v5 = vsel %vm19_vm1, %v377_v4, %v245_v3  ;;  %v378_v6 = vld [vmem:[%s696_s0 + $0x272] ss:$-88 sm:%s252_s14]   ;;  %v389_v7 = vld [vmem:[%s696_s0 + $0x19] ss:$16 sm:%s305_s15]   ;;  %s406_s15 = smov 16  }
  0x1d   :  { %v255_v8 = vsel %vm44_vm2, %v378_v6, %v250_v5  ;;  %v390_v9 = vld [vmem:[%s696_s0 + $0x19] ss:$16 sm:%s308_s18]   ;;  %v384_v12 = vld [vmem:[%s696_s0 + $0x1] ss:$16 sm:%s281_s23]  }
  0x1e   :  { %v391_v10 = vld [vmem:[%s696_s0 + $0x19] ss:$16 sm:%s313_s19]   ;;  %256 = vrot.lane.b32.xlu0 %v255_v8, %s405_s20  ;;  %v311_v11 = vsel %vm34_vm0, %v390_v9, %v389_v7  ;;  %v325_v13 = vld [vmem:[%s696_s0 + $0x40] ss:$8 sm:$0xf]  }
  0x1f   :  { %v316_v14 = vsel %vm19_vm1, %v391_v10, %v311_v11  ;;  %v385_v15 = vld [vmem:[%s696_s0 + $0x1] ss:$16 sm:%s284_s28]   ;;  %v2_v19 = vld [vmem:[%s696_s0] ss:$8 sm:$0xf]  }
  0x20   :  { %v386_v16 = vld [vmem:[%s696_s0 + $0x1] ss:$16 sm:%s289_s29]   ;;  %317 = vrot.lane.b32.xlu1 %v316_v14, %s406_s15  ;;  %v287_v17 = vsel %vm34_vm0, %v385_v15, %v384_v12  ;;  %v3_v22 = vld [vmem:[%s696_s0] ss:$8 sm:$0xf0]  }
  0x21   :  { %v387_v18 = vld [vmem:[%s696_s0 + $0x271] ss:$-88 sm:%s294_s5]   ;;  %v292_v20 = vsel %vm19_vm1, %v386_v16, %v287_v17  ;;  %v326_v21 = vld [vmem:[%s696_s0 + $0x40] ss:$8 sm:%s17_s8]   ;;  %v5_v25 = vsel %vm4_vm3, %v3_v22, %v2_v19 }
  0x22   :  { %v297_v23 = vsel %vm44_vm2, %v387_v18, %v292_v20  ;;  %v20_v24 = vsel %vm19_vm1, %v326_v21, %v325_v13  ;;  %7 = vst.msk [vmem:[%s697_s1] ss:$8 sm:$0x3] %vm6_vm4, %v5_v25   ;;  %322 = vst.msk [vmem:[%s697_s1 - $0xf] ss:$8 sm:$0xc] %vm6_vm4, %v5_v25  }
  0x23   :  { %298 = vrot.lane.b32.xlu0 %v297_v23, %s406_s15  ;;  %327 = vst.msk [vmem:[%s697_s1 + $0x4] ss:$8 sm:$0x3] %vm6_vm4, %v20_v24   ;;  %328 = vst.msk [vmem:[%s697_s1 - $0xb] ss:$8 sm:$0xc] %vm6_vm4, %v20_v24  }
  0x24   :  { %329 = vst.msk [vmem:[%s697_s1 - $0x1a] ss:$8 sm:$0x30] %vm6_vm4, %v20_v24   ;;  %323 = vst.msk [vmem:[%s697_s1 - $0x1e] ss:$8 sm:$0x30] %vm6_vm4, %v5_v25  }
  0x25   :  { %324 = vst.msk [vmem:[%s697_s1 - $0x2d] ss:$8 sm:$0xc0] %vm6_vm4, %v5_v25  }
  0x77   :  { %v108_v26 = vpop.permute.xlu1 %107  }
  0x79   :  { %v66_v27 = vpop.permute.xlu0 %65  }
  0x7a   :  { %338 = vst.msk [vmem:[%s697_s1 + $0x9] sm:$0x3f] %vm48_vm5, %v66_v27  }
  0x7b   :  { %347 = vst.msk [vmem:[%s697_s1 + $0x9] sm:$0x3f] %vm90_vm6, %v108_v26   ;;  %v89_v28 = vpop.permute.xlu1 %88  }
  0x7e   :  { %v47_v29 = vpop.permute.xlu0 %46  }
  0x7f   :  { %334 = vst.msk [vmem:[%s697_s1 + $0x1] sm:$0x80] %vm48_vm5, %v47_v29   ;;  %49 = vst.msk [vmem:[%s697_s1] sm:$0x7f] %vm48_vm5, %v47_v29  }
  0x80   :  { %343 = vst.msk [vmem:[%s697_s1 + $0x1] sm:$0x80] %vm90_vm6, %v89_v28   ;;  %v150_v30 = vpop.permute.xlu1 %149   ;;  %91 = vst.msk [vmem:[%s697_s1] sm:$0x7f] %vm90_vm6, %v89_v28  }
  0x81   :  { %356 = vst.msk [vmem:[%s697_s1 + $0x9] sm:$0x3f] %vm132_vm7, %v150_v30  }
  0x83   :  { %v131_v31 = vpop.permute.xlu0 %130  }
  0x84   :  { %133 = vst.msk [vmem:[%s697_s1] sm:$0x7f] %vm132_vm7, %v131_v31   ;;  %352 = vst.msk [vmem:[%s697_s1 + $0x1] sm:$0x80] %vm132_vm7, %v131_v31   ;;  %v192_v32 = vpop.permute.xlu1 %191  }
  0x85   :  { %365 = vst.msk [vmem:[%s697_s1 + $0x9] sm:$0x3f] %vm174_vm8, %v192_v32  }
  0x87   :  { %v173_v33 = vpop.permute.xlu0 %172  }
  0x88   :  { %175 = vst.msk [vmem:[%s697_s1] sm:$0x7f] %vm174_vm8, %v173_v33   ;;  %361 = vst.msk [vmem:[%s697_s1 + $0x1] sm:$0x80] %vm174_vm8, %v173_v33  }
  0x89   :  { %v234_v34 = vpop.permute.xlu1 %233  }
  0x8a   :  { %374 = vst.msk [vmem:[%s697_s1 + $0x9] sm:$0x3f] %vm216_vm9, %v234_v34  }
  0x8c   :  { %v215_v35 = vpop.permute.xlu0 %214  }
  0x8d   :  { %217 = vst.msk [vmem:[%s697_s1] sm:$0x7f] %vm216_vm9, %v215_v35   ;;  %370 = vst.msk [vmem:[%s697_s1 + $0x1] sm:$0x80] %vm216_vm9, %v215_v35   ;;  %v276_v36 = vpop.permute.xlu1 %275  }
  0x8e   :  { %383 = vst.msk [vmem:[%s697_s1 + $0x9] sm:$0x3f] %vm258_vm10, %v276_v36  }
  0x90   :  { %v257_v37 = vpop.permute.xlu0 %256  }
  0x91   :  { %259 = vst.msk [vmem:[%s697_s1] sm:$0x7f] %vm258_vm10, %v257_v37   ;;  %379 = vst.msk [vmem:[%s697_s1 + $0x1] sm:$0x80] %vm258_vm10, %v257_v37  }
  0x92   :  { %v318_v38 = vpop.permute.xlu1 %317  }
  0x93   :  { %392 = vst.msk [vmem:[%s697_s1 + $0x9] sm:$0x3f] %vm300_vm11, %v318_v38  }
  0x95   :  { %v299_v39 = vpop.permute.xlu0 %298  }
  0x96   :  { %301 = vst.msk [vmem:[%s697_s1] sm:$0x7f] %vm300_vm11, %v299_v39   ;;  %388 = vst.msk [vmem:[%s697_s1 + $0x1] sm:$0x80] %vm300_vm11, %v299_v39  }

// kernel: tile.42
= control target key start
LH: loop header
LB: loop body
LE: loop exit
PB: predicated region body
PF: predicated region fallthrough
CT: control target
= control target key end

     0   :  { %vm5_vm0 = vcmask 1045508   ;;  %s14_s6 = smov 3  ;;  %s17_s7 = smov 12  ;;  %vm19_vm1 = vcmask 1043458   ;;  %vm7_vm2 = vcmask 130048   ;;  %vm28_vm3 = vcmask 1048448   ;;  %s299_s0 = inlined_call_operand.vmem [shape: f32[3,16,16], index: 0, kind: input, shape index: {}]   ;;  %s300_s1 = inlined_call_operand.vmem [shape: f32[3,256], index: 1, kind: output, shape index: {}]  }
   0x1   :  { %v160_v0 = vld [vmem:[%s299_s0 + $0x7] ss:$16 sm:%s14_s6]   ;;  %s22_s12 = smov 48  ;;  %s52_s15 = smov 3  ;;  %vm47_vm4 = vcmask 917248   ;;  %vm66_vm5 = vcmask 786048  }
   0x2   :  { %v161_v1 = vld [vmem:[%s299_s0 + $0x57] ss:$-24 sm:%s17_s7]   ;;  %s55_s16 = smov 12  ;;  %v166_v5 = vld [vmem:[%s299_s0 + $0x5] ss:$16 sm:%s52_s15]   ;;  %s60_s21 = smov 48 }
   0x3   :  { %v20_v2 = vsel %vm19_vm1, %v161_v1, %v160_v0  ;;  %v162_v3 = vld [vmem:[%s299_s0 - $0x21] ss:$16 sm:%s22_s12]   ;;  %v167_v6 = vld [vmem:[%s299_s0 + $0x55] ss:$-24 sm:%s55_s16]   ;;  %s189_s22 = smov 112   ;;  %s33_s25 = smov 3 }
   0x4   :  { %v25_v4 = vsel %vm5_vm0, %v162_v3, %v20_v2  ;;  %v58_v7 = vsel %vm19_vm1, %v167_v6, %v166_v5  ;;  %v168_v8 = vld [vmem:[%s299_s0 - $0x23] ss:$16 sm:%s60_s21]   ;;  %s36_s26 = smov 12  ;;  %v163_v10 = vld [vmem:[%s299_s0 + $0x6] ss:$16 sm:%s33_s25]   ;;  %s41_s2 = smov 48 }
   0x5   :  { %26 = vrot.lane.b32.xlu0 %v25_v4, %s189_s22  ;;  %v63_v9 = vsel %vm5_vm0, %v168_v8, %v58_v7  ;;  %v164_v11 = vld [vmem:[%s299_s0 + $0x56] ss:$-24 sm:%s36_s26]   ;;  %s190_s3 = smov 80   ;;  %s71_s6 = smov 3  ;;  %vm85_vm6 = vcmask 654848   ;;  %vm104_vm7 = vcmask 523648  }
   0x6   :  { %64 = vrot.lane.b32.xlu1 %v63_v9, %s190_s3  ;;  %v39_v12 = vsel %vm19_vm1, %v164_v11, %v163_v10  ;;  %v165_v13 = vld [vmem:[%s299_s0 - $0x22] ss:$16 sm:%s41_s2]   ;;  %s74_s7 = smov 12  ;;  %s79_s12 = smov 48  ;;  %vm123_vm8 = vcmask 392448   ;;  %vm142_vm9 = vcmask 261248  }
   0x7   :  { %v44_v14 = vsel %vm5_vm0, %v165_v13, %v39_v12  ;;  %v169_v15 = vld [vmem:[%s299_s0 + $0x4] ss:$16 sm:%s71_s6]   ;;  %s191_s13 = smov 96   ;;  %v171_v18 = vld [vmem:[%s299_s0 - $0x24] ss:$16 sm:%s79_s12]   ;;  %s90_s16 = smov 3 }
   0x8   :  { %v170_v16 = vld [vmem:[%s299_s0 + $0x54] ss:$-24 sm:%s74_s7]   ;;  %s93_s17 = smov 12  ;;  %v172_v20 = vld [vmem:[%s299_s0 + $0x3] ss:$16 sm:%s90_s16]   ;;  %s98_s22 = smov 48 }
   0x9   :  { %45 = vrot.lane.b32.xlu0 %v44_v14, %s191_s13  ;;  %v77_v17 = vsel %vm19_vm1, %v170_v16, %v169_v15  ;;  %v173_v21 = vld [vmem:[%s299_s0 + $0x53] ss:$-24 sm:%s93_s17]   ;;  %s192_s23 = smov 64   ;;  %s109_s26 = smov 3 }
   0xa   :  { %v82_v19 = vsel %vm5_vm0, %v171_v18, %v77_v17  ;;  %v96_v22 = vsel %vm19_vm1, %v173_v21, %v172_v20  ;;  %v174_v23 = vld [vmem:[%s299_s0 - $0x25] ss:$16 sm:%s98_s22]   ;;  %s112_s27 = smov 12  ;;  %v175_v25 = vld [vmem:[%s299_s0 + $0x2] ss:$16 sm:%s109_s26]   ;;  %s117_s3 = smov 48 }
   0xb   :  { %83 = vrot.lane.b32.xlu1 %v82_v19, %s192_s23  ;;  %v101_v24 = vsel %vm5_vm0, %v174_v23, %v96_v22  ;;  %v176_v26 = vld [vmem:[%s299_s0 + $0x52] ss:$-24 sm:%s112_s27]   ;;  %s193_s4 = smov 48   ;;  %s128_s7 = smov 3 }
   0xc   :  { %v115_v27 = vsel %vm19_vm1, %v176_v26, %v175_v25  ;;  %v177_v28 = vld [vmem:[%s299_s0 - $0x26] ss:$16 sm:%s117_s3]   ;;  %s131_s8 = smov 12  ;;  %v178_v30 = vld [vmem:[%s299_s0 + $0x1] ss:$16 sm:%s128_s7]   ;;  %s136_s13 = smov 48 }
   0xd   :  { %102 = vrot.lane.b32.xlu0 %v101_v24, %s193_s4  ;;  %v120_v29 = vsel %vm5_vm0, %v177_v28, %v115_v27  ;;  %v179_v31 = vld [vmem:[%s299_s0 + $0x51] ss:$-24 sm:%s131_s8]   ;;  %s194_s14 = smov 32   ;;  %v2_v34 = vld [vmem:[%s299_s0] ss:$8 sm:$0xf]  }
   0xe   :  { %v134_v32 = vsel %vm19_vm1, %v179_v31, %v178_v30  ;;  %v180_v33 = vld [vmem:[%s299_s0 - $0x27] ss:$16 sm:%s136_s13]   ;;  %s3_s19 = smov 48 }
   0xf   :  { %121 = vrot.lane.b32.xlu1 %v120_v29, %s194_s14  ;;  %v139_v35 = vsel %vm5_vm0, %v180_v33, %v134_v32  ;;  %v4_v36 = vld [vmem:[%s299_s0] ss:$8 sm:%s3_s19]   ;;  %s195_s0 = smov 16  }
  0x10   :  { %v6_v37 = vsel %vm5_vm0, %v4_v36, %v2_v34 }
  0x11   :  { %140 = vrot.lane.b32.xlu0 %v139_v35, %s195_s0  ;;  %8 = vst.msk [vmem:[#allocation0] ss:$8 sm:$0x3] %vm7_vm2, %v6_v37   ;;  %10 = vst.msk [vmem:[#allocation0 - $0xf] ss:$8 sm:$0xc] %vm7_vm2, %v6_v37  }
  0x12   :  { %12 = vst.msk [vmem:[#allocation0 - $0x1e] ss:$8 sm:$0x30] %vm7_vm2, %v6_v37  }
  0x77   :  { %v27_v38 = vpop.permute.xlu0 %26  }
  0x78   :  { %29 = vst.msk [vmem:[#allocation0] sm:$0x7] %vm28_vm3, %v27_v38   ;;  %31 = vst.msk [vmem:[#allocation0 + $0x5] sm:$0x38] %vm28_vm3, %v27_v38   ;;  %v65_v39 = vpop.permute.xlu1 %64  }
  0x7b   :  { %v46_v40 = vpop.permute.xlu0 %45  }
  0x7c   :  { %48 = vst.msk [vmem:[#allocation0] sm:$0x7] %vm47_vm4, %v46_v40   ;;  %50 = vst.msk [vmem:[#allocation0 + $0x5] sm:$0x38] %vm47_vm4, %v46_v40  }
  0x7d   :  { %67 = vst.msk [vmem:[#allocation0] sm:$0x7] %vm66_vm5, %v65_v39   ;;  %69 = vst.msk [vmem:[#allocation0 + $0x5] sm:$0x38] %vm66_vm5, %v65_v39   ;;  %v84_v41 = vpop.permute.xlu1 %83  }
  0x7e   :  { %86 = vst.msk [vmem:[#allocation0] sm:$0x7] %vm85_vm6, %v84_v41   ;;  %88 = vst.msk [vmem:[#allocation0 + $0x5] sm:$0x38] %vm85_vm6, %v84_v41  }
  0x7f   :  { %v103_v42 = vpop.permute.xlu0 %102  }
  0x80   :  { %105 = vst.msk [vmem:[#allocation0] sm:$0x7] %vm104_vm7, %v103_v42   ;;  %107 = vst.msk [vmem:[#allocation0 + $0x5] sm:$0x38] %vm104_vm7, %v103_v42  }
  0x81   :  { %v122_v43 = vpop.permute.xlu1 %121  }
  0x82   :  { %124 = vst.msk [vmem:[#allocation0] sm:$0x7] %vm123_vm8, %v122_v43   ;;  %126 = vst.msk [vmem:[#allocation0 + $0x5] sm:$0x38] %vm123_vm8, %v122_v43  }
  0x83   :  { %v141_v44 = vpop.permute.xlu0 %140  }
  0x84   :  { %143 = vst.msk [vmem:[#allocation0] sm:$0x7] %vm142_vm9, %v141_v44   ;;  %145 = vst.msk [vmem:[#allocation0 + $0x5] sm:$0x38] %vm142_vm9, %v141_v44  }
  0x8b   :  { %v150_v45 = vld [vmem:[#allocation0] sm:$0xf]  ;;  %v155_v46 = vld [vmem:[#allocation0 + $0x8] sm:$0xf] }
  0x8c   :  { %153 = vst [vmem:[%s300_s1] sm:$0xf] %v150_v45  ;;  %181 = vst [vmem:[%s300_s1 + $0x4] sm:$0xf] %v155_v46 }

// kernel: lska15_forward.1
= control target key start
LH: loop header
LB: loop body
LE: loop exit
PB: predicated region body
PF: predicated region fallthrough
CT: control target
= control target key end

     0   :  { %vm577_vm0 = vcmask 261120   ;;  %s7616_s1 = inlined_call_operand.vmem [shape: f32[256,256], index: 1, kind: input, shape index: {}]   ;;  %s7617_s0 = inlined_call_operand.vmem [shape: f32[32,256], index: 0, kind: input, shape index: {}]   ;;  %s7618_s13 = inlined_call_operand.vmem [shape: f32[256,256], index: 13, kind: input, shape index: {}]   ;;  %s7619_s2 = inlined_call_operand.vmem [shape: f32[1,256], index: 2, kind: input, shape index: {}]   ;;  %s7620_s14 = inlined_call_operand.vmem [shape: f32[1,256], index: 14, kind: input, shape index: {}]   ;;  %s7621_s15 = inlined_call_operand.vmem [shape: f32[1,256], index: 15, kind: input, shape index: {}]   ;;  %s7622_s3 = inlined_call_operand.vmem [shape: f32[3,32,32], index: 3, kind: input, shape index: {}]   ;;  %s7623_s6 = inlined_call_operand.vmem [shape: f32[256,256], index: 6, kind: input, shape index: {}]   ;;  %s7624_s4 = inlined_call_operand.vmem [shape: f32[3,256], index: 4, kind: input, shape index: {}]   ;;  %s7625_s5 = inlined_call_operand.vmem [shape: f32[1,256], index: 5, kind: input, shape index: {}]   ;;  %s7626_s7 = inlined_call_operand.vmem [shape: f32[1,256], index: 7, kind: input, shape index: {}]   ;;  %s7627_s8 = inlined_call_operand.vmem [shape: f32[7,32,32], index: 8, kind: input, shape index: {}]   ;;  %s7628_s11 = inlined_call_operand.vmem [shape: f32[256,256], index: 11, kind: input, shape index: {}]   ;;  %s7629_s9 = inlined_call_operand.vmem [shape: f32[7,256], index: 9, kind: input, shape index: {}]   ;;  %s7630_s10 = inlined_call_operand.vmem [shape: f32[1,256], index: 10, kind: input, shape index: {}]   ;;  %s7631_s12 = inlined_call_operand.vmem [shape: f32[1,256], index: 12, kind: input, shape index: {}]   ;;  %s7632_s16 = inlined_call_operand.vmem [shape: f32[32,256], index: 16, kind: output, shape index: {}]  }
   0x1   :  { %7881 = sst [smem:[#allocation75_spill]] %s7616_s1  ;;  %v120_v24 = vld [vmem:[%s7617_s0 + $0x8] sm:$0xff]  ;;  %v4155_v28 = vld [vmem:[%s7618_s13 + $0xf8] sm:$0xff]  ;;  %v4160_v29 = vld [vmem:[%s7618_s13 + $0xf0] sm:$0xff] }
   0x2   :  { %s7882_s23 = sld [smem:[#allocation75_spill]]  ;;  %267 = vmatprep.mubr.f32.mxu0 %v120_v24  ;;  %v4165_v30 = vld [vmem:[%s7618_s13 + $0xe8] sm:$0xff]  ;;  %344 = vmatprep.subr.mxu1 %v4155_v28  ;;  %v4174_v32 = vld [vmem:[%s7618_s13 + $0xe0] sm:$0xff]  ;;  %v4183_v34 = vld [vmem:[%s7618_s13 + $0xd8] sm:$0xff] }
   0x3   :  { %345 = vmatpush1.msra.mxu1 %v4160_v29  ;;  %v4192_v36 = vld [vmem:[%s7618_s13 + $0xd0] sm:$0xff]  ;;  %v4201_v38 = vld [vmem:[%s7618_s13 + $0xc8] sm:$0xff]  ;;  %v4210_v40 = vld [vmem:[%s7618_s13 + $0xc0] sm:$0xff] }
   0x4   :  { %346 = vmatprep.subr.mxu1 %v4165_v30  ;;  %v4219_v42 = vld [vmem:[%s7618_s13 + $0xb8] sm:$0xff]  ;;  %v4228_v44 = vld [vmem:[%s7618_s13 + $0xb0] sm:$0xff]  ;;  %v4237_v46 = vld [vmem:[%s7618_s13 + $0xa8] sm:$0xff] }
   0x5   :  { %347 = vmatpush1.msra.mxu1 %v4174_v32  ;;  %v4246_v48 = vld [vmem:[%s7618_s13 + $0xa0] sm:$0xff]  ;;  %v4255_v50 = vld [vmem:[%s7618_s13 + $0x98] sm:$0xff]  ;;  %v4264_v52 = vld [vmem:[%s7618_s13 + $0x90] sm:$0xff] }
   0x6   :  { %348 = vmatprep.subr.mxu1 %v4183_v34  ;;  %v4273_v54 = vld [vmem:[%s7618_s13 + $0x88] sm:$0xff]  ;;  %v4282_v56 = vld [vmem:[%s7618_s13 + $0x80] sm:$0xff]  ;;  %v4291_v58 = vld [vmem:[%s7618_s13 + $0x78] sm:$0xff] }
   0x7   :  { %349 = vmatpush1.msra.mxu1 %v4192_v36  ;;  %v4300_v60 = vld [vmem:[%s7618_s13 + $0x70] sm:$0xff]  ;;  %v4309_v62 = vld [vmem:[%s7618_s13 + $0x68] sm:$0xff] }
   0x8   :  { %v158_v0 = vld [vmem:[%s7882_s23 + $0xf8] sm:$0xff]  ;;  %v157_v1 = vld [vmem:[%s7882_s23 + $0xf0] sm:$0xff]  ;;  %v156_v2 = vld [vmem:[%s7882_s23 + $0xe8] sm:$0xff]  ;;  %350 = vmatprep.subr.mxu1 %v4201_v38 }
   0x9   :  { %203 = vmatprep.subr.mxu0 %v158_v0  ;;  %v155_v3 = vld [vmem:[%s7882_s23 + $0xe0] sm:$0xff]  ;;  %v154_v4 = vld [vmem:[%s7882_s23 + $0xd8] sm:$0xff]  ;;  %v153_v5 = vld [vmem:[%s7882_s23 + $0xd0] sm:$0xff]  ;;  %351 = vmatpush1.msra.mxu1 %v4210_v40 }
   0xa   :  { %204 = vmatpush1.msra.mxu0 %v157_v1  ;;  %v152_v6 = vld [vmem:[%s7882_s23 + $0xc8] sm:$0xff]  ;;  %v151_v7 = vld [vmem:[%s7882_s23 + $0xc0] sm:$0xff]  ;;  %v150_v8 = vld [vmem:[%s7882_s23 + $0xb8] sm:$0xff]  ;;  %352 = vmatprep.subr.mxu1 %v4219_v42 }
   0xb   :  { %205 = vmatprep.subr.mxu0 %v156_v2  ;;  %v149_v9 = vld [vmem:[%s7882_s23 + $0xb0] sm:$0xff]  ;;  %v148_v10 = vld [vmem:[%s7882_s23 + $0xa8] sm:$0xff]  ;;  %v147_v11 = vld [vmem:[%s7882_s23 + $0xa0] sm:$0xff]  ;;  %353 = vmatpush1.msra.mxu1 %v4228_v44 }
   0xc   :  { %206 = vmatpush1.msra.mxu0 %v155_v3  ;;  %v146_v12 = vld [vmem:[%s7882_s23 + $0x98] sm:$0xff]  ;;  %v145_v13 = vld [vmem:[%s7882_s23 + $0x90] sm:$0xff]  ;;  %v144_v14 = vld [vmem:[%s7882_s23 + $0x88] sm:$0xff]  ;;  %354 = vmatprep.subr.mxu1 %v4237_v46 }
   0xd   :  { %207 = vmatprep.subr.mxu0 %v154_v4  ;;  %v143_v15 = vld [vmem:[%s7882_s23 + $0x80] sm:$0xff]  ;;  %v142_v16 = vld [vmem:[%s7882_s23 + $0x78] sm:$0xff]  ;;  %v141_v17 = vld [vmem:[%s7882_s23 + $0x70] sm:$0xff]  ;;  %355 = vmatpush1.msra.mxu1 %v4246_v48 }
   0xe   :  { %208 = vmatpush1.msra.mxu0 %v153_v5  ;;  %v140_v18 = vld [vmem:[%s7882_s23 + $0x68] sm:$0xff]  ;;  %v139_v19 = vld [vmem:[%s7882_s23 + $0x60] sm:$0xff]  ;;  %v138_v20 = vld [vmem:[%s7882_s23 + $0x58] sm:$0xff]  ;;  %356 = vmatprep.subr.mxu1 %v4255_v50 }
   0xf   :  { %209 = vmatprep.subr.mxu0 %v152_v6  ;;  %v137_v21 = vld [vmem:[%s7882_s23 + $0x50] sm:$0xff]  ;;  %v136_v22 = vld [vmem:[%s7882_s23 + $0x48] sm:$0xff]  ;;  %v135_v23 = vld [vmem:[%s7882_s23 + $0x40] sm:$0xff]  ;;  %357 = vmatpush1.msra.mxu1 %v4264_v52 }
  0x10   :  { %210 = vmatpush1.msra.mxu0 %v151_v7  ;;  %v134_v25 = vld [vmem:[%s7882_s23 + $0x38] sm:$0xff]  ;;  %v133_v26 = vld [vmem:[%s7882_s23 + $0x30] sm:$0xff]  ;;  %v132_v27 = vld [vmem:[%s7882_s23 + $0x28] sm:$0xff]  ;;  %358 = vmatprep.subr.mxu1 %v4273_v54 }
  0x11   :  { %211 = vmatprep.subr.mxu0 %v150_v8  ;;  %v131_v31 = vld [vmem:[%s7882_s23 + $0x20] sm:$0xff]  ;;  %v130_v33 = vld [vmem:[%s7882_s23 + $0x18] sm:$0xff]  ;;  %v129_v35 = vld [vmem:[%s7882_s23 + $0x10] sm:$0xff]  ;;  %359 = vmatpush1.msra.mxu1 %v4282_v56 }
  0x12   :  { %212 = vmatpush1.msra.mxu0 %v149_v9  ;;  %v128_v37 = vld [vmem:[%s7882_s23 + $0x8] sm:$0xff]  ;;  %v127_v39 = vld [vmem:[%s7882_s23] sm:$0xff]  ;;  %v190_v41 = vld [vmem:[%s7882_s23 + $0x1f8] sm:$0xff]  ;;  %360 = vmatprep.subr.mxu1 %v4291_v58 }
  0x13   :  { %213 = vmatprep.subr.mxu0 %v148_v10  ;;  %v189_v43 = vld [vmem:[%s7882_s23 + $0x1f0] sm:$0xff]  ;;  %v188_v45 = vld [vmem:[%s7882_s23 + $0x1e8] sm:$0xff]  ;;  %v187_v47 = vld [vmem:[%s7882_s23 + $0x1e0] sm:$0xff]  ;;  %361 = vmatpush1.msra.mxu1 %v4300_v60 }
  0x14   :  { %214 = vmatpush1.msra.mxu0 %v147_v11  ;;  %v186_v49 = vld [vmem:[%s7882_s23 + $0x1d8] sm:$0xff]  ;;  %v185_v51 = vld [vmem:[%s7882_s23 + $0x1d0] sm:$0xff]  ;;  %v184_v53 = vld [vmem:[%s7882_s23 + $0x1c8] sm:$0xff]  ;;  %362 = vmatprep.subr.mxu1 %v4309_v62 }
  0x15   :  { %215 = vmatprep.subr.mxu0 %v146_v12  ;;  %v183_v55 = vld [vmem:[%s7882_s23 + $0x1c0] sm:$0xff]  ;;  %v182_v57 = vld [vmem:[%s7882_s23 + $0x1b8] sm:$0xff]  ;;  %v181_v59 = vld [vmem:[%s7882_s23 + $0x1b0] sm:$0xff] }
  0x16   :  { %216 = vmatpush1.msra.mxu0 %v145_v13  ;;  %v180_v61 = vld [vmem:[%s7882_s23 + $0x1a8] sm:$0xff]  ;;  %v179_v63 = vld [vmem:[%s7882_s23 + $0x1a0] sm:$0xff]  ;;  %v178_v1 = vld [vmem:[%s7882_s23 + $0x198] sm:$0xff] }
  0x17   :  { %217 = vmatprep.subr.mxu0 %v144_v14  ;;  %v4318_v0 = vld [vmem:[%s7618_s13 + $0x60] sm:$0xff]  ;;  %v4327_v2 = vld [vmem:[%s7618_s13 + $0x58] sm:$0xff]  ;;  %v177_v3 = vld [vmem:[%s7882_s23 + $0x190] sm:$0xff] }
  0x18   :  { %218 = vmatpush1.msra.mxu0 %v143_v15  ;;  %v4336_v4 = vld [vmem:[%s7618_s13 + $0x50] sm:$0xff]  ;;  %v176_v5 = vld [vmem:[%s7882_s23 + $0x188] sm:$0xff]  ;;  %363 = vmatpush1.msra.mxu1 %v4318_v0  ;;  %v175_v7 = vld [vmem:[%s7882_s23 + $0x180] sm:$0xff] }
  0x19   :  { %219 = vmatprep.subr.mxu0 %v142_v16  ;;  %v4345_v6 = vld [vmem:[%s7618_s13 + $0x48] sm:$0xff]  ;;  %364 = vmatprep.subr.mxu1 %v4327_v2  ;;  %v4354_v8 = vld [vmem:[%s7618_s13 + $0x40] sm:$0xff]  ;;  %v174_v9 = vld [vmem:[%s7882_s23 + $0x178] sm:$0xff] }
  0x1a   :  { %220 = vmatpush1.msra.mxu0 %v141_v17  ;;  %365 = vmatpush1.msra.mxu1 %v4336_v4  ;;  %v4363_v10 = vld [vmem:[%s7618_s13 + $0x38] sm:$0xff]  ;;  %v173_v11 = vld [vmem:[%s7882_s23 + $0x170] sm:$0xff]  ;;  %v172_v13 = vld [vmem:[%s7882_s23 + $0x168] sm:$0xff] }
  0x1b   :  { %221 = vmatprep.subr.mxu0 %v140_v18  ;;  %366 = vmatprep.subr.mxu1 %v4345_v6  ;;  %v4372_v12 = vld [vmem:[%s7618_s13 + $0x30] sm:$0xff]  ;;  %v4381_v14 = vld [vmem:[%s7618_s13 + $0x28] sm:$0xff]  ;;  %v171_v15 = vld [vmem:[%s7882_s23 + $0x160] sm:$0xff] }
  0x1c   :  { %222 = vmatpush1.msra.mxu0 %v139_v19  ;;  %367 = vmatpush1.msra.mxu1 %v4354_v8  ;;  %v4390_v16 = vld [vmem:[%s7618_s13 + $0x20] sm:$0xff]  ;;  %v170_v17 = vld [vmem:[%s7882_s23 + $0x158] sm:$0xff]  ;;  %v169_v19 = vld [vmem:[%s7882_s23 + $0x150] sm:$0xff] }
  0x1d   :  { %223 = vmatprep.subr.mxu0 %v138_v20  ;;  %368 = vmatprep.subr.mxu1 %v4363_v10  ;;  %7883 = vst [vmem:[#allocation2_spill] sm:$0xff] %v4390_v16  ;;  %v4399_v18 = vld [vmem:[%s7618_s13 + $0x18] sm:$0xff]  ;;  %v4408_v20 = vld [vmem:[%s7618_s13 + $0x10] sm:$0xff] }
  0x1e   :  { %224 = vmatpush1.msra.mxu0 %v137_v21  ;;  %369 = vmatpush1.msra.mxu1 %v4372_v12  ;;  %7884 = vst [vmem:[#allocation3_spill] sm:$0xff] %v4399_v18  ;;  %7885 = vst [vmem:[#allocation4_spill] sm:$0xff] %v4408_v20  ;;  %v168_v21 = vld [vmem:[%s7882_s23 + $0x148] sm:$0xff]  ;;  %v165_v24 = vld [vmem:[%s7882_s23 + $0x130] sm:$0xff] }
  0x1f   :  { %225 = vmatprep.subr.mxu0 %v136_v22  ;;  %370 = vmatprep.subr.mxu1 %v4381_v14  ;;  %v167_v22 = vld [vmem:[%s7882_s23 + $0x140] sm:$0xff] }
  0x20   :  { %226 = vmatpush1.msra.mxu0 %v135_v23  ;;  %371 = vmatpush1.msra.mxu1 %v4390_v16  ;;  %v166_v23 = vld [vmem:[%s7882_s23 + $0x138] sm:$0xff] }
  0x21   :  { %227 = vmatprep.subr.mxu0 %v134_v25  ;;  %372 = vmatprep.subr.mxu1 %v4399_v18  ;;  %v164_v25 = vld [vmem:[%s7882_s23 + $0x128] sm:$0xff] }
  0x22   :  { %228 = vmatpush1.msra.mxu0 %v133_v26  ;;  %373 = vmatpush1.msra.mxu1 %v4408_v20  ;;  %v163_v26 = vld [vmem:[%s7882_s23 + $0x120] sm:$0xff] }
  0x23   :  { %229 = vmatprep.subr.mxu0 %v132_v27  ;;  %v162_v27 = vld [vmem:[%s7882_s23 + $0x118] sm:$0xff] }
  0x24   :  { %230 = vmatpush1.msra.mxu0 %v131_v31  ;;  %v161_v31 = vld [vmem:[%s7882_s23 + $0x110] sm:$0xff] }
  0x25   :  { %231 = vmatprep.subr.mxu0 %v130_v33  ;;  %v160_v33 = vld [vmem:[%s7882_s23 + $0x108] sm:$0xff] }
  0x26   :  { %232 = vmatpush1.msra.mxu0 %v129_v35  ;;  %v159_v35 = vld [vmem:[%s7882_s23 + $0x100] sm:$0xff] }
  0x27   :  { %233 = vmatprep.subr.mxu0 %v128_v37  ;;  %v119_v37 = vld [vmem:[%s7617_s0] sm:$0xff] }
  0x28   :  { %234 = vmatpush1.msra.mxu0 %v127_v39  ;;  %v122_v39 = vld [vmem:[%s7617_s0 + $0x18] sm:$0xff] }
  0x29   :  { %235 = vmatprep.subr.mxu0 %v190_v41  ;;  %v121_v41 = vld [vmem:[%s7617_s0 + $0x10] sm:$0xff] }
  0x2a   :  { %236 = vmatpush2.msra.mxu0 %v189_v43  ;;  %v124_v43 = vld [vmem:[%s7617_s0 + $0x28] sm:$0xff] }
  0x2b   :  { %237 = vmatprep.subr.mxu0 %v188_v45  ;;  %v123_v45 = vld [vmem:[%s7617_s0 + $0x20] sm:$0xff] }
  0x2c   :  { %238 = vmatpush2.msra.mxu0 %v187_v47  ;;  %v126_v47 = vld [vmem:[%s7617_s0 + $0x38] sm:$0xff] }
  0x2d   :  { %239 = vmatprep.subr.mxu0 %v186_v49  ;;  %v125_v49 = vld [vmem:[%s7617_s0 + $0x30] sm:$0xff] }
  0x2e   :  { %240 = vmatpush2.msra.mxu0 %v185_v51  ;;  %v4497_v51 = vld [vmem:[%s7618_s13 + $0x8] sm:$0xff] }
  0x2f   :  { %241 = vmatprep.subr.mxu0 %v184_v53  ;;  %7886 = vst [vmem:[#allocation5_spill] sm:$0xff] %v4497_v51  ;;  %374 = vmatprep.subr.mxu1 %v4497_v51  ;;  %v4503_v53 = vld [vmem:[%s7618_s13] sm:$0xff] }
  0x30   :  { %242 = vmatpush2.msra.mxu0 %v183_v55  ;;  %7887 = vst [vmem:[#allocation6_spill] sm:$0xff] %v4503_v53  ;;  %375 = vmatpush1.msra.mxu1 %v4503_v53  ;;  %v4510_v55 = vld [vmem:[%s7618_s13 + $0x1f8] sm:$0xff] }
  0x31   :  { %243 = vmatprep.subr.mxu0 %v182_v57  ;;  %7888 = vst [vmem:[#allocation7_spill] sm:$0xff] %v4510_v55  ;;  %376 = vmatprep.subr.mxu1 %v4510_v55  ;;  %v4517_v57 = vld [vmem:[%s7618_s13 + $0x1f0] sm:$0xff] }
  0x32   :  { %244 = vmatpush2.msra.mxu0 %v181_v59  ;;  %7889 = vst [vmem:[#allocation8_spill] sm:$0xff] %v4517_v57  ;;  %377 = vmatpush2.msra.mxu1 %v4517_v57  ;;  %v4524_v59 = vld [vmem:[%s7618_s13 + $0x1e8] sm:$0xff] }
  0x33   :  { %245 = vmatprep.subr.mxu0 %v180_v61  ;;  %7890 = vst [vmem:[#allocation9_spill] sm:$0xff] %v4524_v59  ;;  %378 = vmatprep.subr.mxu1 %v4524_v59  ;;  %v4531_v61 = vld [vmem:[%s7618_s13 + $0x1e0] sm:$0xff] }
  0x34   :  { %246 = vmatpush2.msra.mxu0 %v179_v63  ;;  %7891 = vst [vmem:[#allocation10_spill] sm:$0xff] %v4531_v61  ;;  %379 = vmatpush2.msra.mxu1 %v4531_v61  ;;  %v4538_v63 = vld [vmem:[%s7618_s13 + $0x1d8] sm:$0xff] }
  0x35   :  { %247 = vmatprep.subr.mxu0 %v178_v1  ;;  %7892 = vst [vmem:[#allocation11_spill] sm:$0xff] %v4538_v63  ;;  %380 = vmatprep.subr.mxu1 %v4538_v63  ;;  %v4545_v1 = vld [vmem:[%s7618_s13 + $0x1d0] sm:$0xff] }
  0x36   :  { %248 = vmatpush2.msra.mxu0 %v177_v3  ;;  %7893 = vst [vmem:[#allocation12_spill] sm:$0xff] %v4545_v1  ;;  %381 = vmatpush2.msra.mxu1 %v4545_v1  ;;  %v4552_v3 = vld [vmem:[%s7618_s13 + $0x1c8] sm:$0xff] }
  0x37   :  { %249 = vmatprep.subr.mxu0 %v176_v5  ;;  %7894 = vst [vmem:[#allocation13_spill] sm:$0xff] %v4552_v3  ;;  %382 = vmatprep.subr.mxu1 %v4552_v3  ;;  %v4559_v5 = vld [vmem:[%s7618_s13 + $0x1c0] sm:$0xff] }
  0x38   :  { %250 = vmatpush2.msra.mxu0 %v175_v7  ;;  %7895 = vst [vmem:[#allocation14_spill] sm:$0xff] %v4559_v5  ;;  %383 = vmatpush2.msra.mxu1 %v4559_v5  ;;  %v4567_v7 = vld [vmem:[%s7618_s13 + $0x1b8] sm:$0xff] }
  0x39   :  { %251 = vmatprep.subr.mxu0 %v174_v9  ;;  %7896 = vst [vmem:[#allocation15_spill] sm:$0xff] %v4567_v7  ;;  %384 = vmatprep.subr.mxu1 %v4567_v7  ;;  %v4573_v9 = vld [vmem:[%s7618_s13 + $0x1b0] sm:$0xff] }
  0x3a   :  { %252 = vmatpush2.msra.mxu0 %v173_v11  ;;  %7897 = vst [vmem:[#allocation16_spill] sm:$0xff] %v4573_v9  ;;  %385 = vmatpush2.msra.mxu1 %v4573_v9  ;;  %v4580_v11 = vld [vmem:[%s7618_s13 + $0x1a8] sm:$0xff] }
  0x3b   :  { %253 = vmatprep.subr.mxu0 %v172_v13  ;;  %7898 = vst [vmem:[#allocation17_spill] sm:$0xff] %v4580_v11  ;;  %386 = vmatprep.subr.mxu1 %v4580_v11  ;;  %v4587_v13 = vld [vmem:[%s7618_s13 + $0x1a0] sm:$0xff] }
  0x3c   :  { %254 = vmatpush2.msra.mxu0 %v171_v15  ;;  %7899 = vst [vmem:[#allocation18_spill] sm:$0xff] %v4587_v13  ;;  %387 = vmatpush2.msra.mxu1 %v4587_v13  ;;  %v4594_v15 = vld [vmem:[%s7618_s13 + $0x198] sm:$0xff] }
  0x3d   :  { %255 = vmatprep.subr.mxu0 %v170_v17  ;;  %7900 = vst [vmem:[#allocation19_spill] sm:$0xff] %v4594_v15  ;;  %388 = vmatprep.subr.mxu1 %v4594_v15  ;;  %v4601_v17 = vld [vmem:[%s7618_s13 + $0x190] sm:$0xff] }
  0x3e   :  { %256 = vmatpush2.msra.mxu0 %v169_v19  ;;  %7901 = vst [vmem:[#allocation20_spill] sm:$0xff] %v4601_v17  ;;  %389 = vmatpush2.msra.mxu1 %v4601_v17  ;;  %v4608_v19 = vld [vmem:[%s7618_s13 + $0x188] sm:$0xff] }
  0x3f   :  { %257 = vmatprep.subr.mxu0 %v168_v21  ;;  %7902 = vst [vmem:[#allocation21_spill] sm:$0xff] %v4608_v19  ;;  %390 = vmatprep.subr.mxu1 %v4608_v19  ;;  %v4615_v21 = vld [vmem:[%s7618_s13 + $0x180] sm:$0xff] }
  0x40   :  { %258 = vmatpush2.msra.mxu0 %v167_v22  ;;  %7903 = vst [vmem:[#allocation22_spill] sm:$0xff] %v4615_v21  ;;  %391 = vmatpush2.msra.mxu1 %v4615_v21  ;;  %v4622_v22 = vld [vmem:[%s7618_s13 + $0x178] sm:$0xff] }
  0x41   :  { %259 = vmatprep.subr.mxu0 %v166_v23  ;;  %7904 = vst [vmem:[#allocation23_spill] sm:$0xff] %v4622_v22  ;;  %392 = vmatprep.subr.mxu1 %v4622_v22  ;;  %v4629_v23 = vld [vmem:[%s7618_s13 + $0x170] sm:$0xff] }
  0x42   :  { %260 = vmatpush2.msra.mxu0 %v165_v24  ;;  %7905 = vst [vmem:[#allocation24_spill] sm:$0xff] %v4629_v23  ;;  %393 = vmatpush2.msra.mxu1 %v4629_v23  ;;  %v4636_v24 = vld [vmem:[%s7618_s13 + $0x168] sm:$0xff] }
  0x43   :  { %261 = vmatprep.subr.mxu0 %v164_v25  ;;  %7906 = vst [vmem:[#allocation25_spill] sm:$0xff] %v4636_v24  ;;  %394 = vmatprep.subr.mxu1 %v4636_v24  ;;  %v4643_v25 = vld [vmem:[%s7618_s13 + $0x160] sm:$0xff] }
  0x44   :  { %262 = vmatpush2.msra.mxu0 %v163_v26  ;;  %7907 = vst [vmem:[#allocation26_spill] sm:$0xff] %v4643_v25  ;;  %395 = vmatpush2.msra.mxu1 %v4643_v25  ;;  %v4650_v26 = vld [vmem:[%s7618_s13 + $0x158] sm:$0xff] }
  0x45   :  { %263 = vmatprep.subr.mxu0 %v162_v27  ;;  %7908 = vst [vmem:[#allocation27_spill] sm:$0xff] %v4650_v26  ;;  %396 = vmatprep.subr.mxu1 %v4650_v26  ;;  %v4657_v27 = vld [vmem:[%s7618_s13 + $0x150] sm:$0xff] }
  0x46   :  { %264 = vmatpush2.msra.mxu0 %v161_v31  ;;  %7909 = vst [vmem:[#allocation28_spill] sm:$0xff] %v4657_v27  ;;  %397 = vmatpush2.msra.mxu1 %v4657_v27  ;;  %v4664_v31 = vld [vmem:[%s7618_s13 + $0x148] sm:$0xff] }
  0x47   :  { %265 = vmatprep.subr.mxu0 %v160_v33  ;;  %7910 = vst [vmem:[#allocation29_spill] sm:$0xff] %v4664_v31  ;;  %398 = vmatprep.subr.mxu1 %v4664_v31  ;;  %v4671_v33 = vld [vmem:[%s7618_s13 + $0x140] sm:$0xff] }
  0x48   :  { %266 = vmatpush2.msra.mxu0 %v159_v35  ;;  %7911 = vst [vmem:[#allocation30_spill] sm:$0xff] %v4671_v33  ;;  %399 = vmatpush2.msra.mxu1 %v4671_v33  ;;  %v4678_v35 = vld [vmem:[%s7618_s13 + $0x138] sm:$0xff] }
  0x49   :  { %268 = vmatmul.mubr.f32.vlgmr.msra.gmra.mxu0 %v119_v37  ;;  %415 = vmatprep.subr.mxu0 %v4155_v28  ;;  %7912 = vst [vmem:[#allocation31_spill] sm:$0xff] %v4678_v35  ;;  %v4685_v37 = vld [vmem:[%s7618_s13 + $0x130] sm:$0xff] }
  0x4a   :  { %273 = vmatprep.mubr.f32.mxu0 %v122_v39  ;;  %416 = vmatpush1.msra.mxu0 %v4160_v29  ;;  %7913 = vst [vmem:[#allocation32_spill] sm:$0xff] %v4685_v37  ;;  %v4692_v39 = vld [vmem:[%s7618_s13 + $0x128] sm:$0xff] }
  0x4b   :  { %417 = vmatprep.subr.mxu0 %v4165_v30  ;;  %400 = vmatprep.subr.mxu1 %v4678_v35  ;;  %7914 = vst [vmem:[#allocation33_spill] sm:$0xff] %v4692_v39 }
  0x4c   :  { %418 = vmatpush1.msra.mxu0 %v4174_v32  ;;  %401 = vmatpush2.msra.mxu1 %v4685_v37 }
  0x4d   :  { %274 = vmatmul.mubr.f32.gmra.mxu0 %v121_v41  ;;  %419 = vmatprep.subr.mxu0 %v4183_v34  ;;  %v4699_v41 = vld [vmem:[%s7618_s13 + $0x120] sm:$0xff] }
  0x4e   :  { %279 = vmatprep.mubr.f32.mxu0 %v124_v43  ;;  %420 = vmatpush1.msra.mxu0 %v4192_v36  ;;  %7915 = vst [vmem:[#allocation34_spill] sm:$0xff] %v4699_v41  ;;  %v4704_v43 = vld [vmem:[%s7618_s13 + $0x118] sm:$0xff] }
  0x4f   :  { %421 = vmatprep.subr.mxu0 %v4201_v38  ;;  %402 = vmatprep.subr.mxu1 %v4692_v39  ;;  %7916 = vst [vmem:[#allocation35_spill] sm:$0xff] %v4704_v43 }
  0x50   :  { %422 = vmatpush1.msra.mxu0 %v4210_v40  ;;  %403 = vmatpush2.msra.mxu1 %v4699_v41 }
  0x51   :  { %280 = vmatmul.mubr.f32.gmra.mxu0 %v123_v45  ;;  %423 = vmatprep.subr.mxu0 %v4219_v42  ;;  %v4710_v45 = vld [vmem:[%s7618_s13 + $0x110] sm:$0xff] }
  0x52   :  { %285 = vmatprep.mubr.f32.mxu0 %v126_v47  ;;  %424 = vmatpush1.msra.mxu0 %v4228_v44  ;;  %7917 = vst [vmem:[#allocation36_spill] sm:$0xff] %v4710_v45  ;;  %v4717_v47 = vld [vmem:[%s7618_s13 + $0x108] sm:$0xff] }
  0x53   :  { %425 = vmatprep.subr.mxu0 %v4237_v46  ;;  %7918 = vst [vmem:[#allocation37_spill] sm:$0xff] %v4717_v47  ;;  %404 = vmatprep.subr.mxu1 %v4704_v43 }
  0x54   :  { %426 = vmatpush1.msra.mxu0 %v4246_v48  ;;  %405 = vmatpush2.msra.mxu1 %v4710_v45 }
  0x55   :  { %286 = vmatmul.mubr.f32.gmra.mxu0 %v125_v49  ;;  %427 = vmatprep.subr.mxu0 %v4255_v50  ;;  %v4724_v49 = vld [vmem:[%s7618_s13 + $0x100] sm:$0xff] }
  0x56   :  { %428 = vmatpush1.msra.mxu0 %v4264_v52  ;;  %7919 = vst [vmem:[#allocation38_spill] sm:$0xff] %v4724_v49  ;;  %406 = vmatprep.subr.mxu1 %v4717_v47 }
  0x57   :  { %429 = vmatprep.subr.mxu0 %v4273_v54  ;;  %407 = vmatpush2.msra.mxu1 %v4724_v49 }
  0x58   :  { %430 = vmatpush1.msra.mxu0 %v4282_v56 }
  0x59   :  { %431 = vmatprep.subr.mxu0 %v4291_v58 }
  0x5a   :  { %432 = vmatpush1.msra.mxu0 %v4300_v60 }
  0x5b   :  { %433 = vmatprep.subr.mxu0 %v4309_v62 }
  0x5c   :  { %434 = vmatpush1.msra.mxu0 %v4318_v0 }
  0x5d   :  { %435 = vmatprep.subr.mxu0 %v4327_v2 }
  0x5e   :  { %436 = vmatpush1.msra.mxu0 %v4336_v4 }
  0x5f   :  { %437 = vmatprep.subr.mxu0 %v4345_v6 }
  0x60   :  { %438 = vmatpush1.msra.mxu0 %v4354_v8 }
  0x61   :  { %439 = vmatprep.subr.mxu0 %v4363_v10 }
  0x62   :  { %440 = vmatpush1.msra.mxu0 %v4372_v12 }
  0x63   :  { %441 = vmatprep.subr.mxu0 %v4381_v14 }
  0x64   :  { %442 = vmatpush1.msra.mxu0 %v4390_v16 }
  0x65   :  { %443 = vmatprep.subr.mxu0 %v4399_v18 }
  0x66   :  { %444 = vmatpush1.msra.mxu0 %v4408_v20 }
  0x67   :  { %445 = vmatprep.subr.mxu0 %v4497_v51 }
  0x68   :  { %446 = vmatpush1.msra.mxu0 %v4503_v53 }
  0x69   :  { %447 = vmatprep.subr.mxu0 %v4510_v55 }
  0x6a   :  { %448 = vmatpush2.msra.mxu0 %v4517_v57 }
  0x6b   :  { %449 = vmatprep.subr.mxu0 %v4524_v59 }
  0x6c   :  { %450 = vmatpush2.msra.mxu0 %v4531_v61 }
  0x6d   :  { %451 = vmatprep.subr.mxu0 %v4538_v63 }
  0x6e   :  { %452 = vmatpush2.msra.mxu0 %v4545_v1 }
  0x6f   :  { %453 = vmatprep.subr.mxu0 %v4552_v3 }
  0x70   :  { %454 = vmatpush2.msra.mxu0 %v4559_v5 }
  0x71   :  { %455 = vmatprep.subr.mxu0 %v4567_v7 }
  0x72   :  { %456 = vmatpush2.msra.mxu0 %v4573_v9 }
  0x73   :  { %457 = vmatprep.subr.mxu0 %v4580_v11 }
  0x74   :  { %458 = vmatpush2.msra.mxu0 %v4587_v13 }
  0x75   :  { %459 = vmatprep.subr.mxu0 %v4594_v15 }
  0x76   :  { %460 = vmatpush2.msra.mxu0 %v4601_v17 }
  0x77   :  { %461 = vmatprep.subr.mxu0 %v4608_v19 }
  0x78   :  { %462 = vmatpush2.msra.mxu0 %v4615_v21 }
  0x79   :  { %463 = vmatprep.subr.mxu0 %v4622_v22 }
  0x7a   :  { %464 = vmatpush2.msra.mxu0 %v4629_v23 }
  0x7b   :  { %465 = vmatprep.subr.mxu0 %v4636_v24 }
  0x7c   :  { %466 = vmatpush2.msra.mxu0 %v4643_v25 }
  0x7d   :  { %467 = vmatprep.subr.mxu0 %v4650_v26 }
  0x7e   :  { %468 = vmatpush2.msra.mxu0 %v4657_v27 }
  0x7f   :  { %469 = vmatprep.subr.mxu0 %v4664_v31 }
  0x80   :  { %470 = vmatpush2.msra.mxu0 %v4671_v33 }
  0x81   :  { %471 = vmatprep.subr.mxu0 %v4678_v35 }
  0x82   :  { %472 = vmatpush2.msra.mxu0 %v4685_v37  ;;  %v191_v37 = vld [vmem:[%s7619_s2] sm:$0x3] }
  0x83   :  { %473 = vmatprep.subr.mxu0 %v4692_v39 }
  0x84   :  { %474 = vmatpush2.msra.mxu0 %v4699_v41  ;;  %v193_v41 = vlaneseq }
  0x85   :  { %475 = vmatprep.subr.mxu0 %v4704_v43 }
  0x86   :  { %476 = vmatpush2.msra.mxu0 %v4710_v45  ;;  %v4732_v39 = vshrl.u32 %v193_v41, 7 }
  0x87   :  { %477 = vmatprep.subr.mxu0 %v4717_v47 }
  0x88   :  { %478 = vmatpush2.msra.mxu0 %v4724_v49  ;;  %7920 = vst [vmem:[#allocation39_spill] sm:$0xff] %v4732_v39  ;;  %v4735_v43 = vsub.s32 0, %v4732_v39  ;;  %v4741_v45 = vsub.s32 1, %v4732_v39 }
  0x8a   :  { %7921 = vst [vmem:[#allocation40_spill] sm:$0xff] %v4735_v43  ;;  %7922 = vst [vmem:[#allocation41_spill] sm:$0xff] %v4741_v45  ;;  %v196_v35 = vrot.slane %v191_v37, %v4735_v43  ;;  %v200_v33 = vrot.slane %v191_v37, %v4741_v45 }
 0x109   :  { %v269_v47 = vpop.f32.mrf.mxu0 }
 0x10a   :  { %v270_v49 = vadd.f32 %v269_v47, %v196_v35 }
 0x10b   :  { %v271_v31 = vpop.f32.mrf.mxu0 }
 0x10c   :  { %v272_v26 = vadd.f32 %v271_v31, %v200_v33  ;;  %v4747_v22 = vmax.f32 %v270_v49, 0.0 }
 0x10d   :  { %v275_v27 = vpop.f32.mrf.mxu0 }
 0x10e   :  { %v276_v41 = vadd.f32 %v275_v27, %v196_v35  ;;  %v4751_v15 = vmax.f32 %v272_v26, 0.0  ;;  %v318_v27 = vmul.f32 %v4747_v22, %v4747_v22 }
 0x10f   :  { %v277_v25 = vpop.f32.mrf.mxu0 }
 0x110   :  { %v4745_v24 = vmax.f32 %v276_v41, 0.0  ;;  %v278_v23 = vadd.f32 %v277_v25, %v200_v33  ;;  %v319_v41 = vmul.f32 %v4751_v15, %v4751_v15 }
 0x111   :  { %v281_v21 = vpop.f32.mrf.mxu0 }
 0x112   :  { %v4749_v19 = vmax.f32 %v278_v23, 0.0  ;;  %v282_v17 = vadd.f32 %v281_v21, %v196_v35  ;;  %v320_v37 = vmul.f32 %v4745_v24, %v4745_v24  ;;  %v300_v23 = vadd.f32 %v4745_v24, %v4747_v22 }
 0x113   :  { %v283_v13 = vpop.f32.mrf.mxu0 }
 0x114   :  { %v4755_v47 = vmax.f32 %v282_v17, 0.0  ;;  %v321_v25 = vmul.f32 %v4749_v19, %v4749_v19  ;;  %v284_v31 = vadd.f32 %v283_v13, %v200_v33  ;;  %v326_v17 = vadd.f32 %v320_v37, %v318_v27 }
 0x115   :  { %v287_v49 = vpop.f32.mrf.mxu0  ;;  %v309_v7 = vadd.f32 %v4749_v19, %v4751_v15 }
 0x116   :  { %v322_v21 = vmul.f32 %v4755_v47, %v4755_v47  ;;  %v288_v26 = vadd.f32 %v287_v49, %v196_v35  ;;  %v4767_v11 = vmax.f32 %v284_v31, 0.0  ;;  %v301_v13 = vadd.f32 %v300_v23, %v4755_v47 }
 0x117   :  { %v289_v9 = vpop.f32.mrf.mxu0  ;;  %v335_v1 = vadd.f32 %v321_v25, %v319_v41 }
 0x118   :  { %v4772_v5 = vmax.f32 %v288_v26, 0.0  ;;  %v290_v3 = vadd.f32 %v289_v9, %v200_v33  ;;  %v327_v63 = vadd.f32 %v326_v17, %v322_v21  ;;  %v323_v35 = vmul.f32 %v4767_v11, %v4767_v11 }
 0x119   :  { %v310_v49 = vadd.f32 %v309_v7, %v4767_v11 }
 0x11a   :  { %v302_v37 = vadd.f32 %v301_v13, %v4772_v5  ;;  %v324_v27 = vmul.f32 %v4772_v5, %v4772_v5  ;;  %v4780_v31 = vmax.f32 %v290_v3, 0.0  ;;  %v336_v61 = vadd.f32 %v335_v1, %v323_v35 }
 0x11c   :  { %v303_v59 = vrot.slane %v302_v37, 4  ;;  %v328_v23 = vadd.f32 %v327_v63, %v324_v27  ;;  %v311_v26 = vadd.f32 %v310_v49, %v4780_v31  ;;  %v325_v9 = vmul.f32 %v4780_v31, %v4780_v31 }
 0x11e   :  { %v304_v33 = vadd.f32 %v303_v59, %v302_v37  ;;  %v329_v25 = vrot.slane %v328_v23, 4  ;;  %v337_v21 = vadd.f32 %v336_v61, %v325_v9  ;;  %v312_v41 = vrot.slane %v311_v26, 4 }
 0x120   :  { %v330_v7 = vadd.f32 %v329_v25, %v328_v23  ;;  %v338_v17 = vrot.slane %v337_v21, 4  ;;  %v313_v13 = vadd.f32 %v312_v41, %v311_v26  ;;  %v305_v57 = vrot.slane %v304_v33, 2 }
 0x121   :  { %v7708_v26 = vmov 0.0  }
 0x122   :  { %v331_v55 = vrot.slane %v330_v7, 2  ;;  %v314_v53 = vrot.slane %v313_v13, 2  ;;  %v306_v3 = vadd.f32 %v305_v57, %v304_v33  ;;  %v339_v51 = vadd.f32 %v338_v17, %v337_v21 }
 0x124   :  { %v332_v1 = vadd.f32 %v331_v55, %v330_v7  ;;  %v315_v35 = vadd.f32 %v314_v53, %v313_v13  ;;  %v340_v63 = vrot.slane %v339_v51, 2  ;;  %v307_v27 = vrot.slane %v306_v3, 1 }
 0x126   :  { %v316_v49 = vrot.slane %v315_v35, 1  ;;  %v341_v20 = vadd.f32 %v340_v63, %v339_v51  ;;  %v333_v18 = vrot.slane %v332_v1, 1  ;;  %v308_v37 = vadd.f32 %v307_v27, %v306_v3  ;;  %v117_v63 = vld [vmem:[%s7620_s14] sm:$0x3] }
 0x128   :  { %v317_v16 = vadd.f32 %v316_v49, %v315_v35  ;;  %v342_v59 = vrot.slane %v341_v20, 1  ;;  %v334_v23 = vadd.f32 %v333_v18, %v332_v1  ;;  %v3982_v18 = vmov 1966171168  }
 0x12a   :  { %408 = vmatprep.mubr.f32.mxu1 %v317_v16  ;;  %v343_v61 = vadd.f32 %v342_v59, %v341_v20  ;;  %v498_v20 = vunpack.c.l.s4 %v3982_v18 }
 0x12b   :  { %409 = vmatmul.mubr.f32.vlgmr.msra.gmra.mxu1 %v308_v37 }
 0x12c   :  { %479 = vmatprep.mubr.f32.mxu0 %v343_v61  ;;  %927 = vmatprep.mubr.f32.mxu1 %v7708_v26  ;;  %v499_v7 = vunpack.c.0.s8 %v498_v20 }
 0x12d   :  { %480 = vmatmul.mubr.f32.vlgmr.msra.gmra.mxu0 %v334_v23 }
 0x12e   :  { %654 = vmatprep.mubr.f32.mxu0 %v7708_v26  ;;  %v4788_v13 = vsub.s32 %v499_v7, %v4732_v39 }
 0x130   :  { %7923 = vst [vmem:[#allocation42_spill] sm:$0xff] %v4788_v13 }
 0x1eb   :  { %v410_v53 = vpop.f32.mrf.mxu1 }
 0x1ec   :  { %v486_v55 = vmul.f32 %v410_v53, %v410_v53 }
 0x1ed   :  { %v412_v57 = vpop.f32.mrf.mxu1  ;;  %v481_v9 = vpop.f32.mrf.mxu0 }
 0x1ee   :  { %v487_v51 = vmul.f32 %v412_v57, %v412_v57  ;;  %v488_v33 = vsub.f32 %v481_v9, %v486_v55 }
 0x1ef   :  { %v483_v25 = vpop.f32.mrf.mxu0 }
 0x1f0   :  { %v490_v21 = vadd.f32 1e-05, %v488_v33  ;;  %v489_v41 = vsub.f32 %v483_v25, %v487_v51  ;;  %v118_v51 = vld [vmem:[%s7621_s15] sm:$0x3] }
 0x1f2   :  { %v491_v16 = vadd.f32 1e-05, %v489_v41  ;;  %3753 = vrsqrt.f32 %v490_v21 }
 0x1f4   :  { %3755 = vrsqrt.f32 %v491_v16 }
 0x1ff   :  { %v3754_v17 = vpop.eup %3753 }
 0x201   :  { %v3756_v3 = vpop.eup %3755 }
 0x202   :  { %v496_v1 = vcombine.low %v3754_v17, %v3756_v3 }
 0x204   :  { %v503_v35 = vrot.slane %v496_v1, %v4788_v13 }
 0x206   :  { %v510_v27 = vrot.slane %v503_v35, %v4788_v13 }
 0x208   :  { %v512_v49 = vmul.f32 %v510_v27, %v117_v63  ;;  %v3692_v27 = vld [vmem:[%s7622_s3 + $0x48] sm:$0xff] }
 0x20a   :  { %v517_v59 = vrot.slane %v512_v49, %v4735_v43  ;;  %v521_v37 = vrot.slane %v512_v49, %v4741_v45  ;;  %v575_v49 = vld [vmem:[%s7622_s3 + $0x10] sm:$0xff] }
 0x20c   :  { %v524_v61 = vmul.f32 %v517_v59, %v410_v53  ;;  %v525_v23 = vmul.f32 %v521_v37, %v412_v57  ;;  %v552_v21 = vmul.f32 %v521_v37, %v4780_v31  ;;  %v551_v16 = vmul.f32 %v517_v59, %v4772_v5 }
 0x20d   :  { %v550_v20 = vmul.f32 %v521_v37, %v4767_v11  ;;  %v549_v7 = vmul.f32 %v517_v59, %v4755_v47  ;;  %v548_v3 = vmul.f32 %v521_v37, %v4749_v19  ;;  %v547_v1 = vmul.f32 %v517_v59, %v4745_v24  ;;  %v573_v24 = vld [vmem:[%s7622_s3] sm:$0xff] }
 0x20e   :  { %v528_v55 = vcombine.low %v524_v61, %v525_v23  ;;  %v546_v35 = vmul.f32 %v521_v37, %v4751_v15  ;;  %v545_v47 = vmul.f32 %v517_v59, %v4747_v22  ;;  %v3691_v15 = vld [vmem:[%s7622_s3 + $0x40] sm:$0xff]  ;;  %v574_v22 = vld [vmem:[%s7622_s3 + $0x8] sm:$0xff]  ;;  %v3693_v59 = vld [vmem:[%s7622_s3 + $0x50] sm:$0xff] }
 0x20f   :  { %v576_v37 = vld [vmem:[%s7622_s3 + $0x18] sm:$0xff]  ;;  %v3683_v23 = vld [vmem:[%s7622_s3 + $0x20] sm:$0xff] }
 0x210   :  { %v535_v9 = vrot.slane %v528_v55, %v4788_v13  ;;  %v3694_v61 = vld [vmem:[%s7622_s3 + $0x58] sm:$0xff]  ;;  %v3685_v55 = vld [vmem:[%s7622_s3 + $0x30] sm:$0xff] }
 0x212   :  { %v542_v33 = vrot.slane %v535_v9, %v4788_v13  ;;  %v7949_v9 = vld [vmem:[#allocation27_spill] sm:$0xff] }
 0x214   :  { %v544_v25 = vsub.f32 %v118_v51, %v542_v33  ;;  %v7950_v51 = vld [vmem:[#allocation28_spill] sm:$0xff]  ;;  %v7951_v33 = vld [vmem:[#allocation29_spill] sm:$0xff] }
 0x216   :  { %v561_v41 = vrot.slane %v544_v25, %v4741_v45  ;;  %v557_v18 = vrot.slane %v544_v25, %v4735_v43  ;;  %v7952_v25 = vld [vmem:[#allocation30_spill] sm:$0xff] }
 0x218   :  { %v571_v53 = vadd.f32 %v561_v41, %v552_v21  ;;  %v570_v57 = vadd.f32 %v557_v18, %v551_v16  ;;  %v569_v17 = vadd.f32 %v561_v41, %v550_v20  ;;  %v568_v31 = vadd.f32 %v557_v18, %v549_v7  ;;  %v7953_v21 = vld [vmem:[#allocation31_spill] sm:$0xff]  ;;  %v7955_v16 = vld [vmem:[#allocation33_spill] sm:$0xff]  ;;  %v7960_v7 = vld [vmem:[#allocation38_spill] sm:$0xff] }
 0x219   :  { %v567_v5 = vadd.f32 %v561_v41, %v548_v3  ;;  %v566_v11 = vadd.f32 %v557_v18, %v547_v1  ;;  %v565_v63 = vadd.f32 %v561_v41, %v546_v35  ;;  %v564_v19 = vadd.f32 %v557_v18, %v545_v47  ;;  %v7954_v41 = vld [vmem:[#allocation32_spill] sm:$0xff]  ;;  %v7956_v18 = vld [vmem:[#allocation34_spill] sm:$0xff]  ;;  %v7959_v20 = vld [vmem:[#allocation37_spill] sm:$0xff] }
 0x21a   :  { %614 = vmatprep.subr.mxu0 %v571_v53  ;;  %887 = vmatprep.subr.mxu1 %v571_v53  ;;  %v1317_v3 = vld [vmem:[%s7623_s6 + $0xf8] sm:$0xff] }
 0x21b   :  { %615 = vmatpush1.msra.mxu0 %v570_v57  ;;  %888 = vmatpush1.msra.mxu1 %v570_v57 }
 0x21c   :  { %616 = vmatprep.subr.mxu0 %v569_v17  ;;  %889 = vmatprep.subr.mxu1 %v569_v17 }
 0x21d   :  { %617 = vmatpush1.msra.mxu0 %v568_v31  ;;  %890 = vmatpush1.msra.mxu1 %v568_v31 }
 0x21e   :  { %618 = vmatprep.subr.mxu0 %v567_v5  ;;  %891 = vmatprep.subr.mxu1 %v567_v5 }
 0x21f   :  { %619 = vmatpush1.msra.mxu0 %v566_v11  ;;  %892 = vmatpush1.msra.mxu1 %v566_v11 }
 0x220   :  { %620 = vmatprep.subr.mxu0 %v565_v63  ;;  %893 = vmatprep.subr.mxu1 %v565_v63 }
 0x221   :  { %621 = vmatpush1.msra.mxu0 %v564_v19  ;;  %894 = vmatpush1.msra.mxu1 %v564_v19 }
 0x222   :  { %3679 = vmatmul.mubr.msk.f32.vlgmr.msra.gmra.mxu0 %vm577_vm0, %v573_v24  ;;  %747 = vmatprep.subr.mxu0 %v571_v53  ;;  %v7957_v53 = vld [vmem:[#allocation35_spill] sm:$0xff]  ;;  %v5014_v24 = vsub.s32 5, %v4732_v39 }
 0x223   :  { %748 = vmatpush1.msra.mxu0 %v570_v57  ;;  %660 = vmatprep.mubr.f32.mxu0 %v7708_v26  ;;  %v7958_v57 = vld [vmem:[#allocation36_spill] sm:$0xff] }
 0x224   :  { %749 = vmatprep.subr.mxu0 %v569_v17  ;;  %3695 = vmatmul.mubr.msk.f32.vlgmr.msra.gmra.mxu1 %vm577_vm0, %v3691_v15  ;;  %v5001_v17 = vld [vmem:[%s7618_s13 + $0xf8] sm:$0xff]  ;;  %v5017_v15 = vsub.s32 4, %v4732_v39 }
 0x225   :  { %750 = vmatpush1.msra.mxu0 %v568_v31  ;;  %933 = vmatprep.mubr.f32.mxu1 %v7708_v26 }
 0x226   :  { %3680 = vmatmul.mubr.msk.f32.gmra.mxu0 %vm577_vm0, %v574_v22  ;;  %751 = vmatprep.subr.mxu0 %v567_v5 }
 0x227   :  { %752 = vmatpush1.msra.mxu0 %v566_v11  ;;  %666 = vmatprep.mubr.f32.mxu0 %v7708_v26  ;;  %v572_v11 = vld [vmem:[%s7624_s4] sm:$0x77] }
 0x228   :  { %753 = vmatprep.subr.mxu0 %v565_v63  ;;  %3696 = vmatmul.mubr.msk.f32.gmra.mxu1 %vm577_vm0, %v3692_v27  ;;  %v683_v27 = vrot.slane %v572_v11, %v4735_v43 }
 0x229   :  { %754 = vmatpush1.msra.mxu0 %v564_v19  ;;  %939 = vmatprep.mubr.f32.mxu1 %v7708_v26  ;;  %v5011_v19 = vsub.s32 2, %v4732_v39 }
 0x22a   :  { %3681 = vmatmul.mubr.msk.f32.gmra.mxu0 %vm577_vm0, %v575_v49  ;;  %1058 = vmatprep.subr.mxu1 %v4155_v28  ;;  %v815_v49 = vrot.slane %v572_v11, %v4741_v45 }
 0x22b   :  { %672 = vmatprep.mubr.f32.mxu0 %v7708_v26  ;;  %1059 = vmatpush1.msra.mxu1 %v4160_v29 }
 0x22c   :  { %3697 = vmatmul.mubr.msk.f32.gmra.mxu1 %vm577_vm0, %v3693_v59  ;;  %1060 = vmatprep.subr.mxu1 %v4165_v30 }
 0x22d   :  { %945 = vmatprep.mubr.f32.mxu1 %v7708_v26  ;;  %1129 = vmatprep.subr.mxu0 %v4155_v28  ;;  %v3684_v28 = vld [vmem:[%s7622_s3 + $0x28] sm:$0xff] }
 0x22e   :  { %3682 = vmatmul.mubr.msk.f32.gmra.mxu0 %vm577_vm0, %v576_v37  ;;  %1061 = vmatpush1.msra.mxu1 %v4174_v32 }
 0x22f   :  { %787 = vmatprep.mubr.f32.mxu0 %v7708_v26  ;;  %1062 = vmatprep.subr.mxu1 %v4183_v34 }
 0x230   :  { %3698 = vmatmul.mubr.msk.f32.gmra.mxu1 %vm577_vm0, %v3694_v61  ;;  %v955_v61 = vrot.slane %v572_v11, %v5011_v19 }
 0x231   :  { %1063 = vmatpush1.msra.mxu1 %v4192_v36 }
 0x232   :  { %3687 = vmatmul.mubr.msk.f32.vlgmr.msra.gmra.mxu0 %vm577_vm0, %v3683_v23  ;;  %1064 = vmatprep.subr.mxu1 %v4201_v38  ;;  %v819_v23 = vrot.slane %v572_v11, %v5014_v24 }
 0x233   :  { %793 = vmatprep.mubr.f32.mxu0 %v7708_v26  ;;  %1130 = vmatpush1.msra.mxu0 %v4160_v29  ;;  %v3686_v29 = vld [vmem:[%s7622_s3 + $0x38] sm:$0xff] }
 0x234   :  { %1131 = vmatprep.subr.mxu0 %v4165_v30  ;;  %1065 = vmatpush1.msra.mxu1 %v4210_v40  ;;  %v7924_v30 = vld [vmem:[#allocation2_spill] sm:$0xff] }
 0x235   :  { %1132 = vmatpush1.msra.mxu0 %v4174_v32  ;;  %1066 = vmatprep.subr.mxu1 %v4219_v42  ;;  %v7925_v32 = vld [vmem:[#allocation3_spill] sm:$0xff]  ;;  %7961 = vst [vmem:[#allocation2_spill] sm:$0xff] %v5011_v19 }
 0x236   :  { %3688 = vmatmul.mubr.msk.f32.gmra.mxu0 %vm577_vm0, %v3684_v28  ;;  %1133 = vmatprep.subr.mxu0 %v4183_v34  ;;  %v7926_v34 = vld [vmem:[#allocation4_spill] sm:$0xff]  ;;  %7962 = vst [vmem:[#allocation3_spill] sm:$0xff] %v5014_v24  ;;  %v687_v28 = vrot.slane %v572_v11, %v5017_v15 }
 0x237   :  { %799 = vmatprep.mubr.f32.mxu0 %v7708_v26  ;;  %1134 = vmatpush1.msra.mxu0 %v4192_v36  ;;  %v7927_v36 = vld [vmem:[#allocation5_spill] sm:$0xff]  ;;  %7963 = vst [vmem:[#allocation4_spill] sm:$0xff] %v5017_v15  ;;  %v5421_v24 = vld [vmem:[%s7618_s13 + $0x170] sm:$0xff]  ;;  %v5427_v15 = vld [vmem:[%s7618_s13 + $0x168] sm:$0xff] }
 0x238   :  { %1135 = vmatprep.subr.mxu0 %v4201_v38  ;;  %1067 = vmatpush1.msra.mxu1 %v4228_v44  ;;  %v7928_v38 = vld [vmem:[#allocation6_spill] sm:$0xff] }
 0x239   :  { %1136 = vmatpush1.msra.mxu0 %v4210_v40  ;;  %1068 = vmatprep.subr.mxu1 %v4237_v46  ;;  %v7929_v40 = vld [vmem:[#allocation7_spill] sm:$0xff] }
 0x23a   :  { %3689 = vmatmul.mubr.msk.f32.gmra.mxu0 %vm577_vm0, %v3685_v55  ;;  %1137 = vmatprep.subr.mxu0 %v4219_v42  ;;  %v7930_v42 = vld [vmem:[#allocation8_spill] sm:$0xff] }
 0x23b   :  { %805 = vmatprep.mubr.f32.mxu0 %v7708_v26  ;;  %1069 = vmatpush1.msra.mxu1 %v4246_v48  ;;  %v5409_v26 = vld [vmem:[%s7618_s13 + $0x180] sm:$0xff] }
 0x23c   :  { %1138 = vmatpush1.msra.mxu0 %v4228_v44  ;;  %1070 = vmatprep.subr.mxu1 %v4255_v50  ;;  %v7931_v44 = vld [vmem:[#allocation9_spill] sm:$0xff] }
 0x23d   :  { %1139 = vmatprep.subr.mxu0 %v4237_v46  ;;  %1071 = vmatpush1.msra.mxu1 %v4264_v52  ;;  %v7932_v46 = vld [vmem:[#allocation10_spill] sm:$0xff] }
 0x23e   :  { %3690 = vmatmul.mubr.msk.f32.gmra.mxu0 %vm577_vm0, %v3686_v29  ;;  %1072 = vmatprep.subr.mxu1 %v4273_v54  ;;  %v5025_v29 = vsub.s32 6, %v4732_v39  ;;  %v5439_v39 = vld [vmem:[%s7618_s13 + $0x158] sm:$0xff] }
 0x23f   :  { %1140 = vmatpush1.msra.mxu0 %v4246_v48  ;;  %1073 = vmatpush1.msra.mxu1 %v4282_v56  ;;  %v7933_v48 = vld [vmem:[#allocation11_spill] sm:$0xff] }
 0x240   :  { %1141 = vmatprep.subr.mxu0 %v4255_v50  ;;  %1074 = vmatprep.subr.mxu1 %v4291_v58  ;;  %v7934_v50 = vld [vmem:[#allocation12_spill] sm:$0xff]  ;;  %7964 = vst [vmem:[#allocation5_spill] sm:$0xff] %v5025_v29 }
 0x241   :  { %1142 = vmatpush1.msra.mxu0 %v4264_v52  ;;  %1075 = vmatpush1.msra.mxu1 %v4300_v60  ;;  %v7935_v52 = vld [vmem:[#allocation13_spill] sm:$0xff] }
 0x242   :  { %1143 = vmatprep.subr.mxu0 %v4273_v54  ;;  %1076 = vmatprep.subr.mxu1 %v4309_v62  ;;  %v7936_v54 = vld [vmem:[#allocation14_spill] sm:$0xff] }
 0x243   :  { %1144 = vmatpush1.msra.mxu0 %v4282_v56  ;;  %1077 = vmatpush1.msra.mxu1 %v4318_v0  ;;  %v7937_v56 = vld [vmem:[#allocation15_spill] sm:$0xff] }
 0x244   :  { %1145 = vmatprep.subr.mxu0 %v4291_v58  ;;  %1078 = vmatprep.subr.mxu1 %v4327_v2  ;;  %v7938_v58 = vld [vmem:[#allocation16_spill] sm:$0xff] }
 0x245   :  { %1146 = vmatpush1.msra.mxu0 %v4300_v60  ;;  %1079 = vmatpush1.msra.mxu1 %v4336_v4  ;;  %v7939_v60 = vld [vmem:[#allocation17_spill] sm:$0xff]  ;;  %7975 = vst [vmem:[#allocation16_spill] sm:$0xff] %v5409_v26 }
 0x246   :  { %1147 = vmatprep.subr.mxu0 %v4309_v62  ;;  %1080 = vmatprep.subr.mxu1 %v4345_v6  ;;  %v7940_v62 = vld [vmem:[#allocation18_spill] sm:$0xff] }
 0x247   :  { %1148 = vmatpush1.msra.mxu0 %v4318_v0  ;;  %1081 = vmatpush1.msra.mxu1 %v4354_v8  ;;  %v7941_v0 = vld [vmem:[#allocation19_spill] sm:$0xff]  ;;  %7977 = vst [vmem:[#allocation18_spill] sm:$0xff] %v5421_v24 }
 0x248   :  { %1149 = vmatprep.subr.mxu0 %v4327_v2  ;;  %1082 = vmatprep.subr.mxu1 %v4363_v10  ;;  %v7942_v2 = vld [vmem:[#allocation20_spill] sm:$0xff]  ;;  %7978 = vst [vmem:[#allocation19_spill] sm:$0xff] %v5427_v15 }
 0x249   :  { %1150 = vmatpush1.msra.mxu0 %v4336_v4  ;;  %1083 = vmatpush1.msra.mxu1 %v4372_v12  ;;  %v7943_v4 = vld [vmem:[#allocation21_spill] sm:$0xff] }
 0x24a   :  { %1151 = vmatprep.subr.mxu0 %v4345_v6  ;;  %1084 = vmatprep.subr.mxu1 %v4381_v14  ;;  %v7944_v6 = vld [vmem:[#allocation22_spill] sm:$0xff]  ;;  %7980 = vst [vmem:[#allocation21_spill] sm:$0xff] %v5439_v39 }
 0x24b   :  { %1152 = vmatpush1.msra.mxu0 %v4354_v8  ;;  %1085 = vmatpush1.msra.mxu1 %v7924_v30  ;;  %v7945_v8 = vld [vmem:[#allocation23_spill] sm:$0xff] }
 0x24c   :  { %1153 = vmatprep.subr.mxu0 %v4363_v10  ;;  %1086 = vmatprep.subr.mxu1 %v7925_v32  ;;  %v7946_v10 = vld [vmem:[#allocation24_spill] sm:$0xff] }
 0x24d   :  { %1154 = vmatpush1.msra.mxu0 %v4372_v12  ;;  %1087 = vmatpush1.msra.mxu1 %v7926_v34  ;;  %v7947_v12 = vld [vmem:[#allocation25_spill] sm:$0xff] }
 0x24e   :  { %1155 = vmatprep.subr.mxu0 %v4381_v14  ;;  %1088 = vmatprep.subr.mxu1 %v7927_v36  ;;  %v7948_v14 = vld [vmem:[#allocation26_spill] sm:$0xff] }
 0x24f   :  { %1156 = vmatpush1.msra.mxu0 %v7924_v30  ;;  %1089 = vmatpush1.msra.mxu1 %v7928_v38  ;;  %v693_v30 = vrot.slane %v683_v27, %v4735_v43 }
 0x250   :  { %1157 = vmatprep.subr.mxu0 %v7925_v32  ;;  %1090 = vmatprep.subr.mxu1 %v7929_v40  ;;  %v825_v32 = vrot.slane %v815_v49, %v4741_v45 }
 0x251   :  { %1158 = vmatpush1.msra.mxu0 %v7926_v34  ;;  %1091 = vmatpush2.msra.mxu1 %v7930_v42 }
 0x252   :  { %1159 = vmatprep.subr.mxu0 %v7927_v36  ;;  %1092 = vmatprep.subr.mxu1 %v7931_v44 }
 0x253   :  { %1160 = vmatpush1.msra.mxu0 %v7928_v38  ;;  %1093 = vmatpush2.msra.mxu1 %v7932_v46  ;;  %v965_v38 = vrot.slane %v955_v61, %v5011_v19 }
 0x254   :  { %1161 = vmatprep.subr.mxu0 %v7929_v40  ;;  %1094 = vmatprep.subr.mxu1 %v7933_v48  ;;  %v5031_v40 = vrot.slane %v819_v23, %v4741_v45 }
 0x255   :  { %1162 = vmatpush2.msra.mxu0 %v7930_v42  ;;  %1095 = vmatpush2.msra.mxu1 %v7934_v50  ;;  %v697_v42 = vrot.slane %v687_v28, %v4735_v43 }
 0x256   :  { %1163 = vmatprep.subr.mxu0 %v7931_v44  ;;  %1096 = vmatprep.subr.mxu1 %v7935_v52 }
 0x257   :  { %1164 = vmatpush2.msra.mxu0 %v7932_v46  ;;  %1097 = vmatpush2.msra.mxu1 %v7936_v54  ;;  %v959_v46 = vrot.slane %v572_v11, %v5025_v29  ;;  %v5415_v29 = vld [vmem:[%s7618_s13 + $0x178] sm:$0xff] }
 0x258   :  { %1165 = vmatprep.subr.mxu0 %v7933_v48  ;;  %1098 = vmatprep.subr.mxu1 %v7937_v56  ;;  %7976 = vst [vmem:[#allocation17_spill] sm:$0xff] %v5415_v29 }
 0x259   :  { %1166 = vmatpush2.msra.mxu0 %v7934_v50  ;;  %1099 = vmatpush2.msra.mxu1 %v7938_v58 }
 0x25a   :  { %1167 = vmatprep.subr.mxu0 %v7935_v52  ;;  %1100 = vmatprep.subr.mxu1 %v7939_v60 }
 0x25b   :  { %1168 = vmatpush2.msra.mxu0 %v7936_v54  ;;  %1101 = vmatpush2.msra.mxu1 %v7940_v62 }
 0x25c   :  { %1169 = vmatprep.subr.mxu0 %v7937_v56  ;;  %1102 = vmatprep.subr.mxu1 %v7941_v0 }
 0x25d   :  { %1170 = vmatpush2.msra.mxu0 %v7938_v58  ;;  %1103 = vmatpush2.msra.mxu1 %v7942_v2 }
 0x25e   :  { %1171 = vmatprep.subr.mxu0 %v7939_v60  ;;  %1104 = vmatprep.subr.mxu1 %v7943_v4  ;;  %v986_v60 = vld [vmem:[%s7625_s5] sm:$0x3] }
 0x25f   :  { %1172 = vmatpush2.msra.mxu0 %v7940_v62  ;;  %1105 = vmatpush2.msra.mxu1 %v7944_v6 }
 0x260   :  { %1173 = vmatprep.subr.mxu0 %v7941_v0  ;;  %1106 = vmatprep.subr.mxu1 %v7945_v8 }
 0x261   :  { %1174 = vmatpush2.msra.mxu0 %v7942_v2  ;;  %1107 = vmatpush2.msra.mxu1 %v7946_v10  ;;  %v969_v2 = vrot.slane %v959_v46, %v5011_v19  ;;  %v5433_v19 = vld [vmem:[%s7618_s13 + $0x160] sm:$0xff] }
 0x262   :  { %1175 = vmatprep.subr.mxu0 %v7943_v4  ;;  %1108 = vmatprep.subr.mxu1 %v7947_v12  ;;  %7979 = vst [vmem:[#allocation20_spill] sm:$0xff] %v5433_v19 }
 0x263   :  { %1176 = vmatpush2.msra.mxu0 %v7944_v6  ;;  %1109 = vmatpush2.msra.mxu1 %v7948_v14 }
 0x264   :  { %1177 = vmatprep.subr.mxu0 %v7945_v8  ;;  %1110 = vmatprep.subr.mxu1 %v7949_v9 }
 0x265   :  { %1178 = vmatpush2.msra.mxu0 %v7946_v10  ;;  %1111 = vmatpush2.msra.mxu1 %v7950_v51 }
 0x266   :  { %1179 = vmatprep.subr.mxu0 %v7947_v12  ;;  %1112 = vmatprep.subr.mxu1 %v7951_v33  ;;  %v991_v12 = vrot.slane %v986_v60, %v4735_v43 }
 0x267   :  { %1180 = vmatpush2.msra.mxu0 %v7948_v14  ;;  %1113 = vmatpush2.msra.mxu1 %v7952_v25 }
 0x268   :  { %1181 = vmatprep.subr.mxu0 %v7949_v9  ;;  %1114 = vmatprep.subr.mxu1 %v7953_v21 }
 0x269   :  { %1182 = vmatpush2.msra.mxu0 %v7950_v51  ;;  %1115 = vmatpush2.msra.mxu1 %v7954_v41 }
 0x26a   :  { %1183 = vmatprep.subr.mxu0 %v7951_v33  ;;  %1116 = vmatprep.subr.mxu1 %v7955_v16 }
 0x26b   :  { %1184 = vmatpush2.msra.mxu0 %v7952_v25  ;;  %1117 = vmatpush2.msra.mxu1 %v7956_v18 }
 0x26c   :  { %1185 = vmatprep.subr.mxu0 %v7953_v21  ;;  %1118 = vmatprep.subr.mxu1 %v7957_v53 }
 0x26d   :  { %1186 = vmatpush2.msra.mxu0 %v7954_v41  ;;  %1119 = vmatpush2.msra.mxu1 %v7958_v57 }
 0x26e   :  { %1187 = vmatprep.subr.mxu0 %v7955_v16  ;;  %1120 = vmatprep.subr.mxu1 %v7959_v20 }
 0x26f   :  { %1188 = vmatpush2.msra.mxu0 %v7956_v18  ;;  %1121 = vmatpush2.msra.mxu1 %v7960_v7 }
 0x270   :  { %1189 = vmatprep.subr.mxu0 %v7957_v53  ;;  %1362 = vmatprep.subr.mxu1 %v1317_v3  ;;  %v995_v53 = vrot.slane %v986_v60, %v4741_v45 }
 0x271   :  { %1190 = vmatpush2.msra.mxu0 %v7958_v57 }
 0x272   :  { %1191 = vmatprep.subr.mxu0 %v7959_v20 }
 0x273   :  { %1192 = vmatpush2.msra.mxu0 %v7960_v7 }
 0x274   :  { %1503 = vmatprep.subr.mxu0 %v5001_v17 }
 0x2e2   :  { %v656_v31 = vpop.f32.mrf.mxu0 }
 0x2e3   :  { %v698_v48 = vmul.f32 %v693_v30, %v656_v31 }
 0x2e4   :  { %v658_v1 = vpop.f32.mrf.mxu0  ;;  %v929_v5 = vpop.f32.mrf.mxu1 }
 0x2e5   :  { %v970_v58 = vmul.f32 %v965_v38, %v929_v5  ;;  %v699_v0 = vmul.f32 %v697_v42, %v658_v1 }
 0x2e6   :  { %v662_v35 = vpop.f32.mrf.mxu0  ;;  %v931_v63 = vpop.f32.mrf.mxu1 }
 0x2e7   :  { %v700_v6 = vmul.f32 %v693_v30, %v662_v35  ;;  %v971_v16 = vmul.f32 %v969_v2, %v931_v63 }
 0x2e8   :  { %v664_v47 = vpop.f32.mrf.mxu0  ;;  %v935_v37 = vpop.f32.mrf.mxu1 }
 0x2e9   :  { %v972_v10 = vmul.f32 %v965_v38, %v935_v37  ;;  %v701_v33 = vmul.f32 %v697_v42, %v664_v47 }
 0x2ea   :  { %v668_v22 = vpop.f32.mrf.mxu0  ;;  %v937_v36 = vpop.f32.mrf.mxu1 }
 0x2eb   :  { %v973_v7 = vmul.f32 %v969_v2, %v937_v36  ;;  %v702_v3 = vmul.f32 %v693_v30, %v668_v22 }
 0x2ec   :  { %v670_v59 = vpop.f32.mrf.mxu0  ;;  %v941_v54 = vpop.f32.mrf.mxu1 }
 0x2ed   :  { %v974_v5 = vmul.f32 %v965_v38, %v941_v54  ;;  %v703_v37 = vmul.f32 %v697_v42, %v670_v59 }
 0x2ee   :  { %v674_v55 = vpop.f32.mrf.mxu0  ;;  %v943_v51 = vpop.f32.mrf.mxu1 }
 0x2ef   :  { %v704_v61 = vmul.f32 %v693_v30, %v674_v55  ;;  %v975_v54 = vmul.f32 %v969_v2, %v943_v51 }
 0x2f0   :  { %v676_v34 = vpop.f32.mrf.mxu0  ;;  %v947_v11 = vpop.f32.mrf.mxu1 }
 0x2f1   :  { %v976_v36 = vmul.f32 %v965_v38, %v947_v11  ;;  %v705_v60 = vmul.f32 %v697_v42, %v676_v34 }
 0x2f2   :  { %v789_v44 = vpop.f32.mrf.mxu0 }
 0x2f3   :  { %v830_v50 = vmul.f32 %v825_v32, %v789_v44 }
 0x2f4   :  { %v791_v52 = vpop.f32.mrf.mxu0 }
 0x2f5   :  { %v838_v56 = vadd.f32 %v830_v50, %v698_v48  ;;  %v831_v62 = vmul.f32 %v5031_v40, %v791_v52 }
 0x2f6   :  { %v795_v4 = vpop.f32.mrf.mxu0 }
 0x2f7   :  { %v832_v8 = vmul.f32 %v825_v32, %v795_v4  ;;  %v839_v14 = vadd.f32 %v831_v62, %v699_v0  ;;  %v978_v25 = vadd.f32 %v970_v58, %v838_v56  ;;  %v949_v58 = vpop.f32.mrf.mxu1 }
 0x2f8   :  { %v797_v9 = vpop.f32.mrf.mxu0 }
 0x2f9   :  { %v840_v21 = vadd.f32 %v832_v8, %v700_v6  ;;  %v833_v41 = vmul.f32 %v5031_v40, %v797_v9  ;;  %v979_v31 = vadd.f32 %v971_v16, %v839_v14  ;;  %v998_v27 = vadd.f32 %v991_v12, %v978_v25 }
 0x2fa   :  { %v801_v18 = vpop.f32.mrf.mxu0  ;;  %v977_v6 = vmul.f32 %v969_v2, %v949_v58 }
 0x2fb   :  { %v980_v57 = vadd.f32 %v972_v10, %v840_v21  ;;  %v841_v20 = vadd.f32 %v833_v41, %v701_v33  ;;  %v834_v1 = vmul.f32 %v825_v32, %v801_v18  ;;  %v999_v22 = vadd.f32 %v995_v53, %v979_v31 }
 0x2fc   :  { %v803_v35 = vpop.f32.mrf.mxu0  ;;  %v5046_v62 = vmax.f32 %v998_v27, 0.0 }
 0x2fd   :  { %v1000_v49 = vadd.f32 %v991_v12, %v980_v57  ;;  %v981_v47 = vadd.f32 %v973_v7, %v841_v20  ;;  %v842_v23 = vadd.f32 %v834_v1, %v702_v3  ;;  %v835_v63 = vmul.f32 %v5031_v40, %v803_v35 }
 0x2fe   :  { %v807_v28 = vpop.f32.mrf.mxu0  ;;  %v5053_v8 = vmax.f32 %v999_v22, 0.0  ;;  %v1032_v42 = vmul.f32 %v5046_v62, %v5046_v62 }
 0x2ff   :  { %v5044_v44 = vmax.f32 %v1000_v49, 0.0  ;;  %v1001_v46 = vadd.f32 %v995_v53, %v981_v47  ;;  %v836_v48 = vmul.f32 %v825_v32, %v807_v28  ;;  %v982_v50 = vadd.f32 %v974_v5, %v842_v23 }
 0x300   :  { %v843_v52 = vadd.f32 %v835_v63, %v703_v37  ;;  %v809_v56 = vpop.f32.mrf.mxu0  ;;  %v1033_v18 = vmul.f32 %v5053_v8, %v5053_v8 }
 0x301   :  { %v844_v59 = vadd.f32 %v836_v48, %v704_v61  ;;  %v5048_v55 = vmax.f32 %v1001_v46, 0.0  ;;  %v1002_v30 = vadd.f32 %v991_v12, %v982_v50  ;;  %v837_v4 = vmul.f32 %v5031_v40, %v809_v56 }
 0x302   :  { %v983_v0 = vadd.f32 %v975_v54, %v843_v52  ;;  %v1034_v32 = vmul.f32 %v5044_v44, %v5044_v44  ;;  %v1014_v9 = vadd.f32 %v5044_v44, %v5046_v62 }
 0x303   :  { %v984_v38 = vadd.f32 %v976_v36, %v844_v59  ;;  %v5055_v10 = vmax.f32 %v1002_v30, 0.0  ;;  %v845_v34 = vadd.f32 %v837_v4, %v705_v60  ;;  %v1035_v40 = vmul.f32 %v5048_v55, %v5048_v55 }
 0x304   :  { %v1003_v14 = vadd.f32 %v995_v53, %v983_v0  ;;  %v1040_v21 = vadd.f32 %v1034_v32, %v1032_v42  ;;  %v1315_v42 = vld [vmem:[%s7623_s6 + $0xe8] sm:$0xff] }
 0x305   :  { %v1004_v51 = vadd.f32 %v991_v12, %v984_v38  ;;  %v1036_v33 = vmul.f32 %v5055_v10, %v5055_v10  ;;  %v985_v25 = vadd.f32 %v977_v6, %v845_v34  ;;  %v1015_v41 = vadd.f32 %v1014_v9, %v5055_v10 }
 0x306   :  { %v5065_v2 = vmax.f32 %v1003_v14, 0.0  ;;  %v1023_v12 = vadd.f32 %v5048_v55, %v5053_v8  ;;  %v1049_v1 = vadd.f32 %v1035_v40, %v1033_v18  ;;  %v1316_v14 = vld [vmem:[%s7623_s6 + $0xf0] sm:$0xff]  ;;  %v1313_v40 = vld [vmem:[%s7623_s6 + $0xd8] sm:$0xff]  ;;  %v5115_v18 = vld [vmem:[%s7618_s13 + $0xe8] sm:$0xff] }
 0x307   :  { %v5068_v16 = vmax.f32 %v1004_v51, 0.0  ;;  %v1005_v20 = vadd.f32 %v995_v53, %v985_v25  ;;  %v1041_v7 = vadd.f32 %v1040_v21, %v1036_v33  ;;  %v1314_v51 = vld [vmem:[%s7623_s6 + $0xe0] sm:$0xff]  ;;  %v1312_v33 = vld [vmem:[%s7623_s6 + $0xd0] sm:$0xff]  ;;  %v1311_v25 = vld [vmem:[%s7623_s6 + $0xc8] sm:$0xff] }
 0x308   :  { %v1037_v57 = vmul.f32 %v5065_v2, %v5065_v2  ;;  %v1024_v5 = vadd.f32 %v1023_v12, %v5065_v2  ;;  %v5106_v21 = vld [vmem:[%s7618_s13 + $0xf0] sm:$0xff]  ;;  %v1309_v12 = vld [vmem:[%s7623_s6 + $0xb8] sm:$0xff] }
 0x309   :  { %v1016_v3 = vadd.f32 %v1015_v41, %v5068_v16  ;;  %v1038_v31 = vmul.f32 %v5068_v16, %v5068_v16  ;;  %v5080_v35 = vmax.f32 %v1005_v20, 0.0  ;;  %v1310_v41 = vld [vmem:[%s7623_s6 + $0xc0] sm:$0xff]  ;;  %v1308_v20 = vld [vmem:[%s7623_s6 + $0xb0] sm:$0xff] }
 0x30a   :  { %v1050_v49 = vadd.f32 %v1049_v1, %v1037_v57  ;;  %v5124_v57 = vld [vmem:[%s7618_s13 + $0xe0] sm:$0xff] }
 0x30b   :  { %v1017_v11 = vrot.slane %v1016_v3, 4  ;;  %v1042_v27 = vadd.f32 %v1041_v7, %v1038_v31  ;;  %v1025_v47 = vadd.f32 %v1024_v5, %v5080_v35  ;;  %v1039_v37 = vmul.f32 %v5080_v35, %v5080_v35  ;;  %v5133_v7 = vld [vmem:[%s7618_s13 + $0xd8] sm:$0xff]  ;;  %v5142_v31 = vld [vmem:[%s7618_s13 + $0xd0] sm:$0xff]  ;;  %v1306_v1 = vld [vmem:[%s7623_s6 + $0xa0] sm:$0xff] }
 0x30c   :  { %v5151_v5 = vld [vmem:[%s7618_s13 + $0xc8] sm:$0xff] }
 0x30d   :  { %v1018_v53 = vadd.f32 %v1017_v11, %v1016_v3  ;;  %v1043_v61 = vrot.slane %v1042_v27, 4  ;;  %v1026_v23 = vrot.slane %v1025_v47, 4  ;;  %v1051_v63 = vadd.f32 %v1050_v49, %v1039_v37  ;;  %v1307_v3 = vld [vmem:[%s7623_s6 + $0xa8] sm:$0xff]  ;;  %v1305_v11 = vld [vmem:[%s7623_s6 + $0x98] sm:$0xff]  ;;  %v1304_v49 = vld [vmem:[%s7623_s6 + $0x90] sm:$0xff] }
 0x30e   :  { %v1303_v37 = vld [vmem:[%s7623_s6 + $0x88] sm:$0xff] }
 0x30f   :  { %v1019_v28 = vrot.slane %v1018_v53, 2  ;;  %v1044_v46 = vadd.f32 %v1043_v61, %v1042_v27  ;;  %v1027_v48 = vadd.f32 %v1026_v23, %v1025_v47  ;;  %v1052_v36 = vrot.slane %v1051_v63, 4  ;;  %v5160_v27 = vld [vmem:[%s7618_s13 + $0xc0] sm:$0xff]  ;;  %v5169_v47 = vld [vmem:[%s7618_s13 + $0xb8] sm:$0xff]  ;;  %v5187_v23 = vld [vmem:[%s7618_s13 + $0xa8] sm:$0xff] }
 0x310   :  { %v1302_v61 = vld [vmem:[%s7623_s6 + $0x80] sm:$0xff] }
 0x311   :  { %v1020_v22 = vadd.f32 %v1019_v28, %v1018_v53  ;;  %v1045_v50 = vrot.slane %v1044_v46, 2  ;;  %v1028_v52 = vrot.slane %v1027_v48, 2  ;;  %v1053_v54 = vadd.f32 %v1052_v36, %v1051_v63  ;;  %v5178_v53 = vld [vmem:[%s7618_s13 + $0xb0] sm:$0xff]  ;;  %v5193_v63 = vld [vmem:[%s7618_s13 + $0xa0] sm:$0xff]  ;;  %v5199_v28 = vld [vmem:[%s7618_s13 + $0x98] sm:$0xff] }
 0x312   :  { %v5217_v36 = vld [vmem:[%s7618_s13 + $0x80] sm:$0xff] }
 0x313   :  { %v1046_v56 = vadd.f32 %v1045_v50, %v1044_v46  ;;  %v1029_v58 = vadd.f32 %v1028_v52, %v1027_v48  ;;  %v1054_v60 = vrot.slane %v1053_v54, 2  ;;  %v1021_v59 = vrot.slane %v1020_v22, 1  ;;  %v5205_v46 = vld [vmem:[%s7618_s13 + $0x90] sm:$0xff]  ;;  %v5211_v48 = vld [vmem:[%s7618_s13 + $0x88] sm:$0xff] }
 0x314   :  { %v5229_v50 = vld [vmem:[%s7618_s13 + $0x70] sm:$0xff]  ;;  %v5235_v52 = vld [vmem:[%s7618_s13 + $0x68] sm:$0xff] }
 0x315   :  { %v1030_v30 = vrot.slane %v1029_v58, 1  ;;  %v1055_v0 = vadd.f32 %v1054_v60, %v1053_v54  ;;  %v1047_v4 = vrot.slane %v1046_v56, 1  ;;  %v1022_v6 = vadd.f32 %v1021_v59, %v1020_v22  ;;  %v5223_v22 = vld [vmem:[%s7618_s13 + $0x78] sm:$0xff]  ;;  %v5241_v54 = vld [vmem:[%s7618_s13 + $0x60] sm:$0xff]  ;;  %v5259_v60 = vld [vmem:[%s7618_s13 + $0x48] sm:$0xff] }
 0x316   :  { %v5265_v59 = vld [vmem:[%s7618_s13 + $0x40] sm:$0xff] }
 0x317   :  { %v1031_v32 = vadd.f32 %v1030_v30, %v1029_v58  ;;  %v1056_v38 = vrot.slane %v1055_v0, 1  ;;  %v1048_v9 = vadd.f32 %v1047_v4, %v1046_v56  ;;  %v5247_v56 = vld [vmem:[%s7618_s13 + $0x58] sm:$0xff]  ;;  %v5253_v58 = vld [vmem:[%s7618_s13 + $0x50] sm:$0xff]  ;;  %v5283_v4 = vld [vmem:[%s7618_s13 + $0x28] sm:$0xff] }
 0x318   :  { %v5271_v30 = vld [vmem:[%s7618_s13 + $0x38] sm:$0xff] }
 0x319   :  { %1122 = vmatprep.mubr.f32.mxu1 %v1031_v32  ;;  %v1057_v34 = vadd.f32 %v1056_v38, %v1055_v0  ;;  %v5277_v0 = vld [vmem:[%s7618_s13 + $0x30] sm:$0xff]  ;;  %v5289_v32 = vld [vmem:[%s7618_s13 + $0x20] sm:$0xff]  ;;  %v5295_v38 = vld [vmem:[%s7618_s13 + $0x18] sm:$0xff] }
 0x31a   :  { %1123 = vmatmul.mubr.f32.vlgmr.msra.gmra.mxu1 %v1022_v6  ;;  %v5301_v6 = vld [vmem:[%s7618_s13 + $0x10] sm:$0xff] }
 0x31b   :  { %1193 = vmatprep.mubr.f32.mxu0 %v1057_v34  ;;  %1363 = vmatpush1.msra.mxu1 %v1316_v14  ;;  %v5307_v14 = vld [vmem:[%s7618_s13 + $0x8] sm:$0xff]  ;;  %v5313_v34 = vld [vmem:[%s7618_s13] sm:$0xff] }
 0x31c   :  { %1194 = vmatmul.mubr.f32.vlgmr.msra.gmra.mxu0 %v1048_v9  ;;  %1364 = vmatprep.subr.mxu1 %v1315_v42  ;;  %v5319_v42 = vld [vmem:[%s7618_s13 + $0x1f8] sm:$0xff]  ;;  %v5325_v9 = vld [vmem:[%s7618_s13 + $0x1f0] sm:$0xff] }
 0x31d   :  { %1365 = vmatpush1.msra.mxu1 %v1314_v51  ;;  %1504 = vmatpush1.msra.mxu0 %v5106_v21  ;;  %v5331_v51 = vld [vmem:[%s7618_s13 + $0x1e8] sm:$0xff] }
 0x31e   :  { %1366 = vmatprep.subr.mxu1 %v1313_v40  ;;  %1505 = vmatprep.subr.mxu0 %v5115_v18  ;;  %v5337_v40 = vld [vmem:[%s7618_s13 + $0x1e0] sm:$0xff] }
 0x31f   :  { %1367 = vmatpush1.msra.mxu1 %v1312_v33  ;;  %1506 = vmatpush1.msra.mxu0 %v5124_v57  ;;  %v5343_v33 = vld [vmem:[%s7618_s13 + $0x1d8] sm:$0xff] }
 0x320   :  { %1368 = vmatprep.subr.mxu1 %v1311_v25  ;;  %1507 = vmatprep.subr.mxu0 %v5133_v7  ;;  %v5349_v25 = vld [vmem:[%s7618_s13 + $0x1d0] sm:$0xff] }
 0x321   :  { %1369 = vmatpush1.msra.mxu1 %v1310_v41  ;;  %1508 = vmatpush1.msra.mxu0 %v5142_v31  ;;  %7965 = vst [vmem:[#allocation6_spill] sm:$0xff] %v5349_v25  ;;  %v5355_v41 = vld [vmem:[%s7618_s13 + $0x1c8] sm:$0xff] }
 0x322   :  { %1370 = vmatprep.subr.mxu1 %v1309_v12  ;;  %1509 = vmatprep.subr.mxu0 %v5151_v5  ;;  %7966 = vst [vmem:[#allocation7_spill] sm:$0xff] %v5355_v41  ;;  %v5361_v12 = vld [vmem:[%s7618_s13 + $0x1c0] sm:$0xff] }
 0x323   :  { %1371 = vmatpush1.msra.mxu1 %v1308_v20  ;;  %1510 = vmatpush1.msra.mxu0 %v5160_v27  ;;  %7967 = vst [vmem:[#allocation8_spill] sm:$0xff] %v5361_v12  ;;  %v5367_v20 = vld [vmem:[%s7618_s13 + $0x1b8] sm:$0xff] }
 0x324   :  { %1372 = vmatprep.subr.mxu1 %v1307_v3  ;;  %1511 = vmatprep.subr.mxu0 %v5169_v47  ;;  %7968 = vst [vmem:[#allocation9_spill] sm:$0xff] %v5367_v20  ;;  %v5373_v3 = vld [vmem:[%s7618_s13 + $0x1b0] sm:$0xff] }
 0x325   :  { %1373 = vmatpush1.msra.mxu1 %v1306_v1  ;;  %1512 = vmatpush1.msra.mxu0 %v5178_v53  ;;  %7969 = vst [vmem:[#allocation10_spill] sm:$0xff] %v5373_v3  ;;  %v5379_v1 = vld [vmem:[%s7618_s13 + $0x1a8] sm:$0xff] }
 0x326   :  { %1374 = vmatprep.subr.mxu1 %v1305_v11  ;;  %1513 = vmatprep.subr.mxu0 %v5187_v23  ;;  %7970 = vst [vmem:[#allocation11_spill] sm:$0xff] %v5379_v1  ;;  %v5385_v11 = vld [vmem:[%s7618_s13 + $0x1a0] sm:$0xff] }
 0x327   :  { %1375 = vmatpush1.msra.mxu1 %v1304_v49  ;;  %1514 = vmatpush1.msra.mxu0 %v5193_v63  ;;  %7971 = vst [vmem:[#allocation12_spill] sm:$0xff] %v5385_v11  ;;  %v5391_v49 = vld [vmem:[%s7618_s13 + $0x198] sm:$0xff] }
 0x328   :  { %1376 = vmatprep.subr.mxu1 %v1303_v37  ;;  %1515 = vmatprep.subr.mxu0 %v5199_v28  ;;  %7972 = vst [vmem:[#allocation13_spill] sm:$0xff] %v5391_v49  ;;  %v5397_v37 = vld [vmem:[%s7618_s13 + $0x190] sm:$0xff] }
 0x329   :  { %1377 = vmatpush1.msra.mxu1 %v1302_v61  ;;  %1516 = vmatpush1.msra.mxu0 %v5205_v46  ;;  %7973 = vst [vmem:[#allocation14_spill] sm:$0xff] %v5397_v37  ;;  %v5403_v61 = vld [vmem:[%s7618_s13 + $0x188] sm:$0xff] }
 0x32a   :  { %1517 = vmatprep.subr.mxu0 %v5211_v48  ;;  %7974 = vst [vmem:[#allocation15_spill] sm:$0xff] %v5403_v61 }
 0x32b   :  { %1518 = vmatpush1.msra.mxu0 %v5217_v36 }
 0x32c   :  { %1519 = vmatprep.subr.mxu0 %v5223_v22 }
 0x32d   :  { %1520 = vmatpush1.msra.mxu0 %v5229_v50 }
 0x32e   :  { %1521 = vmatprep.subr.mxu0 %v5235_v52 }
 0x32f   :  { %1522 = vmatpush1.msra.mxu0 %v5241_v54 }
 0x330   :  { %1523 = vmatprep.subr.mxu0 %v5247_v56 }
 0x331   :  { %1524 = vmatpush1.msra.mxu0 %v5253_v58 }
 0x332   :  { %1525 = vmatprep.subr.mxu0 %v5259_v60 }
 0x333   :  { %1526 = vmatpush1.msra.mxu0 %v5265_v59 }
 0x334   :  { %1527 = vmatprep.subr.mxu0 %v5271_v30 }
 0x335   :  { %1528 = vmatpush1.msra.mxu0 %v5277_v0 }
 0x336   :  { %1529 = vmatprep.subr.mxu0 %v5283_v4 }
 0x337   :  { %1530 = vmatpush1.msra.mxu0 %v5289_v32 }
 0x338   :  { %1531 = vmatprep.subr.mxu0 %v5295_v38 }
 0x339   :  { %1532 = vmatpush1.msra.mxu0 %v5301_v6 }
 0x33a   :  { %1533 = vmatprep.subr.mxu0 %v5307_v14 }
 0x33b   :  { %1534 = vmatpush1.msra.mxu0 %v5313_v34 }
 0x33c   :  { %1535 = vmatprep.subr.mxu0 %v5319_v42 }
 0x33d   :  { %1536 = vmatpush2.msra.mxu0 %v5325_v9 }
 0x33e   :  { %1537 = vmatprep.subr.mxu0 %v5331_v51 }
 0x33f   :  { %1538 = vmatpush2.msra.mxu0 %v5337_v40 }
 0x340   :  { %1539 = vmatprep.subr.mxu0 %v5343_v33 }
 0x341   :  { %1540 = vmatpush2.msra.mxu0 %v5349_v25 }
 0x342   :  { %1541 = vmatprep.subr.mxu0 %v5355_v41 }
 0x343   :  { %1542 = vmatpush2.msra.mxu0 %v5361_v12 }
 0x344   :  { %1543 = vmatprep.subr.mxu0 %v5367_v20 }
 0x345   :  { %1544 = vmatpush2.msra.mxu0 %v5373_v3 }
 0x346   :  { %1545 = vmatprep.subr.mxu0 %v5379_v1 }
 0x347   :  { %1546 = vmatpush2.msra.mxu0 %v5385_v11 }
 0x348   :  { %1547 = vmatprep.subr.mxu0 %v5391_v49 }
 0x349   :  { %1548 = vmatpush2.msra.mxu0 %v5397_v37 }
 0x34a   :  { %1549 = vmatprep.subr.mxu0 %v5403_v61  ;;  %v1332_v61 = vld [vmem:[%s7623_s6 + $0x170] sm:$0xff] }
 0x34b   :  { %1550 = vmatpush2.msra.mxu0 %v5409_v26  ;;  %v1333_v26 = vld [vmem:[%s7623_s6 + $0x178] sm:$0xff] }
 0x34c   :  { %1551 = vmatprep.subr.mxu0 %v5415_v29  ;;  %v1299_v29 = vld [vmem:[%s7623_s6 + $0x68] sm:$0xff] }
 0x34d   :  { %1552 = vmatpush2.msra.mxu0 %v5421_v24  ;;  %v5445_v24 = vld [vmem:[%s7618_s13 + $0x150] sm:$0xff] }
 0x34e   :  { %1553 = vmatprep.subr.mxu0 %v5427_v15  ;;  %7981 = vst [vmem:[#allocation22_spill] sm:$0xff] %v5445_v24  ;;  %v5451_v15 = vld [vmem:[%s7618_s13 + $0x148] sm:$0xff] }
 0x34f   :  { %1554 = vmatpush2.msra.mxu0 %v5433_v19  ;;  %7982 = vst [vmem:[#allocation23_spill] sm:$0xff] %v5451_v15  ;;  %v5457_v19 = vld [vmem:[%s7618_s13 + $0x140] sm:$0xff] }
 0x350   :  { %1555 = vmatprep.subr.mxu0 %v5439_v39  ;;  %7983 = vst [vmem:[#allocation24_spill] sm:$0xff] %v5457_v19  ;;  %v5463_v39 = vld [vmem:[%s7618_s13 + $0x138] sm:$0xff] }
 0x351   :  { %1556 = vmatpush2.msra.mxu0 %v5445_v24  ;;  %7984 = vst [vmem:[#allocation25_spill] sm:$0xff] %v5463_v39  ;;  %v5469_v24 = vld [vmem:[%s7618_s13 + $0x130] sm:$0xff] }
 0x352   :  { %1557 = vmatprep.subr.mxu0 %v5451_v15  ;;  %7985 = vst [vmem:[#allocation26_spill] sm:$0xff] %v5469_v24  ;;  %v5475_v15 = vld [vmem:[%s7618_s13 + $0x128] sm:$0xff] }
 0x353   :  { %1558 = vmatpush2.msra.mxu0 %v5457_v19  ;;  %7986 = vst [vmem:[#allocation27_spill] sm:$0xff] %v5475_v15  ;;  %v5481_v19 = vld [vmem:[%s7618_s13 + $0x120] sm:$0xff] }
 0x354   :  { %1559 = vmatprep.subr.mxu0 %v5463_v39  ;;  %7987 = vst [vmem:[#allocation28_spill] sm:$0xff] %v5481_v19  ;;  %v5487_v39 = vld [vmem:[%s7618_s13 + $0x118] sm:$0xff] }
 0x355   :  { %1560 = vmatpush2.msra.mxu0 %v5469_v24  ;;  %7988 = vst [vmem:[#allocation29_spill] sm:$0xff] %v5487_v39  ;;  %v5493_v24 = vld [vmem:[%s7618_s13 + $0x110] sm:$0xff] }
 0x356   :  { %1561 = vmatprep.subr.mxu0 %v5475_v15  ;;  %7989 = vst [vmem:[#allocation30_spill] sm:$0xff] %v5493_v24  ;;  %v1301_v15 = vld [vmem:[%s7623_s6 + $0x78] sm:$0xff] }
 0x357   :  { %1562 = vmatpush2.msra.mxu0 %v5481_v19  ;;  %v5502_v19 = vld [vmem:[%s7618_s13 + $0x108] sm:$0xff]  ;;  %1378 = vmatprep.subr.mxu1 %v1301_v15  ;;  %v1298_v15 = vld [vmem:[%s7623_s6 + $0x60] sm:$0xff] }
 0x358   :  { %1563 = vmatprep.subr.mxu0 %v5487_v39  ;;  %7990 = vst [vmem:[#allocation31_spill] sm:$0xff] %v5502_v19  ;;  %v1300_v39 = vld [vmem:[%s7623_s6 + $0x70] sm:$0xff] }
 0x359   :  { %1564 = vmatpush2.msra.mxu0 %v5493_v24  ;;  %v5511_v24 = vld [vmem:[%s7618_s13 + $0x100] sm:$0xff]  ;;  %1379 = vmatpush1.msra.mxu1 %v1300_v39  ;;  %v1295_v39 = vld [vmem:[%s7623_s6 + $0x48] sm:$0xff] }
 0x35a   :  { %1565 = vmatprep.subr.mxu0 %v5502_v19  ;;  %7991 = vst [vmem:[#allocation32_spill] sm:$0xff] %v5511_v24  ;;  %1380 = vmatprep.subr.mxu1 %v1299_v29  ;;  %v1297_v19 = vld [vmem:[%s7623_s6 + $0x58] sm:$0xff]  ;;  %v1294_v29 = vld [vmem:[%s7623_s6 + $0x40] sm:$0xff] }
 0x35b   :  { %1566 = vmatpush2.msra.mxu0 %v5511_v24  ;;  %1381 = vmatpush1.msra.mxu1 %v1298_v15  ;;  %v1296_v24 = vld [vmem:[%s7623_s6 + $0x50] sm:$0xff]  ;;  %v1293_v15 = vld [vmem:[%s7623_s6 + $0x38] sm:$0xff] }
 0x35c   :  { %1382 = vmatprep.subr.mxu1 %v1297_v19  ;;  %v1292_v19 = vld [vmem:[%s7623_s6 + $0x30] sm:$0xff] }
 0x35d   :  { %1383 = vmatpush1.msra.mxu1 %v1296_v24  ;;  %v1291_v24 = vld [vmem:[%s7623_s6 + $0x28] sm:$0xff] }
 0x35e   :  { %1384 = vmatprep.subr.mxu1 %v1295_v39  ;;  %v1290_v39 = vld [vmem:[%s7623_s6 + $0x20] sm:$0xff] }
 0x35f   :  { %1385 = vmatpush1.msra.mxu1 %v1294_v29  ;;  %v1289_v29 = vld [vmem:[%s7623_s6 + $0x18] sm:$0xff] }
 0x360   :  { %1386 = vmatprep.subr.mxu1 %v1293_v15  ;;  %v1288_v15 = vld [vmem:[%s7623_s6 + $0x10] sm:$0xff] }
 0x361   :  { %1387 = vmatpush1.msra.mxu1 %v1292_v19  ;;  %v1287_v19 = vld [vmem:[%s7623_s6 + $0x8] sm:$0xff] }
 0x362   :  { %1388 = vmatprep.subr.mxu1 %v1291_v24  ;;  %v1286_v24 = vld [vmem:[%s7623_s6] sm:$0xff] }
 0x363   :  { %1389 = vmatpush1.msra.mxu1 %v1290_v39  ;;  %v1349_v39 = vld [vmem:[%s7623_s6 + $0x1f8] sm:$0xff] }
 0x364   :  { %1390 = vmatprep.subr.mxu1 %v1289_v29  ;;  %v1348_v29 = vld [vmem:[%s7623_s6 + $0x1f0] sm:$0xff] }
 0x365   :  { %1391 = vmatpush1.msra.mxu1 %v1288_v15  ;;  %v1347_v15 = vld [vmem:[%s7623_s6 + $0x1e8] sm:$0xff] }
 0x366   :  { %1392 = vmatprep.subr.mxu1 %v1287_v19  ;;  %v1346_v19 = vld [vmem:[%s7623_s6 + $0x1e0] sm:$0xff] }
 0x367   :  { %1393 = vmatpush1.msra.mxu1 %v1286_v24  ;;  %v1345_v24 = vld [vmem:[%s7623_s6 + $0x1d8] sm:$0xff] }
 0x368   :  { %1394 = vmatprep.subr.mxu1 %v1349_v39  ;;  %v1344_v39 = vld [vmem:[%s7623_s6 + $0x1d0] sm:$0xff] }
 0x369   :  { %1395 = vmatpush2.msra.mxu1 %v1348_v29  ;;  %v1343_v29 = vld [vmem:[%s7623_s6 + $0x1c8] sm:$0xff] }
 0x36a   :  { %1396 = vmatprep.subr.mxu1 %v1347_v15  ;;  %v1342_v15 = vld [vmem:[%s7623_s6 + $0x1c0] sm:$0xff] }
 0x36b   :  { %1397 = vmatpush2.msra.mxu1 %v1346_v19  ;;  %v1341_v19 = vld [vmem:[%s7623_s6 + $0x1b8] sm:$0xff] }
 0x36c   :  { %1398 = vmatprep.subr.mxu1 %v1345_v24  ;;  %v1340_v24 = vld [vmem:[%s7623_s6 + $0x1b0] sm:$0xff] }
 0x36d   :  { %1399 = vmatpush2.msra.mxu1 %v1344_v39  ;;  %v1339_v39 = vld [vmem:[%s7623_s6 + $0x1a8] sm:$0xff] }
 0x36e   :  { %1400 = vmatprep.subr.mxu1 %v1343_v29  ;;  %v1338_v29 = vld [vmem:[%s7623_s6 + $0x1a0] sm:$0xff] }
 0x36f   :  { %1401 = vmatpush2.msra.mxu1 %v1342_v15  ;;  %v1337_v15 = vld [vmem:[%s7623_s6 + $0x198] sm:$0xff] }
 0x370   :  { %1402 = vmatprep.subr.mxu1 %v1341_v19  ;;  %v1336_v19 = vld [vmem:[%s7623_s6 + $0x190] sm:$0xff] }
 0x371   :  { %1403 = vmatpush2.msra.mxu1 %v1340_v24  ;;  %v1335_v24 = vld [vmem:[%s7623_s6 + $0x188] sm:$0xff] }
 0x372   :  { %1404 = vmatprep.subr.mxu1 %v1339_v39  ;;  %v1334_v39 = vld [vmem:[%s7623_s6 + $0x180] sm:$0xff] }
 0x373   :  { %1405 = vmatpush2.msra.mxu1 %v1338_v29  ;;  %v1331_v29 = vld [vmem:[%s7623_s6 + $0x168] sm:$0xff] }
 0x374   :  { %1406 = vmatprep.subr.mxu1 %v1337_v15  ;;  %v1330_v15 = vld [vmem:[%s7623_s6 + $0x160] sm:$0xff] }
 0x375   :  { %1407 = vmatpush2.msra.mxu1 %v1336_v19  ;;  %v1329_v19 = vld [vmem:[%s7623_s6 + $0x158] sm:$0xff] }
 0x376   :  { %1408 = vmatprep.subr.mxu1 %v1335_v24  ;;  %v1328_v24 = vld [vmem:[%s7623_s6 + $0x150] sm:$0xff] }
 0x377   :  { %1409 = vmatpush2.msra.mxu1 %v1334_v39  ;;  %v1327_v39 = vld [vmem:[%s7623_s6 + $0x148] sm:$0xff] }
 0x378   :  { %1410 = vmatprep.subr.mxu1 %v1333_v26  ;;  %v1326_v26 = vld [vmem:[%s7623_s6 + $0x140] sm:$0xff] }
 0x379   :  { %1411 = vmatpush2.msra.mxu1 %v1332_v61  ;;  %v1325_v61 = vld [vmem:[%s7623_s6 + $0x138] sm:$0xff] }
 0x37a   :  { %1412 = vmatprep.subr.mxu1 %v1331_v29  ;;  %v1324_v29 = vld [vmem:[%s7623_s6 + $0x130] sm:$0xff] }
 0x37b   :  { %1413 = vmatpush2.msra.mxu1 %v1330_v15  ;;  %v1323_v15 = vld [vmem:[%s7623_s6 + $0x128] sm:$0xff] }
 0x37c   :  { %1414 = vmatprep.subr.mxu1 %v1329_v19  ;;  %v1322_v19 = vld [vmem:[%s7623_s6 + $0x120] sm:$0xff] }
 0x37d   :  { %1415 = vmatpush2.msra.mxu1 %v1328_v24  ;;  %v1321_v24 = vld [vmem:[%s7623_s6 + $0x118] sm:$0xff] }
 0x37e   :  { %1416 = vmatprep.subr.mxu1 %v1327_v39  ;;  %v1320_v39 = vld [vmem:[%s7623_s6 + $0x110] sm:$0xff] }
 0x37f   :  { %1417 = vmatpush2.msra.mxu1 %v1326_v26  ;;  %v1319_v26 = vld [vmem:[%s7623_s6 + $0x108] sm:$0xff] }
 0x380   :  { %1418 = vmatprep.subr.mxu1 %v1325_v61  ;;  %v1318_v61 = vld [vmem:[%s7623_s6 + $0x100] sm:$0xff] }
 0x381   :  { %1419 = vmatpush2.msra.mxu1 %v1324_v29 }
 0x382   :  { %1420 = vmatprep.subr.mxu1 %v1323_v15 }
 0x383   :  { %1421 = vmatpush2.msra.mxu1 %v1322_v19 }
 0x384   :  { %1422 = vmatprep.subr.mxu1 %v1321_v24 }
 0x385   :  { %1423 = vmatpush2.msra.mxu1 %v1320_v39 }
 0x386   :  { %1424 = vmatprep.subr.mxu1 %v1319_v26 }
 0x387   :  { %1425 = vmatpush2.msra.mxu1 %v1318_v61 }
 0x388   :  { %1574 = vmatprep.subr.mxu1 %v5001_v17  ;;  %v5658_v17 = vld [vmem:[%s7620_s14] sm:$0x3] }
 0x3da   :  { %v1124_v29 = vpop.f32.mrf.mxu1 }
 0x3db   :  { %v1200_v15 = vmul.f32 %v1124_v29, %v1124_v29 }
 0x3dc   :  { %v1126_v37 = vpop.f32.mrf.mxu1  ;;  %v1195_v49 = vpop.f32.mrf.mxu0 }
 0x3dd   :  { %v1201_v11 = vmul.f32 %v1126_v37, %v1126_v37  ;;  %v1202_v19 = vsub.f32 %v1195_v49, %v1200_v15 }
 0x3de   :  { %v1197_v1 = vpop.f32.mrf.mxu0 }
 0x3df   :  { %v1204_v3 = vadd.f32 1e-05, %v1202_v19  ;;  %v1203_v20 = vsub.f32 %v1197_v1, %v1201_v11  ;;  %v5668_v11 = vld [vmem:[%s7621_s15] sm:$0x3] }
 0x3e1   :  { %v1205_v12 = vadd.f32 1e-05, %v1203_v20  ;;  %3757 = vrsqrt.f32 %v1204_v3 }
 0x3e3   :  { %3759 = vrsqrt.f32 %v1205_v12 }
 0x3ee   :  { %v3758_v24 = vpop.eup %3757 }
 0x3f0   :  { %v3760_v41 = vpop.eup %3759 }
 0x3f1   :  { %v1210_v25 = vcombine.low %v3758_v24, %v3760_v41 }
 0x3f3   :  { %v1217_v39 = vrot.slane %v1210_v25, %v4788_v13 }
 0x3f5   :  { %v1224_v26 = vrot.slane %v1217_v39, %v4788_v13 }
 0x3f7   :  { %v1226_v49 = vmul.f32 %v5658_v17, %v1224_v26 }
 0x3f9   :  { %v1231_v61 = vrot.slane %v1226_v49, %v4735_v43  ;;  %v1235_v20 = vrot.slane %v1226_v49, %v4741_v45 }
 0x3fb   :  { %v1238_v3 = vmul.f32 %v1231_v61, %v1124_v29  ;;  %v1239_v12 = vmul.f32 %v1235_v20, %v1126_v37  ;;  %v1260_v19 = vmul.f32 %v1235_v20, %v5053_v8  ;;  %v1259_v39 = vmul.f32 %v1231_v61, %v5046_v62 }
 0x3fc   :  { %v1262_v49 = vmul.f32 %v1235_v20, %v5048_v55  ;;  %v1266_v55 = vmul.f32 %v1235_v20, %v5080_v35  ;;  %v7993_v35 = vld [vmem:[#allocation7_spill] sm:$0xff] }
 0x3fd   :  { %v1242_v1 = vcombine.low %v1238_v3, %v1239_v12  ;;  %v1261_v12 = vmul.f32 %v1231_v61, %v5044_v44 }
 0x3ff   :  { %v1249_v41 = vrot.slane %v1242_v1, %v4788_v13  ;;  %v1264_v1 = vmul.f32 %v1235_v20, %v5065_v2  ;;  %v8017_v20 = vld [vmem:[#allocation31_spill] sm:$0xff] }
 0x401   :  { %v1256_v25 = vrot.slane %v1249_v41, %v4788_v13  ;;  %v1263_v41 = vmul.f32 %v1231_v61, %v5055_v10 }
 0x403   :  { %v1258_v15 = vsub.f32 %v5668_v11, %v1256_v25  ;;  %v1265_v25 = vmul.f32 %v1231_v61, %v5068_v16  ;;  %v7992_v16 = vld [vmem:[#allocation6_spill] sm:$0xff] }
 0x404   :  { %v8016_v61 = vld [vmem:[#allocation30_spill] sm:$0xff] }
 0x405   :  { %v1275_v24 = vrot.slane %v1258_v15, %v4741_v45  ;;  %v1271_v37 = vrot.slane %v1258_v15, %v4735_v43  ;;  %v8018_v15 = vld [vmem:[#allocation32_spill] sm:$0xff] }
 0x407   :  { %v1279_v29 = vadd.f32 %v1275_v24, %v1260_v19  ;;  %v1278_v26 = vadd.f32 %v1271_v37, %v1259_v39  ;;  %v1281_v3 = vadd.f32 %v1275_v24, %v1262_v49  ;;  %v1280_v8 = vadd.f32 %v1271_v37, %v1261_v12  ;;  %v1350_v19 = vld [vmem:[%s7626_s7] sm:$0x3] }
 0x408   :  { %v1283_v62 = vadd.f32 %v1275_v24, %v1264_v1  ;;  %v1282_v44 = vadd.f32 %v1271_v37, %v1263_v41  ;;  %v1285_v2 = vadd.f32 %v1275_v24, %v1266_v55  ;;  %v1284_v10 = vadd.f32 %v1271_v37, %v1265_v25 }
 0x409   :  { %1426 = vmatprep.mubr.f32.mxu1 %v1279_v29  ;;  %v1355_v24 = vrot.slane %v1350_v19, %v4735_v43  ;;  %v1359_v37 = vrot.slane %v1350_v19, %v4741_v45 }
 0x40a   :  { %1427 = vmatmul.mubr.f32.vlgmr.msra.gmra.mxu1 %v1278_v26 }
 0x40b   :  { %1432 = vmatprep.mubr.f32.mxu1 %v1281_v3  ;;  %1575 = vmatpush1.msra.mxu1 %v5106_v21 }
 0x40c   :  { %1576 = vmatprep.subr.mxu1 %v5115_v18 }
 0x40d   :  { %1577 = vmatpush1.msra.mxu1 %v5124_v57 }
 0x40e   :  { %1433 = vmatmul.mubr.f32.gmra.mxu1 %v1280_v8  ;;  %1578 = vmatprep.subr.mxu1 %v5133_v7 }
 0x40f   :  { %1438 = vmatprep.mubr.f32.mxu1 %v1283_v62  ;;  %1579 = vmatpush1.msra.mxu1 %v5142_v31 }
 0x410   :  { %1580 = vmatprep.subr.mxu1 %v5151_v5 }
 0x411   :  { %1581 = vmatpush1.msra.mxu1 %v5160_v27 }
 0x412   :  { %1439 = vmatmul.mubr.f32.gmra.mxu1 %v1282_v44  ;;  %1582 = vmatprep.subr.mxu1 %v5169_v47  ;;  %v7994_v47 = vld [vmem:[#allocation8_spill] sm:$0xff] }
 0x413   :  { %1444 = vmatprep.mubr.f32.mxu1 %v1285_v2  ;;  %1583 = vmatpush1.msra.mxu1 %v5178_v53 }
 0x414   :  { %1584 = vmatprep.subr.mxu1 %v5187_v23 }
 0x415   :  { %1585 = vmatpush1.msra.mxu1 %v5193_v63 }
 0x416   :  { %1445 = vmatmul.mubr.f32.gmra.mxu1 %v1284_v10  ;;  %1586 = vmatprep.subr.mxu1 %v5199_v28 }
 0x417   :  { %1587 = vmatpush1.msra.mxu1 %v5205_v46 }
 0x418   :  { %1588 = vmatprep.subr.mxu1 %v5211_v48 }
 0x419   :  { %1589 = vmatpush1.msra.mxu1 %v5217_v36 }
 0x41a   :  { %1590 = vmatprep.subr.mxu1 %v5223_v22  ;;  %v7995_v22 = vld [vmem:[#allocation9_spill] sm:$0xff] }
 0x41b   :  { %1591 = vmatpush1.msra.mxu1 %v5229_v50  ;;  %v7996_v50 = vld [vmem:[#allocation10_spill] sm:$0xff] }
 0x41c   :  { %1592 = vmatprep.subr.mxu1 %v5235_v52  ;;  %v7997_v52 = vld [vmem:[#allocation11_spill] sm:$0xff] }
 0x41d   :  { %1593 = vmatpush1.msra.mxu1 %v5241_v54  ;;  %v7998_v54 = vld [vmem:[#allocation12_spill] sm:$0xff] }
 0x41e   :  { %1594 = vmatprep.subr.mxu1 %v5247_v56  ;;  %v7999_v56 = vld [vmem:[#allocation13_spill] sm:$0xff] }
 0x41f   :  { %1595 = vmatpush1.msra.mxu1 %v5253_v58  ;;  %v8000_v58 = vld [vmem:[#allocation14_spill] sm:$0xff] }
 0x420   :  { %1596 = vmatprep.subr.mxu1 %v5259_v60  ;;  %v8001_v60 = vld [vmem:[#allocation15_spill] sm:$0xff] }
 0x421   :  { %1597 = vmatpush1.msra.mxu1 %v5265_v59  ;;  %v8002_v59 = vld [vmem:[#allocation16_spill] sm:$0xff] }
 0x422   :  { %1598 = vmatprep.subr.mxu1 %v5271_v30  ;;  %v8003_v30 = vld [vmem:[#allocation17_spill] sm:$0xff] }
 0x423   :  { %1599 = vmatpush1.msra.mxu1 %v5277_v0  ;;  %v8004_v0 = vld [vmem:[#allocation18_spill] sm:$0xff] }
 0x424   :  { %1600 = vmatprep.subr.mxu1 %v5283_v4  ;;  %v8005_v4 = vld [vmem:[#allocation19_spill] sm:$0xff] }
 0x425   :  { %1601 = vmatpush1.msra.mxu1 %v5289_v32  ;;  %v8006_v32 = vld [vmem:[#allocation20_spill] sm:$0xff] }
 0x426   :  { %1602 = vmatprep.subr.mxu1 %v5295_v38  ;;  %v8007_v38 = vld [vmem:[#allocation21_spill] sm:$0xff] }
 0x427   :  { %1603 = vmatpush1.msra.mxu1 %v5301_v6  ;;  %v8008_v6 = vld [vmem:[#allocation22_spill] sm:$0xff] }
 0x428   :  { %1604 = vmatprep.subr.mxu1 %v5307_v14  ;;  %v8009_v14 = vld [vmem:[#allocation23_spill] sm:$0xff] }
 0x429   :  { %1605 = vmatpush1.msra.mxu1 %v5313_v34  ;;  %v8010_v34 = vld [vmem:[#allocation24_spill] sm:$0xff] }
 0x42a   :  { %1606 = vmatprep.subr.mxu1 %v5319_v42  ;;  %v8011_v42 = vld [vmem:[#allocation25_spill] sm:$0xff] }
 0x42b   :  { %1607 = vmatpush2.msra.mxu1 %v5325_v9  ;;  %v8012_v9 = vld [vmem:[#allocation26_spill] sm:$0xff] }
 0x42c   :  { %1608 = vmatprep.subr.mxu1 %v5331_v51  ;;  %v8013_v51 = vld [vmem:[#allocation27_spill] sm:$0xff] }
 0x42d   :  { %1609 = vmatpush2.msra.mxu1 %v5337_v40  ;;  %v8014_v40 = vld [vmem:[#allocation28_spill] sm:$0xff] }
 0x42e   :  { %1610 = vmatprep.subr.mxu1 %v5343_v33  ;;  %v8015_v33 = vld [vmem:[#allocation29_spill] sm:$0xff] }
 0x42f   :  { %1611 = vmatpush2.msra.mxu1 %v7992_v16 }
 0x430   :  { %1612 = vmatprep.subr.mxu1 %v7993_v35 }
 0x431   :  { %1613 = vmatpush2.msra.mxu1 %v7994_v47 }
 0x432   :  { %1614 = vmatprep.subr.mxu1 %v7995_v22 }
 0x433   :  { %1615 = vmatpush2.msra.mxu1 %v7996_v50 }
 0x434   :  { %1616 = vmatprep.subr.mxu1 %v7997_v52 }
 0x435   :  { %1617 = vmatpush2.msra.mxu1 %v7998_v54 }
 0x436   :  { %1618 = vmatprep.subr.mxu1 %v7999_v56 }
 0x437   :  { %1619 = vmatpush2.msra.mxu1 %v8000_v58 }
 0x438   :  { %1620 = vmatprep.subr.mxu1 %v8001_v60 }
 0x439   :  { %1621 = vmatpush2.msra.mxu1 %v8002_v59 }
 0x43a   :  { %1622 = vmatprep.subr.mxu1 %v8003_v30 }
 0x43b   :  { %1623 = vmatpush2.msra.mxu1 %v8004_v0 }
 0x43c   :  { %1624 = vmatprep.subr.mxu1 %v8005_v4 }
 0x43d   :  { %1625 = vmatpush2.msra.mxu1 %v8006_v32 }
 0x43e   :  { %1626 = vmatprep.subr.mxu1 %v8007_v38 }
 0x43f   :  { %1627 = vmatpush2.msra.mxu1 %v8008_v6 }
 0x440   :  { %1628 = vmatprep.subr.mxu1 %v8009_v14 }
 0x441   :  { %1629 = vmatpush2.msra.mxu1 %v8010_v34 }
 0x442   :  { %1630 = vmatprep.subr.mxu1 %v8011_v42 }
 0x443   :  { %1631 = vmatpush2.msra.mxu1 %v8012_v9 }
 0x444   :  { %1632 = vmatprep.subr.mxu1 %v8013_v51 }
 0x445   :  { %1633 = vmatpush2.msra.mxu1 %v8014_v40 }
 0x446   :  { %1634 = vmatprep.subr.mxu1 %v8015_v33 }
 0x447   :  { %1635 = vmatpush2.msra.mxu1 %v8016_v61 }
 0x448   :  { %1636 = vmatprep.subr.mxu1 %v8017_v20 }
 0x449   :  { %1637 = vmatpush2.msra.mxu1 %v8018_v15 }
 0x4ca   :  { %v1428_v39 = vpop.f32.mrf.mxu1 }
 0x4cb   :  { %v1429_v26 = vadd.f32 %v1428_v39, %v1355_v24 }
 0x4cc   :  { %v1430_v29 = vpop.f32.mrf.mxu1 }
 0x4cd   :  { %v1431_v12 = vadd.f32 %v1430_v29, %v1359_v37  ;;  %v5751_v41 = vmax.f32 %v1429_v26, 0.0 }
 0x4ce   :  { %v1434_v49 = vpop.f32.mrf.mxu1 }
 0x4cf   :  { %v1435_v3 = vadd.f32 %v1434_v49, %v1355_v24  ;;  %v5755_v25 = vmax.f32 %v1431_v12, 0.0  ;;  %v1477_v47 = vmul.f32 %v5751_v41, %v5751_v41 }
 0x4d0   :  { %v1436_v1 = vpop.f32.mrf.mxu1 }
 0x4d1   :  { %v5749_v8 = vmax.f32 %v1435_v3, 0.0  ;;  %v1437_v62 = vadd.f32 %v1436_v1, %v1359_v37  ;;  %v1478_v60 = vmul.f32 %v5755_v25, %v5755_v25 }
 0x4d2   :  { %v1440_v55 = vpop.f32.mrf.mxu1 }
 0x4d3   :  { %v5753_v44 = vmax.f32 %v1437_v62, 0.0  ;;  %v1441_v2 = vadd.f32 %v1440_v55, %v1355_v24  ;;  %v1479_v10 = vmul.f32 %v5749_v8, %v5749_v8  ;;  %v1459_v54 = vadd.f32 %v5749_v8, %v5751_v41 }
 0x4d4   :  { %v1442_v16 = vpop.f32.mrf.mxu1 }
 0x4d5   :  { %v5759_v35 = vmax.f32 %v1441_v2, 0.0  ;;  %v1480_v22 = vmul.f32 %v5753_v44, %v5753_v44  ;;  %v1443_v50 = vadd.f32 %v1442_v16, %v1359_v37  ;;  %v1485_v59 = vadd.f32 %v1479_v10, %v1477_v47 }
 0x4d6   :  { %v1446_v52 = vpop.f32.mrf.mxu1  ;;  %v1468_v4 = vadd.f32 %v5753_v44, %v5755_v25 }
 0x4d7   :  { %v1481_v56 = vmul.f32 %v5759_v35, %v5759_v35  ;;  %v1447_v58 = vadd.f32 %v1446_v52, %v1355_v24  ;;  %v5771_v30 = vmax.f32 %v1443_v50, 0.0  ;;  %v1460_v32 = vadd.f32 %v1459_v54, %v5759_v35 }
 0x4d8   :  { %v1448_v0 = vpop.f32.mrf.mxu1  ;;  %v1494_v14 = vadd.f32 %v1480_v22, %v1478_v60 }
 0x4d9   :  { %v5776_v38 = vmax.f32 %v1447_v58, 0.0  ;;  %v1449_v6 = vadd.f32 %v1448_v0, %v1359_v37  ;;  %v1486_v34 = vadd.f32 %v1485_v59, %v1481_v56  ;;  %v1482_v42 = vmul.f32 %v5771_v30, %v5771_v30 }
 0x4da   :  { %v1469_v9 = vadd.f32 %v1468_v4, %v5771_v30 }
 0x4db   :  { %v1461_v51 = vadd.f32 %v1460_v32, %v5776_v38  ;;  %v1483_v40 = vmul.f32 %v5776_v38, %v5776_v38  ;;  %v1458_v33 = vmax.f32 %v1449_v6, 0.0  ;;  %v1495_v61 = vadd.f32 %v1494_v14, %v1482_v42 }
 0x4dc   :  { %v8019_v32 = vmov 0.0  }
 0x4dd   :  { %v1462_v20 = vrot.slane %v1461_v51, 4  ;;  %v1487_v15 = vadd.f32 %v1486_v34, %v1483_v40  ;;  %v1470_v19 = vadd.f32 %v1469_v9, %v1458_v33  ;;  %v1484_v24 = vmul.f32 %v1458_v33, %v1458_v33 }
 0x4df   :  { %v1463_v39 = vadd.f32 %v1462_v20, %v1461_v51  ;;  %v1488_v37 = vrot.slane %v1487_v15, 4  ;;  %v1471_v29 = vrot.slane %v1470_v19, 4  ;;  %v1496_v26 = vadd.f32 %v1495_v61, %v1484_v24 }
 0x4e1   :  { %v1464_v49 = vrot.slane %v1463_v39, 2  ;;  %v1489_v3 = vadd.f32 %v1488_v37, %v1487_v15  ;;  %v1472_v12 = vadd.f32 %v1471_v29, %v1470_v19  ;;  %v1497_v1 = vrot.slane %v1496_v26, 4 }
 0x4e3   :  { %v1490_v62 = vrot.slane %v1489_v3, 2  ;;  %v1473_v55 = vrot.slane %v1472_v12, 2  ;;  %v1465_v2 = vadd.f32 %v1464_v49, %v1463_v39  ;;  %v1498_v10 = vadd.f32 %v1497_v1, %v1496_v26 }
 0x4e5   :  { %v1491_v16 = vadd.f32 %v1490_v62, %v1489_v3  ;;  %v1474_v47 = vadd.f32 %v1473_v55, %v1472_v12  ;;  %v1499_v22 = vrot.slane %v1498_v10, 2  ;;  %v1466_v50 = vrot.slane %v1465_v2, 1 }
 0x4e7   :  { %v1475_v52 = vrot.slane %v1474_v47, 1  ;;  %v1500_v54 = vadd.f32 %v1499_v22, %v1498_v10  ;;  %v1492_v56 = vrot.slane %v1491_v16, 1  ;;  %v1467_v59 = vadd.f32 %v1466_v50, %v1465_v2 }
 0x4e9   :  { %v1476_v58 = vadd.f32 %v1475_v52, %v1474_v47  ;;  %v1501_v60 = vrot.slane %v1500_v54, 1  ;;  %v1493_v4 = vadd.f32 %v1492_v56, %v1491_v16 }
 0x4eb   :  { %1567 = vmatprep.mubr.f32.mxu0 %v1476_v58  ;;  %v1502_v0 = vadd.f32 %v1501_v60, %v1500_v54 }
 0x4ec   :  { %1568 = vmatmul.mubr.f32.vlgmr.msra.gmra.mxu0 %v1467_v59 }
 0x4ed   :  { %1638 = vmatprep.mubr.f32.mxu1 %v1502_v0  ;;  %1813 = vmatprep.mubr.f32.mxu0 %v8019_v32  ;;  %v1734_v0 = vld [vmem:[%s7627_s8 + $0x8] sm:$0xff] }
 0x4ee   :  { %1639 = vmatmul.mubr.f32.vlgmr.msra.gmra.mxu1 %v1493_v4  ;;  %v1735_v4 = vld [vmem:[%s7627_s8 + $0x10] sm:$0xff] }
 0x4ef   :  { %2195 = vmatprep.mubr.f32.mxu1 %v8019_v32 }
 0x5ac   :  { %v1569_v6 = vpop.f32.mrf.mxu0 }
 0x5ad   :  { %v1645_v14 = vmul.f32 %v1569_v6, %v1569_v6 }
 0x5ae   :  { %v1571_v34 = vpop.f32.mrf.mxu0  ;;  %v1640_v42 = vpop.f32.mrf.mxu1 }
 0x5af   :  { %v1646_v9 = vmul.f32 %v1571_v34, %v1571_v34  ;;  %v1647_v51 = vsub.f32 %v1640_v42, %v1645_v14  ;;  %v1736_v14 = vld [vmem:[%s7627_s8 + $0x18] sm:$0xff]  ;;  %v3721_v42 = vld [vmem:[%s7627_s8 + $0x70] sm:$0xff] }
 0x5b0   :  { %v1642_v40 = vpop.f32.mrf.mxu1 }
 0x5b1   :  { %v1649_v61 = vadd.f32 1e-05, %v1647_v51  ;;  %v1648_v20 = vsub.f32 %v1642_v40, %v1646_v9  ;;  %v3703_v9 = vld [vmem:[%s7627_s8 + $0x20] sm:$0xff]  ;;  %v3722_v51 = vld [vmem:[%s7627_s8 + $0x78] sm:$0xff]  ;;  %v3704_v40 = vld [vmem:[%s7627_s8 + $0x28] sm:$0xff] }
 0x5b3   :  { %v1650_v15 = vadd.f32 1e-05, %v1648_v20  ;;  %3761 = vrsqrt.f32 %v1649_v61  ;;  %v3735_v61 = vld [vmem:[%s7627_s8 + $0xa0] sm:$0xff]  ;;  %v3705_v20 = vld [vmem:[%s7627_s8 + $0x30] sm:$0xff] }
 0x5b5   :  { %3763 = vrsqrt.f32 %v1650_v15  ;;  %v3736_v15 = vld [vmem:[%s7627_s8 + $0xa8] sm:$0xff] }
 0x5c0   :  { %v3762_v19 = vpop.eup %3761 }
 0x5c2   :  { %v3764_v24 = vpop.eup %3763 }
 0x5c3   :  { %v1655_v39 = vcombine.low %v3762_v19, %v3764_v24  ;;  %v3706_v19 = vld [vmem:[%s7627_s8 + $0x38] sm:$0xff]  ;;  %v3737_v24 = vld [vmem:[%s7627_s8 + $0xb0] sm:$0xff] }
 0x5c5   :  { %v1662_v37 = vrot.slane %v1655_v39, %v4788_v13  ;;  %v3711_v39 = vld [vmem:[%s7627_s8 + $0x40] sm:$0xff] }
 0x5c7   :  { %v1669_v29 = vrot.slane %v1662_v37, %v4788_v13  ;;  %v6052_v37 = vld [vmem:[%s7618_s13 + $0x50] sm:$0xff] }
 0x5c8   :  { %8026 = vst [vmem:[#allocation6_spill] sm:$0xff] %v6052_v37 }
 0x5c9   :  { %v1671_v26 = vmul.f32 %v5658_v17, %v1669_v29  ;;  %v6058_v29 = vld [vmem:[%s7618_s13 + $0x48] sm:$0xff] }
 0x5ca   :  { %8027 = vst [vmem:[#allocation7_spill] sm:$0xff] %v6058_v29 }
 0x5cb   :  { %v1676_v49 = vrot.slane %v1671_v26, %v4735_v43  ;;  %v1680_v3 = vrot.slane %v1671_v26, %v4741_v45  ;;  %v6065_v26 = vld [vmem:[%s7618_s13 + $0x40] sm:$0xff] }
 0x5cc   :  { %8028 = vst [vmem:[#allocation8_spill] sm:$0xff] %v6065_v26 }
 0x5cd   :  { %v1683_v12 = vmul.f32 %v1676_v49, %v1569_v6  ;;  %v1684_v1 = vmul.f32 %v1680_v3, %v1571_v34  ;;  %v1711_v16 = vmul.f32 %v1680_v3, %v1458_v33  ;;  %v1710_v22 = vmul.f32 %v1676_v49, %v5776_v38  ;;  %v3720_v6 = vld [vmem:[%s7627_s8 + $0x68] sm:$0xff]  ;;  %v5881_v34 = vld [vmem:[%s7618_s13 + $0xf8] sm:$0xff] }
 0x5ce   :  { %v1709_v54 = vmul.f32 %v1680_v3, %v5771_v30  ;;  %v1708_v56 = vmul.f32 %v1676_v49, %v5759_v35  ;;  %v1707_v33 = vmul.f32 %v1680_v3, %v5753_v44  ;;  %v1706_v58 = vmul.f32 %v1676_v49, %v5749_v8 }
 0x5cf   :  { %v1687_v62 = vcombine.low %v1683_v12, %v1684_v1  ;;  %v1705_v30 = vmul.f32 %v1680_v3, %v5755_v25  ;;  %v1704_v60 = vmul.f32 %v1676_v49, %v5751_v41  ;;  %v1733_v25 = vld [vmem:[%s7627_s8] sm:$0xff]  ;;  %v6075_v3 = vld [vmem:[%s7618_s13 + $0x38] sm:$0xff]  ;;  %v6081_v12 = vld [vmem:[%s7618_s13 + $0x30] sm:$0xff] }
 0x5d0   :  { %v3719_v41 = vld [vmem:[%s7627_s8 + $0x60] sm:$0xff]  ;;  %8029 = vst [vmem:[#allocation9_spill] sm:$0xff] %v6075_v3  ;;  %8030 = vst [vmem:[#allocation10_spill] sm:$0xff] %v6081_v12  ;;  %v6087_v1 = vld [vmem:[%s7618_s13 + $0x28] sm:$0xff] }
 0x5d1   :  { %v1694_v55 = vrot.slane %v1687_v62, %v4788_v13  ;;  %v3743_v49 = vld [vmem:[%s7627_s8 + $0xc0] sm:$0xff]  ;;  %8031 = vst [vmem:[#allocation11_spill] sm:$0xff] %v6087_v1 }
 0x5d2   :  { %v6094_v62 = vld [vmem:[%s7618_s13 + $0x20] sm:$0xff] }
 0x5d3   :  { %v1701_v2 = vrot.slane %v1694_v55, %v4788_v13  ;;  %8032 = vst [vmem:[#allocation12_spill] sm:$0xff] %v6094_v62  ;;  %v3744_v55 = vld [vmem:[%s7627_s8 + $0xc8] sm:$0xff]  ;;  %v6423_v13 = vld [vmem:[%s7618_s13 + $0x110] sm:$0xff] }
 0x5d4   :  { %8080 = vst [vmem:[#allocation70_spill] sm:$0xff] %v6423_v13 }
 0x5d5   :  { %v1703_v10 = vsub.f32 %v5668_v11, %v1701_v2  ;;  %v6104_v2 = vld [vmem:[%s7618_s13 + $0xf0] sm:$0xff] }
 0x5d6   :  { %8033 = vst [vmem:[#allocation13_spill] sm:$0xff] %v6104_v2 }
 0x5d7   :  { %v1720_v47 = vrot.slane %v1703_v10, %v4741_v45  ;;  %v1716_v17 = vrot.slane %v1703_v10, %v4735_v43  ;;  %v6110_v10 = vld [vmem:[%s7618_s13 + $0xe8] sm:$0xff] }
 0x5d8   :  { %8034 = vst [vmem:[#allocation14_spill] sm:$0xff] %v6110_v10 }
 0x5d9   :  { %v5797_v50 = vadd.f32 %v1720_v47, %v1711_v16  ;;  %v5799_v52 = vadd.f32 %v1716_v17, %v1710_v22  ;;  %v5805_v11 = vadd.f32 %v1720_v47, %v1709_v54  ;;  %v5810_v38 = vadd.f32 %v1716_v17, %v1708_v56  ;;  %v6116_v16 = vld [vmem:[%s7618_s13 + $0x18] sm:$0xff]  ;;  %v6128_v22 = vld [vmem:[%s7618_s13 + $0x10] sm:$0xff]  ;;  %v6151_v54 = vld [vmem:[%s7618_s13 + $0xc8] sm:$0xff] }
 0x5da   :  { %v5815_v35 = vadd.f32 %v1720_v47, %v1707_v33  ;;  %v5820_v44 = vadd.f32 %v1716_v17, %v1706_v58  ;;  %v5825_v8 = vadd.f32 %v1720_v47, %v1705_v30  ;;  %v5829_v59 = vadd.f32 %v1716_v17, %v1704_v60  ;;  %8035 = vst [vmem:[#allocation15_spill] sm:$0xff] %v6116_v16  ;;  %v6122_v47 = vld [vmem:[%s7618_s13 + $0xe0] sm:$0xff]  ;;  %v6135_v17 = vld [vmem:[%s7618_s13 + $0xd8] sm:$0xff]  ;;  %v6157_v56 = vld [vmem:[%s7618_s13 + $0x8] sm:$0xff] }
 0x5db   :  { %1773 = vmatprep.subr.mxu0 %v5797_v50  ;;  %2155 = vmatprep.subr.mxu1 %v5797_v50  ;;  %8036 = vst [vmem:[#allocation16_spill] sm:$0xff] %v6122_v47  ;;  %8037 = vst [vmem:[#allocation17_spill] sm:$0xff] %v6128_v22  ;;  %v6169_v33 = vld [vmem:[%s7618_s13] sm:$0xff]  ;;  %v6181_v58 = vld [vmem:[%s7618_s13 + $0xb0] sm:$0xff] }
 0x5dc   :  { %1774 = vmatpush1.msra.mxu0 %v5799_v52  ;;  %2156 = vmatpush1.msra.mxu1 %v5799_v52  ;;  %8038 = vst [vmem:[#allocation18_spill] sm:$0xff] %v6135_v17  ;;  %8040 = vst [vmem:[#allocation20_spill] sm:$0xff] %v6151_v54  ;;  %v6199_v30 = vld [vmem:[%s7618_s13 + $0xa0] sm:$0xff]  ;;  %v6212_v60 = vld [vmem:[%s7618_s13 + $0x98] sm:$0xff] }
 0x5dd   :  { %1775 = vmatprep.subr.mxu0 %v5805_v11  ;;  %2157 = vmatprep.subr.mxu1 %v5805_v11  ;;  %8041 = vst [vmem:[#allocation21_spill] sm:$0xff] %v6157_v56  ;;  %8043 = vst [vmem:[#allocation23_spill] sm:$0xff] %v6169_v33 }
 0x5de   :  { %1776 = vmatpush1.msra.mxu0 %v5810_v38  ;;  %2158 = vmatpush1.msra.mxu1 %v5810_v38  ;;  %8044 = vst [vmem:[#allocation24_spill] sm:$0xff] %v6181_v58  ;;  %8047 = vst [vmem:[#allocation27_spill] sm:$0xff] %v6199_v30 }
 0x5df   :  { %1777 = vmatprep.subr.mxu0 %v5815_v35  ;;  %2159 = vmatprep.subr.mxu1 %v5815_v35  ;;  %8049 = vst [vmem:[#allocation29_spill] sm:$0xff] %v6212_v60 }
 0x5e0   :  { %1778 = vmatpush1.msra.mxu0 %v5820_v44  ;;  %2160 = vmatpush1.msra.mxu1 %v5820_v44 }
 0x5e1   :  { %1779 = vmatprep.subr.mxu0 %v5825_v8  ;;  %2161 = vmatprep.subr.mxu1 %v5825_v8 }
 0x5e2   :  { %1780 = vmatpush1.msra.mxu0 %v5829_v59  ;;  %2162 = vmatpush1.msra.mxu1 %v5829_v59 }
 0x5e3   :  { %3699 = vmatmul.mubr.msk.f32.vlgmr.msra.gmra.mxu0 %vm577_vm0, %v1733_v25  ;;  %1895 = vmatprep.subr.mxu0 %v5797_v50  ;;  %v6230_v25 = vld [vmem:[%s7618_s13 + $0x88] sm:$0xff] }
 0x5e4   :  { %2415 = vmatprep.subr.mxu1 %v5797_v50  ;;  %1896 = vmatpush1.msra.mxu0 %v5799_v52  ;;  %8052 = vst [vmem:[#allocation32_spill] sm:$0xff] %v6230_v25 }
 0x5e5   :  { %3723 = vmatmul.mubr.msk.f32.vlgmr.msra.gmra.mxu1 %vm577_vm0, %v3719_v41  ;;  %1897 = vmatprep.subr.mxu0 %v5805_v11  ;;  %v6236_v41 = vld [vmem:[%s7618_s13 + $0x1e0] sm:$0xff] }
 0x5e6   :  { %2416 = vmatpush1.msra.mxu1 %v5799_v52  ;;  %1819 = vmatprep.mubr.f32.mxu0 %v8019_v32  ;;  %8053 = vst [vmem:[#allocation43_spill] sm:$0xff] %v6236_v41 }
 0x5e7   :  { %2417 = vmatprep.subr.mxu1 %v5805_v11  ;;  %1898 = vmatpush1.msra.mxu0 %v5810_v38 }
 0x5e8   :  { %2418 = vmatpush1.msra.mxu1 %v5810_v38  ;;  %3700 = vmatmul.mubr.msk.f32.gmra.mxu0 %vm577_vm0, %v1734_v0  ;;  %v6242_v0 = vld [vmem:[%s7618_s13 + $0x80] sm:$0xff] }
 0x5e9   :  { %1899 = vmatprep.subr.mxu0 %v5815_v35  ;;  %2419 = vmatprep.subr.mxu1 %v5815_v35  ;;  %8054 = vst [vmem:[#allocation44_spill] sm:$0xff] %v6242_v0 }
 0x5ea   :  { %1900 = vmatpush1.msra.mxu0 %v5820_v44  ;;  %2420 = vmatpush1.msra.mxu1 %v5820_v44 }
 0x5eb   :  { %1901 = vmatprep.subr.mxu0 %v5825_v8  ;;  %2421 = vmatprep.subr.mxu1 %v5825_v8 }
 0x5ec   :  { %1825 = vmatprep.mubr.f32.mxu0 %v8019_v32  ;;  %1902 = vmatpush1.msra.mxu0 %v5829_v59 }
 0x5ed   :  { %2422 = vmatpush1.msra.mxu1 %v5829_v59  ;;  %3701 = vmatmul.mubr.msk.f32.gmra.mxu0 %vm577_vm0, %v1735_v4  ;;  %v6248_v4 = vld [vmem:[%s7618_s13 + $0x1d8] sm:$0xff] }
 0x5ee   :  { %2025 = vmatprep.subr.mxu0 %v5797_v50  ;;  %1831 = vmatprep.mubr.f32.mxu0 %v8019_v32  ;;  %8055 = vst [vmem:[#allocation45_spill] sm:$0xff] %v6248_v4 }
 0x5ef   :  { %2201 = vmatprep.mubr.f32.mxu1 %v8019_v32  ;;  %2706 = vmatprep.subr.mxu1 %v5881_v34 }
 0x5f0   :  { %3724 = vmatmul.mubr.msk.f32.gmra.mxu1 %vm577_vm0, %v3720_v6  ;;  %v6255_v6 = vld [vmem:[%s7618_s13 + $0x1d0] sm:$0xff] }
 0x5f1   :  { %3702 = vmatmul.mubr.msk.f32.gmra.mxu0 %vm577_vm0, %v1736_v14  ;;  %2207 = vmatprep.mubr.f32.mxu1 %v8019_v32  ;;  %8056 = vst [vmem:[#allocation46_spill] sm:$0xff] %v6255_v6  ;;  %v6262_v14 = vld [vmem:[%s7618_s13 + $0x1c8] sm:$0xff] }
 0x5f2   :  { %1935 = vmatprep.mubr.f32.mxu0 %v8019_v32  ;;  %8057 = vst [vmem:[#allocation47_spill] sm:$0xff] %v6262_v14 }
 0x5f4   :  { %3725 = vmatmul.mubr.msk.f32.gmra.mxu1 %vm577_vm0, %v3721_v42  ;;  %v6269_v42 = vld [vmem:[%s7618_s13 + $0x1c0] sm:$0xff] }
 0x5f5   :  { %3707 = vmatmul.mubr.msk.f32.vlgmr.msra.gmra.mxu0 %vm577_vm0, %v3703_v9  ;;  %2213 = vmatprep.mubr.f32.mxu1 %v8019_v32  ;;  %8058 = vst [vmem:[#allocation48_spill] sm:$0xff] %v6269_v42  ;;  %v6276_v9 = vld [vmem:[%s7618_s13 + $0x1b8] sm:$0xff] }
 0x5f6   :  { %2026 = vmatpush1.msra.mxu0 %v5799_v52  ;;  %1941 = vmatprep.mubr.f32.mxu0 %v8019_v32  ;;  %8059 = vst [vmem:[#allocation49_spill] sm:$0xff] %v6276_v9 }
 0x5f7   :  { %2027 = vmatprep.subr.mxu0 %v5805_v11 }
 0x5f8   :  { %2028 = vmatpush1.msra.mxu0 %v5810_v38  ;;  %3726 = vmatmul.mubr.msk.f32.gmra.mxu1 %vm577_vm0, %v3722_v51  ;;  %v6283_v51 = vld [vmem:[%s7618_s13 + $0x1b0] sm:$0xff] }
 0x5f9   :  { %2029 = vmatprep.subr.mxu0 %v5815_v35  ;;  %3708 = vmatmul.mubr.msk.f32.gmra.mxu0 %vm577_vm0, %v3704_v40  ;;  %8060 = vst [vmem:[#allocation50_spill] sm:$0xff] %v6283_v51  ;;  %v6290_v40 = vld [vmem:[%s7618_s13 + $0x1a8] sm:$0xff] }
 0x5fa   :  { %2030 = vmatpush1.msra.mxu0 %v5820_v44  ;;  %1947 = vmatprep.mubr.f32.mxu0 %v8019_v32  ;;  %8061 = vst [vmem:[#allocation51_spill] sm:$0xff] %v6290_v40 }
 0x5fb   :  { %2031 = vmatprep.subr.mxu0 %v5825_v8  ;;  %2455 = vmatprep.mubr.f32.mxu1 %v8019_v32 }
 0x5fc   :  { %2032 = vmatpush1.msra.mxu0 %v5829_v59  ;;  %3739 = vmatmul.mubr.msk.f32.vlgmr.msra.gmra.mxu1 %vm577_vm0, %v3735_v61  ;;  %v6297_v61 = vld [vmem:[%s7618_s13 + $0x1a0] sm:$0xff] }
 0x5fd   :  { %2285 = vmatprep.subr.mxu0 %v5797_v50  ;;  %3709 = vmatmul.mubr.msk.f32.gmra.mxu0 %vm577_vm0, %v3705_v20  ;;  %8062 = vst [vmem:[#allocation52_spill] sm:$0xff] %v6297_v61  ;;  %v6304_v20 = vld [vmem:[%s7618_s13 + $0x198] sm:$0xff] }
 0x5fe   :  { %1953 = vmatprep.mubr.f32.mxu0 %v8019_v32  ;;  %2461 = vmatprep.mubr.f32.mxu1 %v8019_v32  ;;  %8063 = vst [vmem:[#allocation53_spill] sm:$0xff] %v6304_v20 }
 0x5ff   :  { %2707 = vmatpush1.msra.mxu1 %v5106_v21  ;;  %v3738_v21 = vld [vmem:[%s7627_s8 + $0xb8] sm:$0xff] }
 0x600   :  { %3740 = vmatmul.mubr.msk.f32.gmra.mxu1 %vm577_vm0, %v3736_v15  ;;  %2708 = vmatprep.subr.mxu1 %v5115_v18  ;;  %v3712_v18 = vld [vmem:[%s7627_s8 + $0x48] sm:$0xff]  ;;  %v6311_v15 = vld [vmem:[%s7618_s13 + $0x190] sm:$0xff] }
 0x601   :  { %3710 = vmatmul.mubr.msk.f32.gmra.mxu0 %vm577_vm0, %v3706_v19  ;;  %2467 = vmatprep.mubr.f32.mxu1 %v8019_v32  ;;  %8064 = vst [vmem:[#allocation54_spill] sm:$0xff] %v6311_v15  ;;  %v6318_v19 = vld [vmem:[%s7618_s13 + $0x188] sm:$0xff] }
 0x602   :  { %2065 = vmatprep.mubr.f32.mxu0 %v8019_v32  ;;  %2709 = vmatpush1.msra.mxu1 %v5124_v57  ;;  %v3713_v57 = vld [vmem:[%s7627_s8 + $0x50] sm:$0xff]  ;;  %8065 = vst [vmem:[#allocation55_spill] sm:$0xff] %v6318_v19 }
 0x603   :  { %2710 = vmatprep.subr.mxu1 %v5133_v7  ;;  %v3714_v7 = vld [vmem:[%s7627_s8 + $0x58] sm:$0xff] }
 0x604   :  { %3741 = vmatmul.mubr.msk.f32.gmra.mxu1 %vm577_vm0, %v3737_v24  ;;  %v6325_v24 = vld [vmem:[%s7618_s13 + $0x180] sm:$0xff] }
 0x605   :  { %3715 = vmatmul.mubr.msk.f32.vlgmr.msra.gmra.mxu0 %vm577_vm0, %v3711_v39  ;;  %2473 = vmatprep.mubr.f32.mxu1 %v8019_v32  ;;  %8066 = vst [vmem:[#allocation56_spill] sm:$0xff] %v6325_v24  ;;  %v6332_v39 = vld [vmem:[%s7618_s13 + $0x178] sm:$0xff] }
 0x606   :  { %2286 = vmatpush1.msra.mxu0 %v5799_v52  ;;  %2071 = vmatprep.mubr.f32.mxu0 %v8019_v32  ;;  %8067 = vst [vmem:[#allocation57_spill] sm:$0xff] %v6332_v39 }
 0x607   :  { %2287 = vmatprep.subr.mxu0 %v5805_v11  ;;  %2711 = vmatpush1.msra.mxu1 %v5142_v31  ;;  %v5981_v31 = vld [vmem:[%s7618_s13 + $0xb8] sm:$0xff] }
 0x608   :  { %2288 = vmatpush1.msra.mxu0 %v5810_v38  ;;  %3742 = vmatmul.mubr.msk.f32.gmra.mxu1 %vm577_vm0, %v3738_v21  ;;  %8020 = vst [vmem:[#allocation33_spill] sm:$0xff] %v5981_v31  ;;  %v6339_v21 = vld [vmem:[%s7618_s13 + $0x170] sm:$0xff] }
 0x609   :  { %2289 = vmatprep.subr.mxu0 %v5815_v35  ;;  %3716 = vmatmul.mubr.msk.f32.gmra.mxu0 %vm577_vm0, %v3712_v18  ;;  %8068 = vst [vmem:[#allocation58_spill] sm:$0xff] %v6339_v21  ;;  %v6346_v18 = vld [vmem:[%s7618_s13 + $0x168] sm:$0xff] }
 0x60a   :  { %2290 = vmatpush1.msra.mxu0 %v5820_v44  ;;  %2077 = vmatprep.mubr.f32.mxu0 %v8019_v32  ;;  %8069 = vst [vmem:[#allocation59_spill] sm:$0xff] %v6346_v18 }
 0x60b   :  { %2291 = vmatprep.subr.mxu0 %v5825_v8  ;;  %2712 = vmatprep.subr.mxu1 %v5151_v5  ;;  %v3727_v5 = vld [vmem:[%s7627_s8 + $0x80] sm:$0xff] }
 0x60c   :  { %2292 = vmatpush1.msra.mxu0 %v5829_v59  ;;  %2713 = vmatpush1.msra.mxu1 %v5160_v27  ;;  %v3728_v27 = vld [vmem:[%s7627_s8 + $0x88] sm:$0xff] }
 0x60d   :  { %2545 = vmatprep.subr.mxu0 %v5797_v50  ;;  %3717 = vmatmul.mubr.msk.f32.gmra.mxu0 %vm577_vm0, %v3713_v57  ;;  %v3745_v50 = vld [vmem:[%s7627_s8 + $0xd0] sm:$0xff]  ;;  %v6353_v57 = vld [vmem:[%s7618_s13 + $0x160] sm:$0xff] }
 0x60e   :  { %2083 = vmatprep.mubr.f32.mxu0 %v8019_v32  ;;  %2714 = vmatprep.subr.mxu1 %v5981_v31  ;;  %8070 = vst [vmem:[#allocation60_spill] sm:$0xff] %v6353_v57 }
 0x60f   :  { %2715 = vmatpush1.msra.mxu1 %v5178_v53  ;;  %v6006_v53 = vld [vmem:[%s7618_s13 + $0x78] sm:$0xff] }
 0x610   :  { %2716 = vmatprep.subr.mxu1 %v5187_v23  ;;  %8021 = vst [vmem:[#allocation34_spill] sm:$0xff] %v6006_v53  ;;  %v6013_v23 = vld [vmem:[%s7618_s13 + $0x70] sm:$0xff] }
 0x611   :  { %3718 = vmatmul.mubr.msk.f32.gmra.mxu0 %vm577_vm0, %v3714_v7  ;;  %2717 = vmatpush1.msra.mxu1 %v5193_v63  ;;  %8022 = vst [vmem:[#allocation35_spill] sm:$0xff] %v6013_v23  ;;  %v3729_v63 = vld [vmem:[%s7627_s8 + $0x90] sm:$0xff]  ;;  %v6360_v7 = vld [vmem:[%s7618_s13 + $0x158] sm:$0xff] }
 0x612   :  { %2325 = vmatprep.mubr.f32.mxu0 %v8019_v32  ;;  %2718 = vmatprep.subr.mxu1 %v5199_v28  ;;  %v6027_v28 = vld [vmem:[%s7618_s13 + $0x68] sm:$0xff]  ;;  %8071 = vst [vmem:[#allocation61_spill] sm:$0xff] %v6360_v7 }
 0x613   :  { %2719 = vmatpush1.msra.mxu1 %v5205_v46  ;;  %8023 = vst [vmem:[#allocation36_spill] sm:$0xff] %v6027_v28  ;;  %v6034_v46 = vld [vmem:[%s7618_s13 + $0x60] sm:$0xff] }
 0x614   :  { %2720 = vmatprep.subr.mxu1 %v5211_v48  ;;  %8024 = vst [vmem:[#allocation37_spill] sm:$0xff] %v6034_v46  ;;  %v3730_v48 = vld [vmem:[%s7627_s8 + $0x98] sm:$0xff] }
 0x615   :  { %3731 = vmatmul.mubr.msk.f32.vlgmr.msra.gmra.mxu0 %vm577_vm0, %v3727_v5  ;;  %2721 = vmatpush1.msra.mxu1 %v5217_v36  ;;  %v6046_v36 = vld [vmem:[%s7618_s13 + $0x58] sm:$0xff]  ;;  %v6367_v5 = vld [vmem:[%s7618_s13 + $0x150] sm:$0xff] }
 0x616   :  { %2546 = vmatpush1.msra.mxu0 %v5799_v52  ;;  %2331 = vmatprep.mubr.f32.mxu0 %v8019_v32  ;;  %8025 = vst [vmem:[#allocation38_spill] sm:$0xff] %v6046_v36  ;;  %v6145_v52 = vld [vmem:[%s7618_s13 + $0xd0] sm:$0xff]  ;;  %8072 = vst [vmem:[#allocation62_spill] sm:$0xff] %v6367_v5 }
 0x617   :  { %2547 = vmatprep.subr.mxu0 %v5805_v11  ;;  %2722 = vmatprep.subr.mxu1 %v6006_v53  ;;  %8039 = vst [vmem:[#allocation19_spill] sm:$0xff] %v6145_v52  ;;  %v6163_v11 = vld [vmem:[%s7618_s13 + $0xc0] sm:$0xff] }
 0x618   :  { %2548 = vmatpush1.msra.mxu0 %v5810_v38  ;;  %2723 = vmatpush1.msra.mxu1 %v6013_v23  ;;  %8042 = vst [vmem:[#allocation22_spill] sm:$0xff] %v6163_v11  ;;  %v3746_v38 = vld [vmem:[%s7627_s8 + $0xd8] sm:$0xff] }
 0x619   :  { %2549 = vmatprep.subr.mxu0 %v5815_v35  ;;  %3732 = vmatmul.mubr.msk.f32.gmra.mxu0 %vm577_vm0, %v3728_v27  ;;  %v6187_v35 = vld [vmem:[%s7618_s13 + $0xa8] sm:$0xff] }
 0x61a   :  { %2550 = vmatpush1.msra.mxu0 %v5820_v44  ;;  %2337 = vmatprep.mubr.f32.mxu0 %v8019_v32  ;;  %8045 = vst [vmem:[#allocation25_spill] sm:$0xff] %v6187_v35  ;;  %v6205_v44 = vld [vmem:[%s7618_s13 + $0x1f0] sm:$0xff]  ;;  %v6374_v27 = vld [vmem:[%s7618_s13 + $0x148] sm:$0xff] }
 0x61b   :  { %2551 = vmatprep.subr.mxu0 %v5825_v8  ;;  %2724 = vmatprep.subr.mxu1 %v6027_v28  ;;  %8048 = vst [vmem:[#allocation28_spill] sm:$0xff] %v6205_v44  ;;  %v6218_v8 = vld [vmem:[%s7618_s13 + $0x90] sm:$0xff]  ;;  %8073 = vst [vmem:[#allocation63_spill] sm:$0xff] %v6374_v27 }
 0x61c   :  { %2552 = vmatpush1.msra.mxu0 %v5829_v59  ;;  %2725 = vmatpush1.msra.mxu1 %v6034_v46  ;;  %8050 = vst [vmem:[#allocation30_spill] sm:$0xff] %v6218_v8  ;;  %v6224_v59 = vld [vmem:[%s7618_s13 + $0x1e8] sm:$0xff] }
 0x61d   :  { %3733 = vmatmul.mubr.msk.f32.gmra.mxu0 %vm577_vm0, %v3729_v63  ;;  %2777 = vmatprep.subr.mxu0 %v5881_v34  ;;  %8051 = vst [vmem:[#allocation31_spill] sm:$0xff] %v6224_v59  ;;  %v6381_v63 = vld [vmem:[%s7618_s13 + $0x140] sm:$0xff] }
 0x61e   :  { %2343 = vmatprep.mubr.f32.mxu0 %v8019_v32  ;;  %2726 = vmatprep.subr.mxu1 %v6046_v36  ;;  %8074 = vst [vmem:[#allocation64_spill] sm:$0xff] %v6381_v63 }
 0x61f   :  { %2727 = vmatpush1.msra.mxu1 %v6052_v37 }
 0x620   :  { %2728 = vmatprep.subr.mxu1 %v6058_v29 }
 0x621   :  { %3734 = vmatmul.mubr.msk.f32.gmra.mxu0 %vm577_vm0, %v3730_v48  ;;  %2729 = vmatpush1.msra.mxu1 %v6065_v26  ;;  %v6388_v48 = vld [vmem:[%s7618_s13 + $0x138] sm:$0xff] }
 0x622   :  { %2585 = vmatprep.mubr.f32.mxu0 %v8019_v32  ;;  %2730 = vmatprep.subr.mxu1 %v6075_v3  ;;  %8075 = vst [vmem:[#allocation65_spill] sm:$0xff] %v6388_v48 }
 0x623   :  { %2731 = vmatpush1.msra.mxu1 %v6081_v12 }
 0x624   :  { %2732 = vmatprep.subr.mxu1 %v6087_v1 }
 0x625   :  { %3747 = vmatmul.mubr.msk.f32.vlgmr.msra.gmra.mxu0 %vm577_vm0, %v3743_v49  ;;  %2733 = vmatpush1.msra.mxu1 %v6094_v62  ;;  %v6395_v49 = vld [vmem:[%s7618_s13 + $0x130] sm:$0xff] }
 0x626   :  { %2591 = vmatprep.mubr.f32.mxu0 %v8019_v32  ;;  %2778 = vmatpush1.msra.mxu0 %v6104_v2  ;;  %8076 = vst [vmem:[#allocation66_spill] sm:$0xff] %v6395_v49 }
 0x627   :  { %2779 = vmatprep.subr.mxu0 %v6110_v10  ;;  %2734 = vmatprep.subr.mxu1 %v6116_v16 }
 0x628   :  { %2780 = vmatpush1.msra.mxu0 %v6122_v47  ;;  %2735 = vmatpush1.msra.mxu1 %v6128_v22 }
 0x629   :  { %3748 = vmatmul.mubr.msk.f32.gmra.mxu0 %vm577_vm0, %v3744_v55  ;;  %2781 = vmatprep.subr.mxu0 %v6135_v17  ;;  %v6402_v55 = vld [vmem:[%s7618_s13 + $0x128] sm:$0xff] }
 0x62a   :  { %2597 = vmatprep.mubr.f32.mxu0 %v8019_v32  ;;  %2782 = vmatpush1.msra.mxu0 %v6145_v52  ;;  %8077 = vst [vmem:[#allocation67_spill] sm:$0xff] %v6402_v55 }
 0x62b   :  { %2783 = vmatprep.subr.mxu0 %v6151_v54  ;;  %2736 = vmatprep.subr.mxu1 %v6157_v56 }
 0x62c   :  { %2784 = vmatpush1.msra.mxu0 %v6163_v11  ;;  %2737 = vmatpush1.msra.mxu1 %v6169_v33 }
 0x62d   :  { %3749 = vmatmul.mubr.msk.f32.gmra.mxu0 %vm577_vm0, %v3745_v50  ;;  %2785 = vmatprep.subr.mxu0 %v5981_v31  ;;  %v6409_v50 = vld [vmem:[%s7618_s13 + $0x120] sm:$0xff]  ;;  %v8090_v31 = vld [vmem:[#allocation5_spill] sm:$0xff] }
 0x62e   :  { %2603 = vmatprep.mubr.f32.mxu0 %v8019_v32  ;;  %2786 = vmatpush1.msra.mxu0 %v6181_v58  ;;  %v6193_v32 = vld [vmem:[%s7618_s13 + $0x1f8] sm:$0xff]  ;;  %8078 = vst [vmem:[#allocation68_spill] sm:$0xff] %v6409_v50 }
 0x62f   :  { %2787 = vmatprep.subr.mxu0 %v6187_v35  ;;  %8046 = vst [vmem:[#allocation26_spill] sm:$0xff] %v6193_v32  ;;  %2738 = vmatprep.subr.mxu1 %v6193_v32 }
 0x630   :  { %2788 = vmatpush1.msra.mxu0 %v6199_v30  ;;  %2739 = vmatpush2.msra.mxu1 %v6205_v44 }
 0x631   :  { %3750 = vmatmul.mubr.msk.f32.gmra.mxu0 %vm577_vm0, %v3746_v38  ;;  %2789 = vmatprep.subr.mxu0 %v6212_v60  ;;  %v6416_v38 = vld [vmem:[%s7618_s13 + $0x118] sm:$0xff] }
 0x632   :  { %2790 = vmatpush1.msra.mxu0 %v6218_v8  ;;  %2740 = vmatprep.subr.mxu1 %v6224_v59  ;;  %8079 = vst [vmem:[#allocation69_spill] sm:$0xff] %v6416_v38 }
 0x633   :  { %2791 = vmatprep.subr.mxu0 %v6230_v25  ;;  %2741 = vmatpush2.msra.mxu1 %v6236_v41  ;;  %v8088_v25 = vld [vmem:[#allocation4_spill] sm:$0xff] }
 0x634   :  { %2792 = vmatpush1.msra.mxu0 %v6242_v0  ;;  %2742 = vmatprep.subr.mxu1 %v6248_v4 }
 0x635   :  { %2793 = vmatprep.subr.mxu0 %v6006_v53  ;;  %2743 = vmatpush2.msra.mxu1 %v6255_v6 }
 0x636   :  { %2794 = vmatpush1.msra.mxu0 %v6013_v23  ;;  %2744 = vmatprep.subr.mxu1 %v6262_v14 }
 0x637   :  { %2795 = vmatprep.subr.mxu0 %v6027_v28  ;;  %2745 = vmatpush2.msra.mxu1 %v6269_v42  ;;  %v8087_v28 = vld [vmem:[#allocation2_spill] sm:$0xff] }
 0x638   :  { %2796 = vmatpush1.msra.mxu0 %v6034_v46  ;;  %2746 = vmatprep.subr.mxu1 %v6276_v9 }
 0x639   :  { %2797 = vmatprep.subr.mxu0 %v6046_v36  ;;  %2747 = vmatpush2.msra.mxu1 %v6283_v51 }
 0x63a   :  { %2798 = vmatpush1.msra.mxu0 %v6052_v37  ;;  %2748 = vmatprep.subr.mxu1 %v6290_v40 }
 0x63b   :  { %2799 = vmatprep.subr.mxu0 %v6058_v29  ;;  %2749 = vmatpush2.msra.mxu1 %v6297_v61 }
 0x63c   :  { %2800 = vmatpush1.msra.mxu0 %v6065_v26  ;;  %2750 = vmatprep.subr.mxu1 %v6304_v20 }
 0x63d   :  { %2801 = vmatprep.subr.mxu0 %v6075_v3  ;;  %2751 = vmatpush2.msra.mxu1 %v6311_v15 }
 0x63e   :  { %2802 = vmatpush1.msra.mxu0 %v6081_v12  ;;  %2752 = vmatprep.subr.mxu1 %v6318_v19 }
 0x63f   :  { %2803 = vmatprep.subr.mxu0 %v6087_v1  ;;  %2753 = vmatpush2.msra.mxu1 %v6325_v24 }
 0x640   :  { %2804 = vmatpush1.msra.mxu0 %v6094_v62  ;;  %2754 = vmatprep.subr.mxu1 %v6332_v39 }
 0x641   :  { %2805 = vmatprep.subr.mxu0 %v6116_v16  ;;  %2755 = vmatpush2.msra.mxu1 %v6339_v21  ;;  %v1732_v16 = vld [vmem:[%s7629_s9 + $0x8] sm:$0x7f] }
 0x642   :  { %2806 = vmatpush1.msra.mxu0 %v6128_v22  ;;  %2756 = vmatprep.subr.mxu1 %v6346_v18  ;;  %v1845_v26 = vrot.slane %v1732_v16, %v4735_v43  ;;  %v6513_v46 = vrot.slane %v1732_v16, %v4741_v45  ;;  %v6519_v53 = vrot.slane %v1732_v16, %v8087_v28 }
 0x643   :  { %2807 = vmatprep.subr.mxu0 %v6157_v56  ;;  %2757 = vmatpush2.msra.mxu1 %v6353_v57  ;;  %v8084_v56 = vld [vmem:[#allocation39_spill] sm:$0xff]  ;;  %v6525_v60 = vrot.slane %v1732_v16, %v8088_v25  ;;  %v6540_v17 = vrot.slane %v1732_v16, %v8090_v31 }
 0x644   :  { %2808 = vmatpush1.msra.mxu0 %v6169_v33  ;;  %2758 = vmatprep.subr.mxu1 %v6360_v7  ;;  %v1731_v33 = vld [vmem:[%s7629_s9] sm:$0x7f]  ;;  %v2222_v22 = vsub.s32 3, %v8084_v56 }
 0x645   :  { %2809 = vmatprep.subr.mxu0 %v6193_v32  ;;  %2759 = vmatpush2.msra.mxu1 %v6367_v5  ;;  %v1841_v12 = vrot.slane %v1731_v33, %v4735_v43  ;;  %v6507_v29 = vrot.slane %v1731_v33, %v4741_v45  ;;  %v2634_v56 = vld [vmem:[%s7630_s10] sm:$0x3]  ;;  %v6516_v23 = vrot.slane %v1731_v33, %v8087_v28 }
 0x646   :  { %2810 = vmatpush2.msra.mxu0 %v6205_v44  ;;  %2760 = vmatprep.subr.mxu1 %v6374_v27  ;;  %v2223_v37 = vrot.slane %v1731_v33, %v2222_v22  ;;  %v2227_v36 = vrot.slane %v1732_v16, %v2222_v22  ;;  %v6522_v8 = vrot.slane %v1731_v33, %v8088_v25  ;;  %v8089_v22 = vld [vmem:[#allocation3_spill] sm:$0xff] }
 0x647   :  { %2811 = vmatprep.subr.mxu0 %v6224_v59  ;;  %2761 = vmatpush2.msra.mxu1 %v6381_v63  ;;  %v6528_v30 = vrot.slane %v1731_v33, %v8089_v22  ;;  %v6531_v35 = vrot.slane %v1732_v16, %v8089_v22  ;;  %v6534_v11 = vrot.slane %v1731_v33, %v8090_v31 }
 0x648   :  { %2812 = vmatpush2.msra.mxu0 %v6236_v41  ;;  %2762 = vmatprep.subr.mxu1 %v6388_v48  ;;  %v6537_v52 = vrot.slane %v2634_v56, %v4735_v43  ;;  %v6543_v25 = vrot.slane %v2634_v56, %v4741_v45 }
 0x649   :  { %2813 = vmatprep.subr.mxu0 %v6248_v4  ;;  %2763 = vmatpush2.msra.mxu1 %v6395_v49  ;;  %8091 = vst [vmem:[#allocation2_spill] sm:$0xff] %v6534_v11 }
 0x64a   :  { %2814 = vmatpush2.msra.mxu0 %v6255_v6  ;;  %2764 = vmatprep.subr.mxu1 %v6402_v55  ;;  %8092 = vst [vmem:[#allocation4_spill] sm:$0xff] %v6537_v52 }
 0x64b   :  { %2815 = vmatprep.subr.mxu0 %v6262_v14  ;;  %2765 = vmatpush2.msra.mxu1 %v6409_v50 }
 0x64c   :  { %2816 = vmatpush2.msra.mxu0 %v6269_v42  ;;  %2766 = vmatprep.subr.mxu1 %v6416_v38  ;;  %v6430_v42 = vld [vmem:[%s7618_s13 + $0x108] sm:$0xff] }
 0x64d   :  { %2817 = vmatprep.subr.mxu0 %v6276_v9  ;;  %2767 = vmatpush2.msra.mxu1 %v6423_v13  ;;  %8081 = vst [vmem:[#allocation71_spill] sm:$0xff] %v6430_v42  ;;  %v6437_v9 = vld [vmem:[%s7618_s13 + $0x100] sm:$0xff] }
 0x64e   :  { %2818 = vmatpush2.msra.mxu0 %v6283_v51  ;;  %2768 = vmatprep.subr.mxu1 %v6430_v42  ;;  %8082 = vst [vmem:[#allocation72_spill] sm:$0xff] %v6437_v9 }
 0x64f   :  { %2819 = vmatprep.subr.mxu0 %v6290_v40  ;;  %2769 = vmatpush2.msra.mxu1 %v6437_v9 }
 0x650   :  { %2820 = vmatpush2.msra.mxu0 %v6297_v61 }
 0x651   :  { %2821 = vmatprep.subr.mxu0 %v6304_v20 }
 0x652   :  { %2822 = vmatpush2.msra.mxu0 %v6311_v15 }
 0x653   :  { %2823 = vmatprep.subr.mxu0 %v6318_v19 }
 0x654   :  { %2824 = vmatpush2.msra.mxu0 %v6325_v24 }
 0x655   :  { %2825 = vmatprep.subr.mxu0 %v6332_v39 }
 0x656   :  { %2826 = vmatpush2.msra.mxu0 %v6339_v21 }
 0x657   :  { %2827 = vmatprep.subr.mxu0 %v6346_v18 }
 0x658   :  { %2828 = vmatpush2.msra.mxu0 %v6353_v57 }
 0x659   :  { %2829 = vmatprep.subr.mxu0 %v6360_v7 }
 0x65a   :  { %2830 = vmatpush2.msra.mxu0 %v6367_v5 }
 0x65b   :  { %2831 = vmatprep.subr.mxu0 %v6374_v27 }
 0x65c   :  { %2832 = vmatpush2.msra.mxu0 %v6381_v63 }
 0x65d   :  { %2833 = vmatprep.subr.mxu0 %v6388_v48  ;;  %v2965_v48 = vld [vmem:[%s7628_s11 + $0xf8] sm:$0xff] }
 0x65e   :  { %2834 = vmatpush2.msra.mxu0 %v6395_v49  ;;  %3010 = vmatprep.subr.mxu1 %v2965_v48 }
 0x65f   :  { %2835 = vmatprep.subr.mxu0 %v6402_v55 }
 0x660   :  { %2836 = vmatpush2.msra.mxu0 %v6409_v50 }
 0x661   :  { %2837 = vmatprep.subr.mxu0 %v6416_v38 }
 0x662   :  { %2838 = vmatpush2.msra.mxu0 %v6423_v13 }
 0x663   :  { %2839 = vmatprep.subr.mxu0 %v6430_v42 }
 0x664   :  { %2840 = vmatpush2.msra.mxu0 %v6437_v9 }
 0x665   :  { %3151 = vmatprep.subr.mxu0 %v5881_v34 }
 0x6a3   :  { %v1815_v49 = vpop.f32.mrf.mxu0 }
 0x6a4   :  { %v1846_v54 = vmul.f32 %v1841_v12, %v1815_v49 }
 0x6a5   :  { %v1817_v63 = vpop.f32.mrf.mxu0  ;;  %v2197_v5 = vpop.f32.mrf.mxu1 }
 0x6a6   :  { %v1847_v47 = vmul.f32 %v1845_v26, %v1817_v63  ;;  %v2228_v22 = vmul.f32 %v2223_v37, %v2197_v5 }
 0x6a7   :  { %v2199_v13 = vpop.f32.mrf.mxu1 }
 0x6a8   :  { %v1821_v55 = vpop.f32.mrf.mxu0  ;;  %v2229_v2 = vmul.f32 %v2227_v36, %v2199_v13 }
 0x6aa   :  { %v1823_v27 = vpop.f32.mrf.mxu0 }
 0x6ad   :  { %v1827_v50 = vpop.f32.mrf.mxu0 }
 0x6ae   :  { %v1850_v33 = vmul.f32 %v1841_v12, %v1827_v50 }
 0x6af   :  { %v1829_v38 = vpop.f32.mrf.mxu0 }
 0x6b0   :  { %v2203_v57 = vpop.f32.mrf.mxu1  ;;  %v1851_v11 = vmul.f32 %v1845_v26, %v1829_v38 }
 0x6b1   :  { %v6465_v7 = vpop.f32.mrf.mxu0  ;;  %v2230_v16 = vmul.f32 %v2223_v37, %v2203_v57 }
 0x6b2   :  { %v6469_v21 = vpop.f32.mrf.mxu1  ;;  %v1852_v56 = vmul.f32 %v1841_v12, %v6465_v7 }
 0x6b3   :  { %v6467_v42 = vpop.f32.mrf.mxu0  ;;  %v2231_v13 = vmul.f32 %v2227_v36, %v6469_v21 }
 0x6b4   :  { %v6473_v24 = vpop.f32.mrf.mxu1  ;;  %v1853_v63 = vmul.f32 %v1845_v26, %v6467_v42 }
 0x6b5   :  { %v1937_v9 = vpop.f32.mrf.mxu0 }
 0x6b6   :  { %v6479_v20 = vpop.f32.mrf.mxu1  ;;  %v1968_v10 = vmul.f32 %v6507_v29, %v1937_v9 }
 0x6b7   :  { %v1939_v34 = vpop.f32.mrf.mxu0 }
 0x6b8   :  { %v6483_v51 = vpop.f32.mrf.mxu1 }
 0x6b9   :  { %v1943_v18 = vpop.f32.mrf.mxu0 }
 0x6ba   :  { %v6485_v4 = vpop.f32.mrf.mxu1  ;;  %v1970_v43 = vmul.f32 %v6507_v29, %v1943_v18  ;;  %v2232_v18 = vmul.f32 %v2223_v37, %v6473_v24 }
 0x6bb   :  { %v1945_v39 = vpop.f32.mrf.mxu0 }
 0x6bc   :  { %v6489_v44 = vpop.f32.mrf.mxu1  ;;  %v1971_v9 = vmul.f32 %v6513_v46, %v1945_v39 }
 0x6bd   :  { %v6471_v48 = vpop.f32.mrf.mxu0 }
 0x6be   :  { %v2459_v1 = vpop.f32.mrf.mxu1 }
 0x6bf   :  { %v6475_v19 = vpop.f32.mrf.mxu0 }
 0x6c0   :  { %v2463_v58 = vpop.f32.mrf.mxu1  ;;  %v1973_v24 = vmul.f32 %v6513_v46, %v6475_v19 }
 0x6c1   :  { %v6477_v15 = vpop.f32.mrf.mxu0 }
 0x6c2   :  { %v2465_v52 = vpop.f32.mrf.mxu1 }
 0x6c3   :  { %v6481_v61 = vpop.f32.mrf.mxu0 }
 0x6c4   :  { %8083 = vst [vmem:[#allocation73_spill] sm:$0xff] %v6481_v61  ;;  %v1969_v61 = vmul.f32 %v6513_v46, %v1939_v34 }
 0x6c5   :  { %v2067_v40 = vpop.f32.mrf.mxu0 }
 0x6c6   :  { %v2098_v31 = vmul.f32 %v6516_v23, %v2067_v40  ;;  %v1972_v40 = vmul.f32 %v6507_v29, %v6471_v48  ;;  %v1977_v39 = vadd.f32 %v1969_v61, %v1847_v47 }
 0x6c7   :  { %v2069_v14 = vpop.f32.mrf.mxu0 }
 0x6c9   :  { %v2073_v6 = vpop.f32.mrf.mxu0 }
 0x6ca   :  { %v2100_v50 = vmul.f32 %v6516_v23, %v2073_v6  ;;  %v2469_v6 = vpop.f32.mrf.mxu1 }
 0x6cb   :  { %v2075_v41 = vpop.f32.mrf.mxu0  ;;  %v8093_v48 = vld [vmem:[#allocation73_spill] sm:$0xff] }
 0x6cc   :  { %v2101_v57 = vmul.f32 %v6519_v53, %v2075_v41  ;;  %v2488_v41 = vmul.f32 %v6528_v30, %v6489_v44  ;;  %v1974_v44 = vmul.f32 %v6507_v29, %v6477_v15  ;;  %v2471_v34 = vpop.f32.mrf.mxu1 }
 0x6cd   :  { %v6487_v59 = vpop.f32.mrf.mxu0 }
 0x6cf   :  { %v6491_v32 = vpop.f32.mrf.mxu0 }
 0x6d1   :  { %v6500_v62 = vpop.f32.mrf.mxu0 }
 0x6d2   :  { %8085 = vst [vmem:[#allocation39_spill] sm:$0xff] %v6500_v62  ;;  %v1849_v62 = vmul.f32 %v1845_v26, %v1823_v27  ;;  %v1976_v27 = vadd.f32 %v1968_v10, %v1846_v54  ;;  %v6561_v26 = vmul.f32 %v2223_v37, %v6483_v51  ;;  %v6564_v54 = vmul.f32 %v2227_v36, %v6485_v4 }
 0x6d3   :  { %v6503_v3 = vpop.f32.mrf.mxu0  ;;  %v2490_v4 = vmul.f32 %v6528_v30, %v2463_v58 }
 0x6d4   :  { %8086 = vst [vmem:[#allocation74_spill] sm:$0xff] %v6503_v3  ;;  %v1848_v3 = vmul.f32 %v1841_v12, %v1821_v55  ;;  %v2099_v55 = vmul.f32 %v6519_v53, %v2069_v14  ;;  %v2233_v12 = vmul.f32 %v2227_v36, %v6479_v20  ;;  %v2106_v10 = vadd.f32 %v2098_v31, %v1976_v27 }
 0x6d5   :  { %v2327_v0 = vpop.f32.mrf.mxu0  ;;  %v1979_v14 = vadd.f32 %v1971_v9, %v1849_v62  ;;  %v2489_v20 = vmul.f32 %v6531_v35, %v2459_v1  ;;  %v1980_v36 = vadd.f32 %v1972_v40, %v1850_v33  ;;  %v2103_v62 = vmul.f32 %v6519_v53, %v6491_v32 }
 0x6d6   :  { %v1978_v21 = vadd.f32 %v1970_v43, %v1848_v3  ;;  %v2107_v37 = vadd.f32 %v2099_v55, %v1977_v39  ;;  %v2102_v43 = vmul.f32 %v6516_v23, %v6487_v59  ;;  %v2358_v3 = vmul.f32 %v6522_v8, %v2327_v0  ;;  %v8096_v39 = vld [vmem:[#allocation2_spill] sm:$0xff] }
 0x6d7   :  { %v2329_v28 = vpop.f32.mrf.mxu0  ;;  %v2109_v47 = vadd.f32 %v2101_v57, %v1979_v14  ;;  %v2236_v1 = vadd.f32 %v2228_v22, %v2106_v10  ;;  %v1981_v59 = vadd.f32 %v1973_v24, %v1851_v11  ;;  %v1975_v0 = vmul.f32 %v6513_v46, %v8093_v48 }
 0x6d8   :  { %v2108_v51 = vadd.f32 %v2100_v50, %v1978_v21  ;;  %v2359_v19 = vmul.f32 %v6525_v60, %v2329_v28  ;;  %v2491_v32 = vmul.f32 %v6531_v35, %v2465_v52  ;;  %v2237_v58 = vadd.f32 %v2229_v2, %v2107_v37 }
 0x6d9   :  { %v2333_v49 = vpop.f32.mrf.mxu0  ;;  %v2110_v27 = vadd.f32 %v2102_v43, %v1980_v36  ;;  %v2366_v55 = vadd.f32 %v2358_v3, %v2236_v1  ;;  %v2239_v29 = vadd.f32 %v2231_v13, %v2109_v47  ;;  %v2111_v15 = vadd.f32 %v2103_v62, %v1981_v59  ;;  %v8094_v22 = vld [vmem:[#allocation39_spill] sm:$0xff] }
 0x6da   :  { %v2360_v38 = vmul.f32 %v6522_v8, %v2333_v49  ;;  %v2238_v9 = vadd.f32 %v2230_v16, %v2108_v51  ;;  %v2104_v28 = vmul.f32 %v6516_v23, %v8094_v22  ;;  %v1982_v40 = vadd.f32 %v1974_v44, %v1852_v56 }
 0x6db   :  { %v2335_v5 = vpop.f32.mrf.mxu0  ;;  %v8095_v49 = vld [vmem:[#allocation74_spill] sm:$0xff]  ;;  %v2367_v46 = vadd.f32 %v2359_v19, %v2237_v58  ;;  %v1983_v21 = vadd.f32 %v1975_v0, %v1853_v63  ;;  %v2496_v14 = vadd.f32 %v2488_v41, %v2366_v55  ;;  %v2492_v23 = vmul.f32 %v6528_v30, %v2469_v6  ;;  %v8097_v0 = vld [vmem:[#allocation4_spill] sm:$0xff] }
 0x6dc   :  { %v2361_v33 = vmul.f32 %v6525_v60, %v2335_v5  ;;  %v2105_v11 = vmul.f32 %v6519_v53, %v8095_v49  ;;  %v2368_v57 = vadd.f32 %v2360_v38, %v2238_v9  ;;  %v2475_v5 = vpop.f32.mrf.mxu1  ;;  %v2493_v24 = vmul.f32 %v6531_v35, %v2471_v34 }
 0x6dd   :  { %v2339_v42 = vpop.f32.mrf.mxu0  ;;  %v2240_v56 = vadd.f32 %v2232_v18, %v2110_v27  ;;  %v2112_v37 = vadd.f32 %v2104_v28, %v1982_v40  ;;  %v2241_v51 = vadd.f32 %v2233_v12, %v2111_v15  ;;  %v2497_v36 = vadd.f32 %v2489_v20, %v2367_v46 }
 0x6de   :  { %v2369_v2 = vadd.f32 %v2361_v33, %v2239_v29  ;;  %v2362_v16 = vmul.f32 %v6522_v8, %v2339_v42  ;;  %v2113_v43 = vadd.f32 %v2105_v11, %v1983_v21  ;;  %v2498_v63 = vadd.f32 %v2490_v4, %v2368_v57  ;;  %v2477_v47 = vpop.f32.mrf.mxu1 }
 0x6df   :  { %v2341_v7 = vpop.f32.mrf.mxu0  ;;  %v2242_v34 = vadd.f32 %v6561_v26, %v2112_v37  ;;  %v2494_v20 = vmul.f32 %v6528_v30, %v2475_v5  ;;  %v2495_v4 = vmul.f32 %v6531_v35, %v2477_v47 }
 0x6e0   :  { %v2363_v13 = vmul.f32 %v6525_v60, %v2341_v7  ;;  %v2370_v7 = vadd.f32 %v2362_v16, %v2240_v56  ;;  %v2499_v44 = vadd.f32 %v2491_v32, %v2369_v2  ;;  %v2243_v48 = vadd.f32 %v6564_v54, %v2113_v43 }
 0x6e1   :  { %v2345_v61 = vpop.f32.mrf.mxu0 }
 0x6e2   :  { %v2371_v41 = vadd.f32 %v2363_v13, %v2241_v51  ;;  %v2364_v6 = vmul.f32 %v6522_v8, %v2345_v61  ;;  %v2500_v32 = vadd.f32 %v2492_v23, %v2370_v7 }
 0x6e3   :  { %v2347_v31 = vpop.f32.mrf.mxu0 }
 0x6e4   :  { %v2365_v19 = vmul.f32 %v6525_v60, %v2347_v31  ;;  %v2372_v60 = vadd.f32 %v2364_v6, %v2242_v34  ;;  %v2501_v31 = vadd.f32 %v2493_v24, %v2371_v41 }
 0x6e5   :  { %v2587_v50 = vpop.f32.mrf.mxu0 }
 0x6e6   :  { %v2618_v52 = vmul.f32 %v8096_v39, %v2587_v50  ;;  %v2373_v27 = vadd.f32 %v2365_v19, %v2243_v48  ;;  %v2502_v49 = vadd.f32 %v2494_v20, %v2372_v60 }
 0x6e7   :  { %v2589_v10 = vpop.f32.mrf.mxu0 }
 0x6e8   :  { %v2619_v53 = vmul.f32 %v6540_v17, %v2589_v10  ;;  %v2626_v62 = vadd.f32 %v2618_v52, %v2496_v14  ;;  %v2503_v46 = vadd.f32 %v2495_v4, %v2373_v27 }
 0x6e9   :  { %v2593_v3 = vpop.f32.mrf.mxu0 }
 0x6ea   :  { %v2620_v42 = vmul.f32 %v8096_v39, %v2593_v3  ;;  %v2627_v38 = vadd.f32 %v2619_v53, %v2497_v36  ;;  %v2646_v33 = vadd.f32 %v8097_v0, %v2626_v62 }
 0x6eb   :  { %v2595_v1 = vpop.f32.mrf.mxu0 }
 0x6ec   :  { %v2628_v18 = vadd.f32 %v2620_v42, %v2498_v63  ;;  %v2621_v12 = vmul.f32 %v6540_v17, %v2595_v1  ;;  %v2647_v26 = vadd.f32 %v6543_v25, %v2627_v38  ;;  %v6611_v15 = vmax.f32 %v2646_v33, 0.0 }
 0x6ed   :  { %v2599_v59 = vpop.f32.mrf.mxu0 }
 0x6ee   :  { %v2648_v8 = vadd.f32 %v8097_v0, %v2628_v18  ;;  %v2629_v61 = vadd.f32 %v2621_v12, %v2499_v44  ;;  %v2622_v58 = vmul.f32 %v8096_v39, %v2599_v59  ;;  %v6617_v57 = vmax.f32 %v2647_v26, 0.0 }
 0x6ef   :  { %v2601_v9 = vpop.f32.mrf.mxu0  ;;  %v2680_v13 = vmul.f32 %v6611_v15, %v6611_v15 }
 0x6f0   :  { %v2649_v30 = vadd.f32 %v6543_v25, %v2629_v61  ;;  %v2623_v35 = vmul.f32 %v6540_v17, %v2601_v9  ;;  %v6609_v55 = vmax.f32 %v2648_v8, 0.0  ;;  %v2630_v54 = vadd.f32 %v2622_v58, %v2500_v32 }
 0x6f1   :  { %v2605_v29 = vpop.f32.mrf.mxu0 }
 0x6f2   :  { %v6613_v22 = vmax.f32 %v2649_v30, 0.0  ;;  %v2631_v28 = vadd.f32 %v2623_v35, %v2501_v31  ;;  %v2650_v11 = vadd.f32 %v8097_v0, %v2630_v54  ;;  %v2624_v50 = vmul.f32 %v8096_v39, %v2605_v29  ;;  %v2964_v29 = vld [vmem:[%s7628_s11 + $0xf0] sm:$0xff] }
 0x6f3   :  { %v2607_v40 = vpop.f32.mrf.mxu0  ;;  %v2682_v52 = vmul.f32 %v6609_v55, %v6609_v55  ;;  %v2662_v14 = vadd.f32 %v6609_v55, %v6611_v15 }
 0x6f4   :  { %v2651_v5 = vadd.f32 %v6543_v25, %v2631_v28  ;;  %v6622_v21 = vmax.f32 %v2650_v11, 0.0  ;;  %v2632_v2 = vadd.f32 %v2624_v50, %v2502_v49  ;;  %v2625_v16 = vmul.f32 %v6540_v17, %v2607_v40  ;;  %v2963_v49 = vld [vmem:[%s7628_s11 + $0xe8] sm:$0xff]  ;;  %v2962_v50 = vld [vmem:[%s7628_s11 + $0xe0] sm:$0xff]  ;;  %v2961_v40 = vld [vmem:[%s7628_s11 + $0xd8] sm:$0xff] }
 0x6f5   :  { %v2683_v39 = vmul.f32 %v6613_v22, %v6613_v22  ;;  %v2681_v17 = vmul.f32 %v6617_v57, %v6617_v57  ;;  %v2671_v56 = vadd.f32 %v6613_v22, %v6617_v57  ;;  %v2688_v51 = vadd.f32 %v2682_v52, %v2680_v13  ;;  %v8098_v52 = vld [vmem:[#allocation13_spill] sm:$0xff] }
 0x6f6   :  { %v6629_v10 = vmax.f32 %v2651_v5, 0.0  ;;  %v2684_v23 = vmul.f32 %v6622_v21, %v6622_v21  ;;  %v2652_v24 = vadd.f32 %v8097_v0, %v2632_v2  ;;  %v2633_v53 = vadd.f32 %v2625_v16, %v2503_v46  ;;  %v2960_v46 = vld [vmem:[%s7628_s11 + $0xd0] sm:$0xff]  ;;  %v2959_v5 = vld [vmem:[%s7628_s11 + $0xc8] sm:$0xff]  ;;  %v2958_v2 = vld [vmem:[%s7628_s11 + $0xc0] sm:$0xff] }
 0x6f7   :  { %v2663_v43 = vadd.f32 %v2662_v14, %v6622_v21  ;;  %v2697_v63 = vadd.f32 %v2683_v39, %v2681_v17  ;;  %v8099_v16 = vld [vmem:[#allocation14_spill] sm:$0xff]  ;;  %v2957_v13 = vld [vmem:[%s7628_s11 + $0xb8] sm:$0xff]  ;;  %v8100_v39 = vld [vmem:[#allocation16_spill] sm:$0xff] }
 0x6f8   :  { %v2685_v37 = vmul.f32 %v6629_v10, %v6629_v10  ;;  %v6643_v3 = vmax.f32 %v2652_v24, 0.0  ;;  %v2653_v36 = vadd.f32 %v6543_v25, %v2633_v53  ;;  %v2672_v47 = vadd.f32 %v2671_v56, %v6629_v10  ;;  %v2956_v14 = vld [vmem:[%s7628_s11 + $0xb0] sm:$0xff]  ;;  %v2955_v24 = vld [vmem:[%s7628_s11 + $0xa8] sm:$0xff]  ;;  %v2954_v17 = vld [vmem:[%s7628_s11 + $0xa0] sm:$0xff] }
 0x6f9   :  { %v2689_v62 = vadd.f32 %v2688_v51, %v2684_v23  ;;  %v8101_v23 = vld [vmem:[#allocation18_spill] sm:$0xff]  ;;  %v8102_v53 = vld [vmem:[#allocation19_spill] sm:$0xff]  ;;  %v8103_v56 = vld [vmem:[#allocation20_spill] sm:$0xff] }
 0x6fa   :  { %v2664_v42 = vadd.f32 %v2663_v43, %v6643_v3  ;;  %v2686_v7 = vmul.f32 %v6643_v3, %v6643_v3  ;;  %v6650_v44 = vmax.f32 %v2653_v36, 0.0  ;;  %v2698_v41 = vadd.f32 %v2697_v63, %v2685_v37  ;;  %v2953_v37 = vld [vmem:[%s7628_s11 + $0x98] sm:$0xff]  ;;  %v8104_v51 = vld [vmem:[#allocation22_spill] sm:$0xff]  ;;  %v2952_v43 = vld [vmem:[%s7628_s11 + $0x90] sm:$0xff] }
 0x6fb   :  { %v8105_v36 = vld [vmem:[#allocation33_spill] sm:$0xff]  ;;  %v2951_v63 = vld [vmem:[%s7628_s11 + $0x88] sm:$0xff] }
 0x6fc   :  { %v2665_v6 = vrot.slane %v2664_v42, 4  ;;  %v2690_v1 = vadd.f32 %v2689_v62, %v2686_v7  ;;  %v2673_v19 = vadd.f32 %v2672_v47, %v6650_v44  ;;  %v2687_v38 = vmul.f32 %v6650_v44, %v6650_v44  ;;  %v8106_v47 = vld [vmem:[#allocation24_spill] sm:$0xff]  ;;  %v2950_v62 = vld [vmem:[%s7628_s11 + $0x80] sm:$0xff]  ;;  %v8108_v7 = vld [vmem:[#allocation27_spill] sm:$0xff] }
 0x6fe   :  { %v2666_v25 = vadd.f32 %v2665_v6, %v2664_v42  ;;  %v2691_v18 = vrot.slane %v2690_v1, 4  ;;  %v2674_v12 = vrot.slane %v2673_v19, 4  ;;  %v2699_v34 = vadd.f32 %v2698_v41, %v2687_v38  ;;  %v8107_v42 = vld [vmem:[#allocation25_spill] sm:$0xff]  ;;  %v8110_v6 = vld [vmem:[#allocation30_spill] sm:$0xff] }
 0x6ff   :  { %v8109_v41 = vld [vmem:[#allocation29_spill] sm:$0xff]  ;;  %v8113_v38 = vld [vmem:[#allocation34_spill] sm:$0xff] }
 0x700   :  { %v2667_v20 = vrot.slane %v2666_v25, 2  ;;  %v2692_v4 = vadd.f32 %v2691_v18, %v2690_v1  ;;  %v2675_v59 = vadd.f32 %v2674_v12, %v2673_v19  ;;  %v2700_v48 = vrot.slane %v2699_v34, 4  ;;  %v8111_v1 = vld [vmem:[#allocation32_spill] sm:$0xff]  ;;  %v8116_v12 = vld [vmem:[#allocation37_spill] sm:$0xff] }
 0x701   :  { %v8112_v19 = vld [vmem:[#allocation44_spill] sm:$0xff] }
 0x702   :  { %v2668_v0 = vadd.f32 %v2667_v20, %v2666_v25  ;;  %v2693_v33 = vrot.slane %v2692_v4, 2  ;;  %v2676_v8 = vrot.slane %v2675_v59, 2  ;;  %v2701_v61 = vadd.f32 %v2700_v48, %v2699_v34  ;;  %v8114_v25 = vld [vmem:[#allocation35_spill] sm:$0xff]  ;;  %v8115_v18 = vld [vmem:[#allocation36_spill] sm:$0xff]  ;;  %v8117_v34 = vld [vmem:[#allocation38_spill] sm:$0xff] }
 0x703   :  { %v8118_v20 = vld [vmem:[#allocation6_spill] sm:$0xff]  ;;  %v8121_v48 = vld [vmem:[#allocation9_spill] sm:$0xff] }
 0x704   :  { %v2677_v32 = vadd.f32 %v2676_v8, %v2675_v59  ;;  %v2702_v60 = vrot.slane %v2701_v61, 2  ;;  %v2694_v31 = vadd.f32 %v2693_v33, %v2692_v4  ;;  %v2669_v58 = vrot.slane %v2668_v0, 1  ;;  %v8119_v4 = vld [vmem:[#allocation7_spill] sm:$0xff]  ;;  %v8120_v59 = vld [vmem:[#allocation8_spill] sm:$0xff] }
 0x705   :  { %v8123_v33 = vld [vmem:[#allocation11_spill] sm:$0xff]  ;;  %v8124_v8 = vld [vmem:[#allocation12_spill] sm:$0xff] }
 0x706   :  { %v2678_v9 = vrot.slane %v2677_v32, 1  ;;  %v2703_v27 = vadd.f32 %v2702_v60, %v2701_v61  ;;  %v2695_v26 = vrot.slane %v2694_v31, 1  ;;  %v2670_v54 = vadd.f32 %v2669_v58, %v2668_v0  ;;  %v8122_v0 = vld [vmem:[#allocation10_spill] sm:$0xff]  ;;  %v8125_v61 = vld [vmem:[#allocation15_spill] sm:$0xff]  ;;  %v8127_v60 = vld [vmem:[#allocation21_spill] sm:$0xff] }
 0x707   :  { %v8129_v58 = vld [vmem:[#allocation26_spill] sm:$0xff] }
 0x708   :  { %v2679_v30 = vadd.f32 %v2678_v9, %v2677_v32  ;;  %v2704_v35 = vrot.slane %v2703_v27, 1  ;;  %v2696_v11 = vadd.f32 %v2695_v26, %v2694_v31  ;;  %v8126_v32 = vld [vmem:[#allocation17_spill] sm:$0xff]  ;;  %v8128_v31 = vld [vmem:[#allocation23_spill] sm:$0xff]  ;;  %v8130_v9 = vld [vmem:[#allocation28_spill] sm:$0xff] }
 0x709   :  { %v8132_v26 = vld [vmem:[#allocation43_spill] sm:$0xff] }
 0x70a   :  { %2770 = vmatprep.mubr.f32.mxu1 %v2679_v30  ;;  %v2705_v28 = vadd.f32 %v2704_v35, %v2703_v27  ;;  %v8131_v27 = vld [vmem:[#allocation31_spill] sm:$0xff]  ;;  %v8133_v30 = vld [vmem:[#allocation45_spill] sm:$0xff]  ;;  %v8134_v35 = vld [vmem:[#allocation46_spill] sm:$0xff] }
 0x70b   :  { %2771 = vmatmul.mubr.f32.vlgmr.msra.gmra.mxu1 %v2670_v54  ;;  %v8135_v54 = vld [vmem:[#allocation47_spill] sm:$0xff] }
 0x70c   :  { %2841 = vmatprep.mubr.f32.mxu0 %v2705_v28  ;;  %3011 = vmatpush1.msra.mxu1 %v2964_v29  ;;  %v8136_v29 = vld [vmem:[#allocation48_spill] sm:$0xff]  ;;  %v8137_v28 = vld [vmem:[#allocation49_spill] sm:$0xff] }
 0x70d   :  { %2842 = vmatmul.mubr.f32.vlgmr.msra.gmra.mxu0 %v2696_v11  ;;  %3012 = vmatprep.subr.mxu1 %v2963_v49  ;;  %v8138_v49 = vld [vmem:[#allocation50_spill] sm:$0xff]  ;;  %v8139_v11 = vld [vmem:[#allocation51_spill] sm:$0xff] }
 0x70e   :  { %3013 = vmatpush1.msra.mxu1 %v2962_v50  ;;  %3152 = vmatpush1.msra.mxu0 %v8098_v52  ;;  %v8140_v50 = vld [vmem:[#allocation52_spill] sm:$0xff] }
 0x70f   :  { %3014 = vmatprep.subr.mxu1 %v2961_v40  ;;  %3153 = vmatprep.subr.mxu0 %v8099_v16  ;;  %v8141_v40 = vld [vmem:[#allocation53_spill] sm:$0xff]  ;;  %v8144_v52 = vld [vmem:[#allocation56_spill] sm:$0xff]  ;;  %v8146_v16 = vld [vmem:[#allocation58_spill] sm:$0xff] }
 0x710   :  { %3015 = vmatpush1.msra.mxu1 %v2960_v46  ;;  %3154 = vmatpush1.msra.mxu0 %v8100_v39  ;;  %v8142_v46 = vld [vmem:[#allocation54_spill] sm:$0xff]  ;;  %v8148_v39 = vld [vmem:[#allocation60_spill] sm:$0xff] }
 0x711   :  { %3016 = vmatprep.subr.mxu1 %v2959_v5  ;;  %3155 = vmatprep.subr.mxu0 %v8101_v23  ;;  %v8143_v5 = vld [vmem:[#allocation55_spill] sm:$0xff]  ;;  %v8150_v23 = vld [vmem:[#allocation62_spill] sm:$0xff] }
 0x712   :  { %3017 = vmatpush1.msra.mxu1 %v2958_v2  ;;  %3156 = vmatpush1.msra.mxu0 %v8102_v53  ;;  %v8145_v2 = vld [vmem:[#allocation57_spill] sm:$0xff]  ;;  %v8152_v53 = vld [vmem:[#allocation64_spill] sm:$0xff] }
 0x713   :  { %3018 = vmatprep.subr.mxu1 %v2957_v13  ;;  %3157 = vmatprep.subr.mxu0 %v8103_v56  ;;  %v8147_v13 = vld [vmem:[#allocation59_spill] sm:$0xff]  ;;  %v8154_v56 = vld [vmem:[#allocation66_spill] sm:$0xff] }
 0x714   :  { %3019 = vmatpush1.msra.mxu1 %v2956_v14  ;;  %3158 = vmatpush1.msra.mxu0 %v8104_v51  ;;  %v8149_v14 = vld [vmem:[#allocation61_spill] sm:$0xff]  ;;  %v8156_v51 = vld [vmem:[#allocation68_spill] sm:$0xff] }
 0x715   :  { %3020 = vmatprep.subr.mxu1 %v2955_v24  ;;  %3159 = vmatprep.subr.mxu0 %v8105_v36  ;;  %v8151_v24 = vld [vmem:[#allocation63_spill] sm:$0xff]  ;;  %v2949_v36 = vld [vmem:[%s7628_s11 + $0x78] sm:$0xff] }
 0x716   :  { %3021 = vmatpush1.msra.mxu1 %v2954_v17  ;;  %3160 = vmatpush1.msra.mxu0 %v8106_v47  ;;  %v8153_v17 = vld [vmem:[#allocation65_spill] sm:$0xff]  ;;  %v2948_v47 = vld [vmem:[%s7628_s11 + $0x70] sm:$0xff] }
 0x717   :  { %3022 = vmatprep.subr.mxu1 %v2953_v37  ;;  %3161 = vmatprep.subr.mxu0 %v8107_v42  ;;  %v8155_v37 = vld [vmem:[#allocation67_spill] sm:$0xff] }
 0x718   :  { %3023 = vmatpush1.msra.mxu1 %v2952_v43  ;;  %3162 = vmatpush1.msra.mxu0 %v8108_v7  ;;  %v8157_v43 = vld [vmem:[#allocation69_spill] sm:$0xff]  ;;  %v2947_v42 = vld [vmem:[%s7628_s11 + $0x68] sm:$0xff]  ;;  %v8160_v7 = vld [vmem:[#allocation72_spill] sm:$0xff] }
 0x719   :  { %3024 = vmatprep.subr.mxu1 %v2951_v63  ;;  %3163 = vmatprep.subr.mxu0 %v8109_v41  ;;  %v8158_v63 = vld [vmem:[#allocation70_spill] sm:$0xff] }
 0x71a   :  { %3025 = vmatpush1.msra.mxu1 %v2950_v62  ;;  %3164 = vmatpush1.msra.mxu0 %v8110_v6  ;;  %v8159_v62 = vld [vmem:[#allocation71_spill] sm:$0xff]  ;;  %v2946_v41 = vld [vmem:[%s7628_s11 + $0x60] sm:$0xff]  ;;  %v6778_v6 = vld [vmem:[%s7618_s13 + $0xf8] sm:$0xff] }
 0x71b   :  { %3165 = vmatprep.subr.mxu0 %v8111_v1  ;;  %3026 = vmatprep.subr.mxu1 %v2949_v36  ;;  %v2945_v1 = vld [vmem:[%s7628_s11 + $0x58] sm:$0xff] }
 0x71c   :  { %3166 = vmatpush1.msra.mxu0 %v8112_v19  ;;  %3027 = vmatpush1.msra.mxu1 %v2948_v47  ;;  %v2944_v19 = vld [vmem:[%s7628_s11 + $0x50] sm:$0xff] }
 0x71d   :  { %3167 = vmatprep.subr.mxu0 %v8113_v38  ;;  %3028 = vmatprep.subr.mxu1 %v2947_v42  ;;  %v2943_v38 = vld [vmem:[%s7628_s11 + $0x48] sm:$0xff] }
 0x71e   :  { %3168 = vmatpush1.msra.mxu0 %v8114_v25  ;;  %3029 = vmatpush1.msra.mxu1 %v2946_v41  ;;  %v2942_v25 = vld [vmem:[%s7628_s11 + $0x40] sm:$0xff] }
 0x71f   :  { %3169 = vmatprep.subr.mxu0 %v8115_v18  ;;  %3030 = vmatprep.subr.mxu1 %v2945_v1  ;;  %v2941_v18 = vld [vmem:[%s7628_s11 + $0x38] sm:$0xff] }
 0x720   :  { %3170 = vmatpush1.msra.mxu0 %v8116_v12  ;;  %3031 = vmatpush1.msra.mxu1 %v2944_v19  ;;  %v2940_v12 = vld [vmem:[%s7628_s11 + $0x30] sm:$0xff] }
 0x721   :  { %3171 = vmatprep.subr.mxu0 %v8117_v34  ;;  %3032 = vmatprep.subr.mxu1 %v2943_v38  ;;  %v2939_v34 = vld [vmem:[%s7628_s11 + $0x28] sm:$0xff] }
 0x722   :  { %3172 = vmatpush1.msra.mxu0 %v8118_v20  ;;  %3033 = vmatpush1.msra.mxu1 %v2942_v25  ;;  %v2938_v20 = vld [vmem:[%s7628_s11 + $0x20] sm:$0xff] }
 0x723   :  { %3173 = vmatprep.subr.mxu0 %v8119_v4  ;;  %3034 = vmatprep.subr.mxu1 %v2941_v18  ;;  %v2937_v4 = vld [vmem:[%s7628_s11 + $0x18] sm:$0xff]  ;;  %v8161_v25 = vld [vmem:[#allocation42_spill] sm:$0xff] }
 0x724   :  { %3174 = vmatpush1.msra.mxu0 %v8120_v59  ;;  %3035 = vmatpush1.msra.mxu1 %v2940_v12  ;;  %v2936_v59 = vld [vmem:[%s7628_s11 + $0x10] sm:$0xff] }
 0x725   :  { %3175 = vmatprep.subr.mxu0 %v8121_v48  ;;  %3036 = vmatprep.subr.mxu1 %v2939_v34  ;;  %v2935_v48 = vld [vmem:[%s7628_s11 + $0x8] sm:$0xff]  ;;  %v6919_v34 = vld [vmem:[%s7620_s14] sm:$0x3] }
 0x726   :  { %3176 = vmatpush1.msra.mxu0 %v8122_v0  ;;  %3037 = vmatpush1.msra.mxu1 %v2938_v20  ;;  %v2934_v0 = vld [vmem:[%s7628_s11] sm:$0xff]  ;;  %8162 = vst [vmem:[#allocation3_spill] sm:$0xff] %v6919_v34 }
 0x727   :  { %3177 = vmatprep.subr.mxu0 %v8123_v33  ;;  %3038 = vmatprep.subr.mxu1 %v2937_v4  ;;  %v2997_v33 = vld [vmem:[%s7628_s11 + $0x1f8] sm:$0xff]  ;;  %v8163_v4 = vld [vmem:[#allocation40_spill] sm:$0xff] }
 0x728   :  { %3178 = vmatpush1.msra.mxu0 %v8124_v8  ;;  %3039 = vmatpush1.msra.mxu1 %v2936_v59  ;;  %v2996_v8 = vld [vmem:[%s7628_s11 + $0x1f0] sm:$0xff] }
 0x729   :  { %3179 = vmatprep.subr.mxu0 %v8125_v61  ;;  %3040 = vmatprep.subr.mxu1 %v2935_v48  ;;  %v2995_v61 = vld [vmem:[%s7628_s11 + $0x1e8] sm:$0xff] }
 0x72a   :  { %3180 = vmatpush1.msra.mxu0 %v8126_v32  ;;  %3041 = vmatpush1.msra.mxu1 %v2934_v0  ;;  %v2994_v32 = vld [vmem:[%s7628_s11 + $0x1e0] sm:$0xff] }
 0x72b   :  { %3181 = vmatprep.subr.mxu0 %v8127_v60  ;;  %3042 = vmatprep.subr.mxu1 %v2997_v33  ;;  %v2993_v60 = vld [vmem:[%s7628_s11 + $0x1d8] sm:$0xff] }
 0x72c   :  { %3182 = vmatpush1.msra.mxu0 %v8128_v31  ;;  %3043 = vmatpush2.msra.mxu1 %v2996_v8  ;;  %v2992_v31 = vld [vmem:[%s7628_s11 + $0x1d0] sm:$0xff] }
 0x72d   :  { %3183 = vmatprep.subr.mxu0 %v8129_v58  ;;  %3044 = vmatprep.subr.mxu1 %v2995_v61  ;;  %v2991_v58 = vld [vmem:[%s7628_s11 + $0x1c8] sm:$0xff] }
 0x72e   :  { %3184 = vmatpush2.msra.mxu0 %v8130_v9  ;;  %3045 = vmatpush2.msra.mxu1 %v2994_v32  ;;  %v2990_v9 = vld [vmem:[%s7628_s11 + $0x1c0] sm:$0xff] }
 0x72f   :  { %3185 = vmatprep.subr.mxu0 %v8131_v27  ;;  %3046 = vmatprep.subr.mxu1 %v2993_v60  ;;  %v2989_v27 = vld [vmem:[%s7628_s11 + $0x1b8] sm:$0xff]  ;;  %v6929_v60 = vld [vmem:[%s7621_s15] sm:$0x3] }
 0x730   :  { %3186 = vmatpush2.msra.mxu0 %v8132_v26  ;;  %3047 = vmatpush2.msra.mxu1 %v2992_v31  ;;  %v2988_v26 = vld [vmem:[%s7628_s11 + $0x1b0] sm:$0xff]  ;;  %8164 = vst [vmem:[#allocation5_spill] sm:$0xff] %v6929_v60 }
 0x731   :  { %3187 = vmatprep.subr.mxu0 %v8133_v30  ;;  %3048 = vmatprep.subr.mxu1 %v2991_v58  ;;  %v2987_v30 = vld [vmem:[%s7628_s11 + $0x1a8] sm:$0xff] }
 0x732   :  { %3188 = vmatpush2.msra.mxu0 %v8134_v35  ;;  %3049 = vmatpush2.msra.mxu1 %v2990_v9  ;;  %v2986_v35 = vld [vmem:[%s7628_s11 + $0x1a0] sm:$0xff] }
 0x733   :  { %3189 = vmatprep.subr.mxu0 %v8135_v54  ;;  %3050 = vmatprep.subr.mxu1 %v2989_v27  ;;  %v2985_v54 = vld [vmem:[%s7628_s11 + $0x198] sm:$0xff] }
 0x734   :  { %3190 = vmatpush2.msra.mxu0 %v8136_v29  ;;  %3051 = vmatpush2.msra.mxu1 %v2988_v26  ;;  %v2984_v29 = vld [vmem:[%s7628_s11 + $0x190] sm:$0xff] }
 0x735   :  { %3191 = vmatprep.subr.mxu0 %v8137_v28  ;;  %3052 = vmatprep.subr.mxu1 %v2987_v30  ;;  %v2983_v28 = vld [vmem:[%s7628_s11 + $0x188] sm:$0xff] }
 0x736   :  { %3192 = vmatpush2.msra.mxu0 %v8138_v49  ;;  %3053 = vmatpush2.msra.mxu1 %v2986_v35  ;;  %v2982_v49 = vld [vmem:[%s7628_s11 + $0x180] sm:$0xff] }
 0x737   :  { %3193 = vmatprep.subr.mxu0 %v8139_v11  ;;  %3054 = vmatprep.subr.mxu1 %v2985_v54  ;;  %v2981_v11 = vld [vmem:[%s7628_s11 + $0x178] sm:$0xff] }
 0x738   :  { %3194 = vmatpush2.msra.mxu0 %v8140_v50  ;;  %3055 = vmatpush2.msra.mxu1 %v2984_v29  ;;  %v2980_v50 = vld [vmem:[%s7628_s11 + $0x170] sm:$0xff] }
 0x739   :  { %3195 = vmatprep.subr.mxu0 %v8141_v40  ;;  %3056 = vmatprep.subr.mxu1 %v2983_v28  ;;  %v2979_v40 = vld [vmem:[%s7628_s11 + $0x168] sm:$0xff] }
 0x73a   :  { %3196 = vmatpush2.msra.mxu0 %v8142_v46  ;;  %3057 = vmatpush2.msra.mxu1 %v2982_v49  ;;  %v2978_v46 = vld [vmem:[%s7628_s11 + $0x160] sm:$0xff] }
 0x73b   :  { %3197 = vmatprep.subr.mxu0 %v8143_v5  ;;  %3058 = vmatprep.subr.mxu1 %v2981_v11  ;;  %v2977_v5 = vld [vmem:[%s7628_s11 + $0x158] sm:$0xff] }
 0x73c   :  { %3198 = vmatpush2.msra.mxu0 %v8144_v52  ;;  %3059 = vmatpush2.msra.mxu1 %v2980_v50  ;;  %v2976_v52 = vld [vmem:[%s7628_s11 + $0x150] sm:$0xff]  ;;  %v6961_v50 = vld [vmem:[%s7618_s13 + $0xd8] sm:$0xff] }
 0x73d   :  { %3199 = vmatprep.subr.mxu0 %v8145_v2  ;;  %3060 = vmatprep.subr.mxu1 %v2979_v40  ;;  %v2975_v2 = vld [vmem:[%s7628_s11 + $0x148] sm:$0xff] }
 0x73e   :  { %3200 = vmatpush2.msra.mxu0 %v8146_v16  ;;  %3061 = vmatpush2.msra.mxu1 %v2978_v46  ;;  %v2974_v16 = vld [vmem:[%s7628_s11 + $0x140] sm:$0xff]  ;;  %v6968_v46 = vld [vmem:[%s7618_s13 + $0xd0] sm:$0xff] }
 0x73f   :  { %3201 = vmatprep.subr.mxu0 %v8147_v13  ;;  %3062 = vmatprep.subr.mxu1 %v2977_v5  ;;  %v2973_v13 = vld [vmem:[%s7628_s11 + $0x138] sm:$0xff] }
 0x740   :  { %3202 = vmatpush2.msra.mxu0 %v8148_v39  ;;  %3063 = vmatpush2.msra.mxu1 %v2976_v52  ;;  %v2972_v39 = vld [vmem:[%s7628_s11 + $0x130] sm:$0xff] }
 0x741   :  { %3203 = vmatprep.subr.mxu0 %v8149_v14  ;;  %3064 = vmatprep.subr.mxu1 %v2975_v2  ;;  %v2971_v14 = vld [vmem:[%s7628_s11 + $0x128] sm:$0xff] }
 0x742   :  { %3204 = vmatpush2.msra.mxu0 %v8150_v23  ;;  %3065 = vmatpush2.msra.mxu1 %v2974_v16  ;;  %v2970_v23 = vld [vmem:[%s7628_s11 + $0x120] sm:$0xff]  ;;  %v6987_v16 = vld [vmem:[%s7618_s13 + $0xb8] sm:$0xff] }
 0x743   :  { %3205 = vmatprep.subr.mxu0 %v8151_v24  ;;  %3066 = vmatprep.subr.mxu1 %v2973_v13  ;;  %v2969_v24 = vld [vmem:[%s7628_s11 + $0x118] sm:$0xff]  ;;  %v6993_v13 = vld [vmem:[%s7618_s13 + $0xb0] sm:$0xff] }
 0x744   :  { %3206 = vmatpush2.msra.mxu0 %v8152_v53  ;;  %3067 = vmatpush2.msra.mxu1 %v2972_v39  ;;  %v2968_v53 = vld [vmem:[%s7628_s11 + $0x110] sm:$0xff] }
 0x745   :  { %3207 = vmatprep.subr.mxu0 %v8153_v17  ;;  %3068 = vmatprep.subr.mxu1 %v2971_v14  ;;  %v2967_v17 = vld [vmem:[%s7628_s11 + $0x108] sm:$0xff]  ;;  %v7005_v14 = vld [vmem:[%s7618_s13 + $0xa0] sm:$0xff] }
 0x746   :  { %3208 = vmatpush2.msra.mxu0 %v8154_v56  ;;  %3069 = vmatpush2.msra.mxu1 %v2970_v23  ;;  %v2966_v56 = vld [vmem:[%s7628_s11 + $0x100] sm:$0xff]  ;;  %v7011_v23 = vld [vmem:[%s7618_s13 + $0x98] sm:$0xff] }
 0x747   :  { %3209 = vmatprep.subr.mxu0 %v8155_v37  ;;  %3070 = vmatprep.subr.mxu1 %v2969_v24  ;;  %v7017_v24 = vld [vmem:[%s7618_s13 + $0x90] sm:$0xff] }
 0x748   :  { %3210 = vmatpush2.msra.mxu0 %v8156_v51  ;;  %3071 = vmatpush2.msra.mxu1 %v2968_v53  ;;  %v7023_v53 = vld [vmem:[%s7618_s13 + $0x88] sm:$0xff] }
 0x749   :  { %3211 = vmatprep.subr.mxu0 %v8157_v43  ;;  %3072 = vmatprep.subr.mxu1 %v2967_v17  ;;  %v7029_v17 = vld [vmem:[%s7618_s13 + $0x80] sm:$0xff] }
 0x74a   :  { %3212 = vmatpush2.msra.mxu0 %v8158_v63  ;;  %3073 = vmatpush2.msra.mxu1 %v2966_v56  ;;  %v7035_v56 = vld [vmem:[%s7618_s13 + $0x78] sm:$0xff] }
 0x74b   :  { %3213 = vmatprep.subr.mxu0 %v8159_v62  ;;  %3222 = vmatprep.subr.mxu1 %v6778_v6 }
 0x74c   :  { %3214 = vmatpush2.msra.mxu0 %v8160_v7 }
 0x74d   :  { %3439 = vmatprep.subr.mxu0 %v6778_v6 }
 0x7cb   :  { %v2772_v37 = vpop.f32.mrf.mxu1 }
 0x7cc   :  { %v2848_v51 = vmul.f32 %v2772_v37, %v2772_v37 }
 0x7cd   :  { %v2774_v43 = vpop.f32.mrf.mxu1  ;;  %v2843_v36 = vpop.f32.mrf.mxu0 }
 0x7ce   :  { %v2849_v63 = vmul.f32 %v2774_v43, %v2774_v43  ;;  %v2850_v47 = vsub.f32 %v2843_v36, %v2848_v51  ;;  %v7047_v51 = vld [vmem:[%s7618_s13 + $0x68] sm:$0xff]  ;;  %v7059_v36 = vld [vmem:[%s7618_s13 + $0x58] sm:$0xff] }
 0x7cf   :  { %v2845_v62 = vpop.f32.mrf.mxu0 }
 0x7d0   :  { %v2852_v42 = vadd.f32 1e-05, %v2850_v47  ;;  %v2851_v7 = vsub.f32 %v2845_v62, %v2849_v63  ;;  %v7065_v63 = vld [vmem:[%s7618_s13 + $0x50] sm:$0xff]  ;;  %v7071_v47 = vld [vmem:[%s7618_s13 + $0x48] sm:$0xff]  ;;  %v7077_v62 = vld [vmem:[%s7618_s13 + $0x40] sm:$0xff] }
 0x7d2   :  { %v2853_v41 = vadd.f32 1e-05, %v2851_v7  ;;  %3765 = vrsqrt.f32 %v2852_v42  ;;  %v7083_v42 = vld [vmem:[%s7618_s13 + $0x38] sm:$0xff]  ;;  %v7089_v7 = vld [vmem:[%s7618_s13 + $0x30] sm:$0xff] }
 0x7d4   :  { %3767 = vrsqrt.f32 %v2853_v41  ;;  %v7095_v41 = vld [vmem:[%s7618_s13 + $0x28] sm:$0xff] }
 0x7df   :  { %v3766_v1 = vpop.eup %3765 }
 0x7e1   :  { %v3768_v19 = vpop.eup %3767 }
 0x7e2   :  { %v2858_v38 = vcombine.low %v3766_v1, %v3768_v19  ;;  %v7101_v1 = vld [vmem:[%s7618_s13 + $0x20] sm:$0xff]  ;;  %v7107_v19 = vld [vmem:[%s7618_s13 + $0x18] sm:$0xff] }
 0x7e4   :  { %v2865_v18 = vrot.slane %v2858_v38, %v8161_v25  ;;  %v7113_v38 = vld [vmem:[%s7618_s13 + $0x10] sm:$0xff] }
 0x7e6   :  { %v2872_v12 = vrot.slane %v2865_v18, %v8161_v25  ;;  %v7119_v18 = vld [vmem:[%s7618_s13 + $0x8] sm:$0xff] }
 0x7e8   :  { %v2874_v20 = vmul.f32 %v6919_v34, %v2872_v12  ;;  %v7125_v12 = vld [vmem:[%s7618_s13] sm:$0xff]  ;;  %v7299_v34 = vld [vmem:[%s7618_s13 + $0x118] sm:$0xff] }
 0x7e9   :  { %8186 = vst [vmem:[#allocation35_spill] sm:$0xff] %v7299_v34 }
 0x7ea   :  { %v2879_v59 = vrot.slane %v2874_v20, %v8163_v4  ;;  %v2883_v48 = vrot.slane %v2874_v20, %v4741_v45  ;;  %v7131_v20 = vld [vmem:[%s7618_s13 + $0x1f8] sm:$0xff] }
 0x7ec   :  { %v2886_v0 = vmul.f32 %v2879_v59, %v2772_v37  ;;  %v2887_v33 = vmul.f32 %v2883_v48, %v2774_v43  ;;  %v2908_v58 = vmul.f32 %v2883_v48, %v6617_v57  ;;  %v2907_v27 = vmul.f32 %v2879_v59, %v6611_v15  ;;  %v6942_v57 = vld [vmem:[%s7618_s13 + $0xf0] sm:$0xff]  ;;  %v7053_v43 = vld [vmem:[%s7618_s13 + $0x60] sm:$0xff] }
 0x7ed   :  { %v2910_v54 = vmul.f32 %v2883_v48, %v6613_v22  ;;  %v2909_v28 = vmul.f32 %v2879_v59, %v6609_v55  ;;  %v2912_v49 = vmul.f32 %v2883_v48, %v6629_v10  ;;  %v6948_v22 = vld [vmem:[%s7618_s13 + $0xe8] sm:$0xff]  ;;  %v6954_v55 = vld [vmem:[%s7618_s13 + $0xe0] sm:$0xff]  ;;  %v2911_v10 = vmul.f32 %v2879_v59, %v6622_v21  ;;  %v7041_v37 = vld [vmem:[%s7618_s13 + $0x70] sm:$0xff] }
 0x7ee   :  { %v2890_v8 = vcombine.low %v2886_v0, %v2887_v33  ;;  %v2914_v40 = vmul.f32 %v2883_v48, %v6650_v44  ;;  %v6974_v21 = vld [vmem:[%s7618_s13 + $0xc8] sm:$0xff]  ;;  %v6980_v44 = vld [vmem:[%s7618_s13 + $0xc0] sm:$0xff]  ;;  %v2913_v2 = vmul.f32 %v2879_v59, %v6643_v3  ;;  %v7137_v59 = vld [vmem:[%s7618_s13 + $0x1f0] sm:$0xff] }
 0x7ef   :  { %v6999_v3 = vld [vmem:[%s7618_s13 + $0xa8] sm:$0xff]  ;;  %v7149_v0 = vld [vmem:[%s7618_s13 + $0x1e0] sm:$0xff]  ;;  %v7155_v33 = vld [vmem:[%s7618_s13 + $0x1d8] sm:$0xff] }
 0x7f0   :  { %v2897_v61 = vrot.slane %v2890_v8, %v8161_v25  ;;  %v7143_v48 = vld [vmem:[%s7618_s13 + $0x1e8] sm:$0xff]  ;;  %v7161_v8 = vld [vmem:[%s7618_s13 + $0x1d0] sm:$0xff] }
 0x7f2   :  { %v2904_v32 = vrot.slane %v2897_v61, %v8161_v25  ;;  %v7167_v61 = vld [vmem:[%s7618_s13 + $0x1c8] sm:$0xff]  ;;  %v7305_v25 = vld [vmem:[%s7618_s13 + $0x110] sm:$0xff] }
 0x7f3   :  { %8187 = vst [vmem:[#allocation36_spill] sm:$0xff] %v7305_v25 }
 0x7f4   :  { %v2906_v31 = vsub.f32 %v6929_v60, %v2904_v32  ;;  %v7173_v32 = vld [vmem:[%s7618_s13 + $0x1c0] sm:$0xff] }
 0x7f5   :  { %8165 = vst [vmem:[#allocation73_spill] sm:$0xff] %v7173_v32  ;;  %v7293_v60 = vld [vmem:[%s7618_s13 + $0x120] sm:$0xff] }
 0x7f6   :  { %v2923_v9 = vrot.slane %v2906_v31, %v4741_v45  ;;  %v2919_v26 = vrot.slane %v2906_v31, %v8163_v4  ;;  %v7179_v31 = vld [vmem:[%s7618_s13 + $0x1b8] sm:$0xff]  ;;  %8185 = vst [vmem:[#allocation34_spill] sm:$0xff] %v7293_v60 }
 0x7f7   :  { %8166 = vst [vmem:[#allocation39_spill] sm:$0xff] %v7179_v31 }
 0x7f8   :  { %v2927_v30 = vadd.f32 %v2923_v9, %v2908_v58  ;;  %v2926_v35 = vadd.f32 %v2919_v26, %v2907_v27  ;;  %v2929_v29 = vadd.f32 %v2923_v9, %v2910_v54  ;;  %v2928_v15 = vadd.f32 %v2919_v26, %v2909_v28  ;;  %v7185_v58 = vld [vmem:[%s7618_s13 + $0x1b0] sm:$0xff]  ;;  %v7197_v27 = vld [vmem:[%s7618_s13 + $0x1a0] sm:$0xff] }
 0x7f9   :  { %v2931_v11 = vadd.f32 %v2923_v9, %v2912_v49  ;;  %v2930_v5 = vadd.f32 %v2919_v26, %v2911_v10  ;;  %v2933_v52 = vadd.f32 %v2923_v9, %v2914_v40  ;;  %v2932_v39 = vadd.f32 %v2919_v26, %v2913_v2  ;;  %8167 = vst [vmem:[#allocation74_spill] sm:$0xff] %v7185_v58  ;;  %v7191_v9 = vld [vmem:[%s7618_s13 + $0x1a8] sm:$0xff]  ;;  %v7203_v26 = vld [vmem:[%s7618_s13 + $0x198] sm:$0xff]  ;;  %v7221_v54 = vld [vmem:[%s7618_s13 + $0x180] sm:$0xff] }
 0x7fa   :  { %3074 = vmatprep.mubr.f32.mxu1 %v2927_v30  ;;  %8168 = vst [vmem:[#allocation2_spill] sm:$0xff] %v7191_v9  ;;  %8169 = vst [vmem:[#allocation4_spill] sm:$0xff] %v7197_v27  ;;  %v7209_v30 = vld [vmem:[%s7618_s13 + $0x190] sm:$0xff]  ;;  %v7239_v49 = vld [vmem:[%s7618_s13 + $0x168] sm:$0xff] }
 0x7fb   :  { %3075 = vmatmul.mubr.f32.vlgmr.msra.gmra.mxu1 %v2926_v35  ;;  %8170 = vst [vmem:[#allocation13_spill] sm:$0xff] %v7203_v26  ;;  %8171 = vst [vmem:[#allocation14_spill] sm:$0xff] %v7209_v30  ;;  %v7215_v35 = vld [vmem:[%s7618_s13 + $0x188] sm:$0xff]  ;;  %v7233_v28 = vld [vmem:[%s7618_s13 + $0x170] sm:$0xff] }
 0x7fc   :  { %3080 = vmatprep.mubr.f32.mxu1 %v2929_v29  ;;  %3223 = vmatpush1.msra.mxu1 %v6942_v57  ;;  %8172 = vst [vmem:[#allocation16_spill] sm:$0xff] %v7215_v35  ;;  %8173 = vst [vmem:[#allocation18_spill] sm:$0xff] %v7221_v54  ;;  %v7227_v29 = vld [vmem:[%s7618_s13 + $0x178] sm:$0xff]  ;;  %v7257_v10 = vld [vmem:[%s7618_s13 + $0x150] sm:$0xff] }
 0x7fd   :  { %3224 = vmatprep.subr.mxu1 %v6948_v22  ;;  %8174 = vst [vmem:[#allocation19_spill] sm:$0xff] %v7227_v29  ;;  %8175 = vst [vmem:[#allocation20_spill] sm:$0xff] %v7233_v28  ;;  %v7263_v40 = vld [vmem:[%s7618_s13 + $0x148] sm:$0xff]  ;;  %v7281_v2 = vld [vmem:[%s7618_s13 + $0x130] sm:$0xff] }
 0x7fe   :  { %3225 = vmatpush1.msra.mxu1 %v6954_v55  ;;  %8176 = vst [vmem:[#allocation22_spill] sm:$0xff] %v7239_v49  ;;  %8179 = vst [vmem:[#allocation25_spill] sm:$0xff] %v7257_v10 }
 0x7ff   :  { %3081 = vmatmul.mubr.f32.gmra.mxu1 %v2928_v15  ;;  %3226 = vmatprep.subr.mxu1 %v6961_v50  ;;  %v7245_v15 = vld [vmem:[%s7618_s13 + $0x160] sm:$0xff]  ;;  %8180 = vst [vmem:[#allocation27_spill] sm:$0xff] %v7263_v40  ;;  %8183 = vst [vmem:[#allocation32_spill] sm:$0xff] %v7281_v2 }
 0x800   :  { %3086 = vmatprep.mubr.f32.mxu1 %v2931_v11  ;;  %3227 = vmatpush1.msra.mxu1 %v6968_v46  ;;  %8177 = vst [vmem:[#allocation33_spill] sm:$0xff] %v7245_v15  ;;  %v7251_v11 = vld [vmem:[%s7618_s13 + $0x158] sm:$0xff] }
 0x801   :  { %3228 = vmatprep.subr.mxu1 %v6974_v21  ;;  %8178 = vst [vmem:[#allocation24_spill] sm:$0xff] %v7251_v11 }
 0x802   :  { %3229 = vmatpush1.msra.mxu1 %v6980_v44 }
 0x803   :  { %3087 = vmatmul.mubr.f32.gmra.mxu1 %v2930_v5  ;;  %3230 = vmatprep.subr.mxu1 %v6987_v16  ;;  %v7269_v5 = vld [vmem:[%s7618_s13 + $0x140] sm:$0xff] }
 0x804   :  { %3092 = vmatprep.mubr.f32.mxu1 %v2933_v52  ;;  %3231 = vmatpush1.msra.mxu1 %v6993_v13  ;;  %8181 = vst [vmem:[#allocation29_spill] sm:$0xff] %v7269_v5  ;;  %v7275_v52 = vld [vmem:[%s7618_s13 + $0x138] sm:$0xff] }
 0x805   :  { %3232 = vmatprep.subr.mxu1 %v6999_v3  ;;  %8182 = vst [vmem:[#allocation30_spill] sm:$0xff] %v7275_v52 }
 0x806   :  { %3233 = vmatpush1.msra.mxu1 %v7005_v14 }
 0x807   :  { %3093 = vmatmul.mubr.f32.gmra.mxu1 %v2932_v39  ;;  %3234 = vmatprep.subr.mxu1 %v7011_v23  ;;  %v7287_v39 = vld [vmem:[%s7618_s13 + $0x128] sm:$0xff] }
 0x808   :  { %3235 = vmatpush1.msra.mxu1 %v7017_v24  ;;  %8184 = vst [vmem:[#allocation44_spill] sm:$0xff] %v7287_v39 }
 0x809   :  { %3236 = vmatprep.subr.mxu1 %v7023_v53 }
 0x80a   :  { %3237 = vmatpush1.msra.mxu1 %v7029_v17 }
 0x80b   :  { %3238 = vmatprep.subr.mxu1 %v7035_v56 }
 0x80c   :  { %3239 = vmatpush1.msra.mxu1 %v7041_v37 }
 0x80d   :  { %3240 = vmatprep.subr.mxu1 %v7047_v51 }
 0x80e   :  { %3241 = vmatpush1.msra.mxu1 %v7053_v43 }
 0x80f   :  { %3242 = vmatprep.subr.mxu1 %v7059_v36 }
 0x810   :  { %3243 = vmatpush1.msra.mxu1 %v7065_v63 }
 0x811   :  { %3244 = vmatprep.subr.mxu1 %v7071_v47 }
 0x812   :  { %3245 = vmatpush1.msra.mxu1 %v7077_v62 }
 0x813   :  { %3246 = vmatprep.subr.mxu1 %v7083_v42 }
 0x814   :  { %3247 = vmatpush1.msra.mxu1 %v7089_v7 }
 0x815   :  { %3248 = vmatprep.subr.mxu1 %v7095_v41 }
 0x816   :  { %3249 = vmatpush1.msra.mxu1 %v7101_v1 }
 0x817   :  { %3250 = vmatprep.subr.mxu1 %v7107_v19 }
 0x818   :  { %3251 = vmatpush1.msra.mxu1 %v7113_v38 }
 0x819   :  { %3252 = vmatprep.subr.mxu1 %v7119_v18 }
 0x81a   :  { %3253 = vmatpush1.msra.mxu1 %v7125_v12 }
 0x81b   :  { %3254 = vmatprep.subr.mxu1 %v7131_v20 }
 0x81c   :  { %3255 = vmatpush2.msra.mxu1 %v7137_v59 }
 0x81d   :  { %3256 = vmatprep.subr.mxu1 %v7143_v48 }
 0x81e   :  { %3257 = vmatpush2.msra.mxu1 %v7149_v0 }
 0x81f   :  { %3258 = vmatprep.subr.mxu1 %v7155_v33 }
 0x820   :  { %3259 = vmatpush2.msra.mxu1 %v7161_v8 }
 0x821   :  { %3260 = vmatprep.subr.mxu1 %v7167_v61 }
 0x822   :  { %3261 = vmatpush2.msra.mxu1 %v7173_v32 }
 0x823   :  { %3262 = vmatprep.subr.mxu1 %v7179_v31 }
 0x824   :  { %3263 = vmatpush2.msra.mxu1 %v7185_v58 }
 0x825   :  { %3264 = vmatprep.subr.mxu1 %v7191_v9 }
 0x826   :  { %3265 = vmatpush2.msra.mxu1 %v7197_v27 }
 0x827   :  { %3266 = vmatprep.subr.mxu1 %v7203_v26 }
 0x828   :  { %3267 = vmatpush2.msra.mxu1 %v7209_v30 }
 0x829   :  { %3268 = vmatprep.subr.mxu1 %v7215_v35 }
 0x82a   :  { %3269 = vmatpush2.msra.mxu1 %v7221_v54 }
 0x82b   :  { %3270 = vmatprep.subr.mxu1 %v7227_v29 }
 0x82c   :  { %3271 = vmatpush2.msra.mxu1 %v7233_v28 }
 0x82d   :  { %3272 = vmatprep.subr.mxu1 %v7239_v49 }
 0x82e   :  { %3273 = vmatpush2.msra.mxu1 %v7245_v15 }
 0x82f   :  { %3274 = vmatprep.subr.mxu1 %v7251_v11 }
 0x830   :  { %3275 = vmatpush2.msra.mxu1 %v7257_v10 }
 0x831   :  { %3276 = vmatprep.subr.mxu1 %v7263_v40 }
 0x832   :  { %3277 = vmatpush2.msra.mxu1 %v7269_v5 }
 0x833   :  { %3278 = vmatprep.subr.mxu1 %v7275_v52 }
 0x834   :  { %3279 = vmatpush2.msra.mxu1 %v7281_v2 }
 0x835   :  { %3280 = vmatprep.subr.mxu1 %v7287_v39  ;;  %v7311_v39 = vld [vmem:[%s7618_s13 + $0x108] sm:$0xff] }
 0x836   :  { %3281 = vmatpush2.msra.mxu1 %v7293_v60  ;;  %8188 = vst [vmem:[#allocation37_spill] sm:$0xff] %v7311_v39  ;;  %v7317_v60 = vld [vmem:[%s7618_s13 + $0x100] sm:$0xff] }
 0x837   :  { %3282 = vmatprep.subr.mxu1 %v7299_v34  ;;  %8189 = vst [vmem:[#allocation38_spill] sm:$0xff] %v7317_v60 }
 0x838   :  { %3283 = vmatpush2.msra.mxu1 %v7305_v25  ;;  %v2998_v25 = vld [vmem:[%s7631_s12] sm:$0x3] }
 0x839   :  { %3284 = vmatprep.subr.mxu1 %v7311_v39  ;;  %v3003_v34 = vrot.slane %v2998_v25, %v8163_v4  ;;  %v3007_v52 = vrot.slane %v2998_v25, %v4741_v45 }
 0x83a   :  { %3285 = vmatpush2.msra.mxu1 %v7317_v60 }
 0x83b   :  { %3510 = vmatprep.subr.mxu1 %v6778_v6 }
 0x8bb   :  { %v3076_v2 = vpop.f32.mrf.mxu1 }
 0x8bc   :  { %v3077_v39 = vadd.f32 %v3076_v2, %v3003_v34 }
 0x8bd   :  { %v3078_v5 = vpop.f32.mrf.mxu1 }
 0x8be   :  { %v3079_v11 = vadd.f32 %v3078_v5, %v3007_v52  ;;  %v7328_v28 = vmax.f32 %v3077_v39, 0.0 }
 0x8bf   :  { %v3082_v40 = vpop.f32.mrf.mxu1 }
 0x8c0   :  { %v3083_v10 = vadd.f32 %v3082_v40, %v3003_v34  ;;  %8191 = vst [vmem:[#allocation7_spill] sm:$0xff] %v7328_v28  ;;  %v7332_v35 = vmax.f32 %v3079_v11, 0.0  ;;  %v3125_v40 = vmul.f32 %v7328_v28, %v7328_v28 }
 0x8c1   :  { %v3084_v15 = vpop.f32.mrf.mxu1 }
 0x8c2   :  { %v7326_v49 = vmax.f32 %v3083_v10, 0.0  ;;  %v3085_v60 = vadd.f32 %v3084_v15, %v3007_v52  ;;  %8193 = vst [vmem:[#allocation9_spill] sm:$0xff] %v7332_v35 }
 0x8c3   :  { %v3088_v6 = vpop.f32.mrf.mxu1 }
 0x8c4   :  { %8190 = vst [vmem:[#allocation6_spill] sm:$0xff] %v7326_v49  ;;  %v7330_v29 = vmax.f32 %v3085_v60, 0.0  ;;  %v3089_v54 = vadd.f32 %v3088_v6, %v3003_v34  ;;  %v3127_v25 = vmul.f32 %v7326_v49, %v7326_v49  ;;  %v3107_v60 = vadd.f32 %v7326_v49, %v7328_v28 }
 0x8c5   :  { %v3090_v45 = vpop.f32.mrf.mxu1  ;;  %v3126_v6 = vmul.f32 %v7332_v35, %v7332_v35 }
 0x8c6   :  { %8192 = vst [vmem:[#allocation8_spill] sm:$0xff] %v7330_v29  ;;  %v7336_v2 = vmax.f32 %v3089_v54, 0.0  ;;  %v3128_v15 = vmul.f32 %v7330_v29, %v7330_v29  ;;  %v3091_v10 = vadd.f32 %v3090_v45, %v3007_v52  ;;  %v3133_v54 = vadd.f32 %v3127_v25, %v3125_v40 }
 0x8c7   :  { %v3094_v5 = vpop.f32.mrf.mxu1  ;;  %v3116_v26 = vadd.f32 %v7330_v29, %v7332_v35 }
 0x8c8   :  { %8194 = vst [vmem:[#allocation10_spill] sm:$0xff] %v7336_v2  ;;  %v3129_v11 = vmul.f32 %v7336_v2, %v7336_v2  ;;  %v3095_v39 = vadd.f32 %v3094_v5, %v3003_v34  ;;  %v7348_v4 = vmax.f32 %v3091_v10, 0.0  ;;  %v3108_v45 = vadd.f32 %v3107_v60, %v7336_v2 }
 0x8c9   :  { %v3096_v30 = vpop.f32.mrf.mxu1  ;;  %v3142_v49 = vadd.f32 %v3128_v15, %v3126_v6 }
 0x8ca   :  { %8195 = vst [vmem:[#allocation11_spill] sm:$0xff] %v7348_v4  ;;  %v7353_v27 = vmax.f32 %v3095_v39, 0.0  ;;  %v3097_v9 = vadd.f32 %v3096_v30, %v3007_v52  ;;  %v3134_v28 = vadd.f32 %v3133_v54, %v3129_v11  ;;  %v3130_v34 = vmul.f32 %v7348_v4, %v7348_v4 }
 0x8cb   :  { %v3117_v5 = vadd.f32 %v3116_v26, %v7348_v4 }
 0x8cc   :  { %8196 = vst [vmem:[#allocation12_spill] sm:$0xff] %v7353_v27  ;;  %v3109_v25 = vadd.f32 %v3108_v45, %v7353_v27  ;;  %v3131_v40 = vmul.f32 %v7353_v27, %v7353_v27  ;;  %v7361_v10 = vmax.f32 %v3097_v9, 0.0  ;;  %v3143_v29 = vadd.f32 %v3142_v49, %v3130_v34 }
 0x8ce   :  { %8197 = vst [vmem:[#allocation15_spill] sm:$0xff] %v7361_v10  ;;  %v3110_v35 = vrot.slane %v3109_v25, 4  ;;  %v3135_v60 = vadd.f32 %v3134_v28, %v3131_v40  ;;  %v3118_v39 = vadd.f32 %v3117_v5, %v7361_v10  ;;  %v3132_v30 = vmul.f32 %v7361_v10, %v7361_v10 }
 0x8d0   :  { %v3111_v52 = vadd.f32 %v3110_v35, %v3109_v25  ;;  %v3136_v15 = vrot.slane %v3135_v60, 4  ;;  %v3119_v11 = vrot.slane %v3118_v39, 4  ;;  %v3144_v6 = vadd.f32 %v3143_v29, %v3132_v30 }
 0x8d2   :  { %v3112_v26 = vrot.slane %v3111_v52, 2  ;;  %v3137_v54 = vadd.f32 %v3136_v15, %v3135_v60  ;;  %v3120_v45 = vadd.f32 %v3119_v11, %v3118_v39  ;;  %v3145_v2 = vrot.slane %v3144_v6, 4  ;;  %v8226_v39 = vld [vmem:[#allocation41_spill] sm:$0xff] }
 0x8d4   :  { %v3138_v4 = vrot.slane %v3137_v54, 2  ;;  %v3121_v27 = vrot.slane %v3120_v45, 2  ;;  %v3113_v9 = vadd.f32 %v3112_v26, %v3111_v52  ;;  %v3146_v58 = vadd.f32 %v3145_v2, %v3144_v6  ;;  %v8225_v2 = vld [vmem:[#allocation40_spill] sm:$0xff] }
 0x8d6   :  { %v3139_v49 = vadd.f32 %v3138_v4, %v3137_v54  ;;  %v3122_v34 = vadd.f32 %v3121_v27, %v3120_v45  ;;  %v3147_v28 = vrot.slane %v3146_v58, 2  ;;  %v3114_v40 = vrot.slane %v3113_v9, 1  ;;  %v8198_v4 = vld [vmem:[#allocation73_spill] sm:$0xff] }
 0x8d7   :  { %v8227_v54 = vld [vmem:[#allocation5_spill] sm:$0xff] }
 0x8d8   :  { %v3123_v5 = vrot.slane %v3122_v34, 1  ;;  %v3148_v31 = vadd.f32 %v3147_v28, %v3146_v58  ;;  %v3140_v32 = vrot.slane %v3139_v49, 1  ;;  %v3115_v25 = vadd.f32 %v3114_v40, %v3113_v9  ;;  %v8224_v58 = vld [vmem:[#allocation3_spill] sm:$0xff]  ;;  %v8228_v9 = vld [vmem:[#allocation9_spill] sm:$0xff] }
 0x8d9   :  { %v8230_v40 = vld [vmem:[#allocation11_spill] sm:$0xff] }
 0x8da   :  { %v3124_v10 = vadd.f32 %v3123_v5, %v3122_v34  ;;  %v3149_v35 = vrot.slane %v3148_v31, 1  ;;  %v3141_v60 = vadd.f32 %v3140_v32, %v3139_v49  ;;  %v8229_v34 = vld [vmem:[#allocation8_spill] sm:$0xff] }
 0x8dc   :  { %3215 = vmatprep.mubr.f32.mxu0 %v3124_v10  ;;  %v3150_v29 = vadd.f32 %v3149_v35, %v3148_v31  ;;  %v8231_v35 = vld [vmem:[#allocation15_spill] sm:$0xff] }
 0x8dd   :  { %3216 = vmatmul.mubr.f32.vlgmr.msra.gmra.mxu0 %v3115_v25 }
 0x8de   :  { %3286 = vmatprep.mubr.f32.mxu1 %v3150_v29  ;;  %3440 = vmatpush1.msra.mxu0 %v6942_v57 }
 0x8df   :  { %3287 = vmatmul.mubr.f32.vlgmr.msra.gmra.mxu1 %v3141_v60  ;;  %3441 = vmatprep.subr.mxu0 %v6948_v22 }
 0x8e0   :  { %3442 = vmatpush1.msra.mxu0 %v6954_v55  ;;  %3511 = vmatpush1.msra.mxu1 %v6942_v57  ;;  %v8199_v57 = vld [vmem:[#allocation39_spill] sm:$0xff] }
 0x8e1   :  { %3443 = vmatprep.subr.mxu0 %v6961_v50  ;;  %3512 = vmatprep.subr.mxu1 %v6948_v22  ;;  %v8200_v22 = vld [vmem:[#allocation74_spill] sm:$0xff] }
 0x8e2   :  { %3444 = vmatpush1.msra.mxu0 %v6968_v46  ;;  %3513 = vmatpush1.msra.mxu1 %v6954_v55  ;;  %v8201_v55 = vld [vmem:[#allocation2_spill] sm:$0xff] }
 0x8e3   :  { %3445 = vmatprep.subr.mxu0 %v6974_v21  ;;  %3514 = vmatprep.subr.mxu1 %v6961_v50  ;;  %v8202_v50 = vld [vmem:[#allocation4_spill] sm:$0xff] }
 0x8e4   :  { %3446 = vmatpush1.msra.mxu0 %v6980_v44  ;;  %3515 = vmatpush1.msra.mxu1 %v6968_v46  ;;  %v8203_v46 = vld [vmem:[#allocation13_spill] sm:$0xff] }
 0x8e5   :  { %3447 = vmatprep.subr.mxu0 %v6987_v16  ;;  %3516 = vmatprep.subr.mxu1 %v6974_v21  ;;  %v8204_v21 = vld [vmem:[#allocation14_spill] sm:$0xff] }
 0x8e6   :  { %3448 = vmatpush1.msra.mxu0 %v6993_v13  ;;  %3517 = vmatpush1.msra.mxu1 %v6980_v44  ;;  %v8205_v44 = vld [vmem:[#allocation16_spill] sm:$0xff] }
 0x8e7   :  { %3449 = vmatprep.subr.mxu0 %v6999_v3  ;;  %3518 = vmatprep.subr.mxu1 %v6987_v16  ;;  %v8206_v16 = vld [vmem:[#allocation18_spill] sm:$0xff] }
 0x8e8   :  { %3450 = vmatpush1.msra.mxu0 %v7005_v14  ;;  %3519 = vmatpush1.msra.mxu1 %v6993_v13  ;;  %v8207_v13 = vld [vmem:[#allocation19_spill] sm:$0xff] }
 0x8e9   :  { %3451 = vmatprep.subr.mxu0 %v7011_v23  ;;  %3520 = vmatprep.subr.mxu1 %v6999_v3  ;;  %v8208_v3 = vld [vmem:[#allocation20_spill] sm:$0xff] }
 0x8ea   :  { %3452 = vmatpush1.msra.mxu0 %v7017_v24  ;;  %3521 = vmatpush1.msra.mxu1 %v7005_v14  ;;  %v8209_v14 = vld [vmem:[#allocation22_spill] sm:$0xff] }
 0x8eb   :  { %3453 = vmatprep.subr.mxu0 %v7023_v53  ;;  %3522 = vmatprep.subr.mxu1 %v7011_v23  ;;  %v8210_v23 = vld [vmem:[#allocation33_spill] sm:$0xff] }
 0x8ec   :  { %3454 = vmatpush1.msra.mxu0 %v7029_v17  ;;  %3523 = vmatpush1.msra.mxu1 %v7017_v24  ;;  %v8211_v24 = vld [vmem:[#allocation24_spill] sm:$0xff] }
 0x8ed   :  { %3455 = vmatprep.subr.mxu0 %v7035_v56  ;;  %3524 = vmatprep.subr.mxu1 %v7023_v53  ;;  %v8212_v53 = vld [vmem:[#allocation25_spill] sm:$0xff] }
 0x8ee   :  { %3456 = vmatpush1.msra.mxu0 %v7041_v37  ;;  %3525 = vmatpush1.msra.mxu1 %v7029_v17  ;;  %v8213_v17 = vld [vmem:[#allocation27_spill] sm:$0xff] }
 0x8ef   :  { %3457 = vmatprep.subr.mxu0 %v7047_v51  ;;  %3526 = vmatprep.subr.mxu1 %v7035_v56  ;;  %v8214_v56 = vld [vmem:[#allocation29_spill] sm:$0xff] }
 0x8f0   :  { %3458 = vmatpush1.msra.mxu0 %v7053_v43  ;;  %3527 = vmatpush1.msra.mxu1 %v7041_v37  ;;  %v8215_v37 = vld [vmem:[#allocation30_spill] sm:$0xff] }
 0x8f1   :  { %3459 = vmatprep.subr.mxu0 %v7059_v36  ;;  %3528 = vmatprep.subr.mxu1 %v7047_v51  ;;  %v8216_v51 = vld [vmem:[#allocation32_spill] sm:$0xff] }
 0x8f2   :  { %3460 = vmatpush1.msra.mxu0 %v7065_v63  ;;  %3529 = vmatpush1.msra.mxu1 %v7053_v43  ;;  %v8217_v43 = vld [vmem:[#allocation44_spill] sm:$0xff] }
 0x8f3   :  { %3461 = vmatprep.subr.mxu0 %v7071_v47  ;;  %3530 = vmatprep.subr.mxu1 %v7059_v36  ;;  %v8218_v36 = vld [vmem:[#allocation34_spill] sm:$0xff] }
 0x8f4   :  { %3462 = vmatpush1.msra.mxu0 %v7077_v62  ;;  %3531 = vmatpush1.msra.mxu1 %v7065_v63  ;;  %v8219_v63 = vld [vmem:[#allocation35_spill] sm:$0xff] }
 0x8f5   :  { %3463 = vmatprep.subr.mxu0 %v7083_v42  ;;  %3532 = vmatprep.subr.mxu1 %v7071_v47  ;;  %v8220_v47 = vld [vmem:[#allocation36_spill] sm:$0xff] }
 0x8f6   :  { %3464 = vmatpush1.msra.mxu0 %v7089_v7  ;;  %3533 = vmatpush1.msra.mxu1 %v7077_v62  ;;  %v8221_v62 = vld [vmem:[#allocation37_spill] sm:$0xff] }
 0x8f7   :  { %3465 = vmatprep.subr.mxu0 %v7095_v41  ;;  %3534 = vmatprep.subr.mxu1 %v7083_v42  ;;  %v8222_v42 = vld [vmem:[#allocation38_spill] sm:$0xff] }
 0x8f8   :  { %3466 = vmatpush1.msra.mxu0 %v7101_v1  ;;  %3535 = vmatpush1.msra.mxu1 %v7089_v7 }
 0x8f9   :  { %3467 = vmatprep.subr.mxu0 %v7107_v19  ;;  %3536 = vmatprep.subr.mxu1 %v7095_v41 }
 0x8fa   :  { %3468 = vmatpush1.msra.mxu0 %v7113_v38  ;;  %3537 = vmatpush1.msra.mxu1 %v7101_v1 }
 0x8fb   :  { %3469 = vmatprep.subr.mxu0 %v7119_v18  ;;  %3538 = vmatprep.subr.mxu1 %v7107_v19 }
 0x8fc   :  { %3470 = vmatpush1.msra.mxu0 %v7125_v12  ;;  %3539 = vmatpush1.msra.mxu1 %v7113_v38 }
 0x8fd   :  { %3471 = vmatprep.subr.mxu0 %v7131_v20  ;;  %3540 = vmatprep.subr.mxu1 %v7119_v18 }
 0x8fe   :  { %3472 = vmatpush2.msra.mxu0 %v7137_v59  ;;  %3541 = vmatpush1.msra.mxu1 %v7125_v12 }
 0x8ff   :  { %3473 = vmatprep.subr.mxu0 %v7143_v48  ;;  %3542 = vmatprep.subr.mxu1 %v7131_v20 }
 0x900   :  { %3474 = vmatpush2.msra.mxu0 %v7149_v0  ;;  %3543 = vmatpush2.msra.mxu1 %v7137_v59 }
 0x901   :  { %3475 = vmatprep.subr.mxu0 %v7155_v33  ;;  %3544 = vmatprep.subr.mxu1 %v7143_v48 }
 0x902   :  { %3476 = vmatpush2.msra.mxu0 %v7161_v8  ;;  %3545 = vmatpush2.msra.mxu1 %v7149_v0 }
 0x903   :  { %3477 = vmatprep.subr.mxu0 %v7167_v61  ;;  %3546 = vmatprep.subr.mxu1 %v7155_v33 }
 0x904   :  { %3478 = vmatpush2.msra.mxu0 %v8198_v4  ;;  %3547 = vmatpush2.msra.mxu1 %v7161_v8 }
 0x905   :  { %3479 = vmatprep.subr.mxu0 %v8199_v57  ;;  %3548 = vmatprep.subr.mxu1 %v7167_v61  ;;  %v8223_v61 = vld [vmem:[#allocation42_spill] sm:$0xff] }
 0x906   :  { %3480 = vmatpush2.msra.mxu0 %v8200_v22  ;;  %3549 = vmatpush2.msra.mxu1 %v8198_v4  ;;  %v8232_v4 = vld [vmem:[#allocation7_spill] sm:$0xff] }
 0x907   :  { %3481 = vmatprep.subr.mxu0 %v8201_v55  ;;  %3550 = vmatprep.subr.mxu1 %v8199_v57 }
 0x908   :  { %3482 = vmatpush2.msra.mxu0 %v8202_v50  ;;  %3551 = vmatpush2.msra.mxu1 %v8200_v22  ;;  %v8233_v22 = vld [vmem:[#allocation6_spill] sm:$0xff] }
 0x909   :  { %3483 = vmatprep.subr.mxu0 %v8203_v46  ;;  %3552 = vmatprep.subr.mxu1 %v8201_v55 }
 0x90a   :  { %3484 = vmatpush2.msra.mxu0 %v8204_v21  ;;  %3553 = vmatpush2.msra.mxu1 %v8202_v50  ;;  %v8234_v50 = vld [vmem:[#allocation10_spill] sm:$0xff] }
 0x90b   :  { %3485 = vmatprep.subr.mxu0 %v8205_v44  ;;  %3554 = vmatprep.subr.mxu1 %v8203_v46 }
 0x90c   :  { %3486 = vmatpush2.msra.mxu0 %v8206_v16  ;;  %3555 = vmatpush2.msra.mxu1 %v8204_v21  ;;  %v8235_v21 = vld [vmem:[#allocation12_spill] sm:$0xff] }
 0x90d   :  { %3487 = vmatprep.subr.mxu0 %v8207_v13  ;;  %3556 = vmatprep.subr.mxu1 %v8205_v44 }
 0x90e   :  { %3488 = vmatpush2.msra.mxu0 %v8208_v3  ;;  %3557 = vmatpush2.msra.mxu1 %v8206_v16 }
 0x90f   :  { %3489 = vmatprep.subr.mxu0 %v8209_v14  ;;  %3558 = vmatprep.subr.mxu1 %v8207_v13 }
 0x910   :  { %3490 = vmatpush2.msra.mxu0 %v8210_v23  ;;  %3559 = vmatpush2.msra.mxu1 %v8208_v3 }
 0x911   :  { %3491 = vmatprep.subr.mxu0 %v8211_v24  ;;  %3560 = vmatprep.subr.mxu1 %v8209_v14 }
 0x912   :  { %3492 = vmatpush2.msra.mxu0 %v8212_v53  ;;  %3561 = vmatpush2.msra.mxu1 %v8210_v23 }
 0x913   :  { %3493 = vmatprep.subr.mxu0 %v8213_v17  ;;  %3562 = vmatprep.subr.mxu1 %v8211_v24 }
 0x914   :  { %3494 = vmatpush2.msra.mxu0 %v8214_v56  ;;  %3563 = vmatpush2.msra.mxu1 %v8212_v53 }
 0x915   :  { %3495 = vmatprep.subr.mxu0 %v8215_v37  ;;  %3564 = vmatprep.subr.mxu1 %v8213_v17 }
 0x916   :  { %3496 = vmatpush2.msra.mxu0 %v8216_v51  ;;  %3565 = vmatpush2.msra.mxu1 %v8214_v56  ;;  %v3973_v56 = vld [vmem:[%s7617_s0 + $0x8] sm:$0xff] }
 0x917   :  { %3497 = vmatprep.subr.mxu0 %v8217_v43  ;;  %3566 = vmatprep.subr.mxu1 %v8215_v37 }
 0x918   :  { %3498 = vmatpush2.msra.mxu0 %v8218_v36  ;;  %3567 = vmatpush2.msra.mxu1 %v8216_v51  ;;  %v3974_v51 = vld [vmem:[%s7617_s0 + $0x18] sm:$0xff] }
 0x919   :  { %3499 = vmatprep.subr.mxu0 %v8219_v63  ;;  %3568 = vmatprep.subr.mxu1 %v8217_v43 }
 0x91a   :  { %3500 = vmatpush2.msra.mxu0 %v8220_v47  ;;  %3569 = vmatpush2.msra.mxu1 %v8218_v36  ;;  %v3975_v36 = vld [vmem:[%s7617_s0 + $0x28] sm:$0xff] }
 0x91b   :  { %3501 = vmatprep.subr.mxu0 %v8221_v62  ;;  %3570 = vmatprep.subr.mxu1 %v8219_v63 }
 0x91c   :  { %3502 = vmatpush2.msra.mxu0 %v8222_v42  ;;  %3571 = vmatpush2.msra.mxu1 %v8220_v47  ;;  %v3976_v47 = vld [vmem:[%s7617_s0 + $0x38] sm:$0xff] }
 0x91d   :  { %3572 = vmatprep.subr.mxu1 %v8221_v62 }
 0x91e   :  { %3573 = vmatpush2.msra.mxu1 %v8222_v42  ;;  %v3977_v42 = vld [vmem:[%s7617_s0] sm:$0xff] }
 0x99d   :  { %v3217_v7 = vpop.f32.mrf.mxu0 }
 0x99e   :  { %v3293_v41 = vmul.f32 %v3217_v7, %v3217_v7 }
 0x99f   :  { %v3219_v1 = vpop.f32.mrf.mxu0  ;;  %v3288_v19 = vpop.f32.mrf.mxu1 }
 0x9a0   :  { %v3294_v38 = vmul.f32 %v3219_v1, %v3219_v1  ;;  %v3295_v18 = vsub.f32 %v3288_v19, %v3293_v41  ;;  %v3978_v41 = vld [vmem:[%s7617_s0 + $0x10] sm:$0xff]  ;;  %v3979_v19 = vld [vmem:[%s7617_s0 + $0x20] sm:$0xff] }
 0x9a1   :  { %v3290_v12 = vpop.f32.mrf.mxu1 }
 0x9a2   :  { %v3297_v20 = vadd.f32 1e-05, %v3295_v18  ;;  %v3296_v59 = vsub.f32 %v3290_v12, %v3294_v38  ;;  %v3980_v18 = vld [vmem:[%s7617_s0 + $0x30] sm:$0xff] }
 0x9a4   :  { %v3298_v48 = vadd.f32 1e-05, %v3296_v59  ;;  %3769 = vrsqrt.f32 %v3297_v20 }
 0x9a6   :  { %3771 = vrsqrt.f32 %v3298_v48 }
 0x9b1   :  { %v3770_v0 = vpop.eup %3769 }
 0x9b3   :  { %v3772_v33 = vpop.eup %3771 }
 0x9b4   :  { %v3303_v8 = vcombine.low %v3770_v0, %v3772_v33 }
 0x9b6   :  { %v3310_v32 = vrot.slane %v3303_v8, %v8223_v61 }
 0x9b8   :  { %v3317_v31 = vrot.slane %v3310_v32, %v8223_v61 }
 0x9ba   :  { %v3319_v27 = vmul.f32 %v8224_v58, %v3317_v31 }
 0x9bc   :  { %v3324_v10 = vrot.slane %v3319_v27, %v8225_v2  ;;  %v3328_v30 = vrot.slane %v3319_v27, %v8226_v39 }
 0x9be   :  { %v3331_v52 = vmul.f32 %v3324_v10, %v3217_v7  ;;  %v3332_v15 = vmul.f32 %v3328_v30, %v3219_v1  ;;  %v3353_v49 = vmul.f32 %v3328_v30, %v8228_v9  ;;  %v3355_v28 = vmul.f32 %v3328_v30, %v8229_v34 }
 0x9bf   :  { %v3357_v5 = vmul.f32 %v3328_v30, %v8230_v40  ;;  %v3359_v25 = vmul.f32 %v3328_v30, %v8231_v35  ;;  %v3352_v57 = vmul.f32 %v3324_v10, %v8232_v4  ;;  %v3354_v55 = vmul.f32 %v3324_v10, %v8233_v22 }
 0x9c0   :  { %v3335_v11 = vcombine.low %v3331_v52, %v3332_v15  ;;  %v3356_v46 = vmul.f32 %v3324_v10, %v8234_v50  ;;  %v3358_v44 = vmul.f32 %v3324_v10, %v8235_v21 }
 0x9c2   :  { %v3342_v6 = vrot.slane %v3335_v11, %v8223_v61 }
 0x9c4   :  { %v3349_v26 = vrot.slane %v3342_v6, %v8223_v61 }
 0x9c6   :  { %v3351_v45 = vsub.f32 %v8227_v54, %v3349_v26 }
 0x9c8   :  { %v3368_v29 = vrot.slane %v3351_v45, %v8226_v39  ;;  %v3364_v60 = vrot.slane %v3351_v45, %v8225_v2 }
 0x9ca   :  { %v3372_v16 = vadd.f32 %v3368_v29, %v3353_v49  ;;  %v3374_v13 = vadd.f32 %v3368_v29, %v3355_v28  ;;  %v3376_v3 = vadd.f32 %v3368_v29, %v3357_v5  ;;  %v3378_v14 = vadd.f32 %v3368_v29, %v3359_v25 }
 0x9cb   :  { %v3371_v23 = vadd.f32 %v3364_v60, %v3352_v57  ;;  %v3373_v24 = vadd.f32 %v3364_v60, %v3354_v55  ;;  %v3375_v53 = vadd.f32 %v3364_v60, %v3356_v46  ;;  %v3377_v17 = vadd.f32 %v3364_v60, %v3358_v44 }
 0x9cc   :  { %v3380_v37 = vmul.f32 %v3973_v56, %v3372_v16  ;;  %v3382_v43 = vmul.f32 %v3974_v51, %v3374_v13  ;;  %v3384_v63 = vmul.f32 %v3975_v36, %v3376_v3  ;;  %v3386_v62 = vmul.f32 %v3976_v47, %v3378_v14 }
 0x9cd   :  { %v3379_v7 = vmul.f32 %v3977_v42, %v3371_v23  ;;  %v3381_v1 = vmul.f32 %v3978_v41, %v3373_v24  ;;  %v3383_v38 = vmul.f32 %v3979_v19, %v3375_v53  ;;  %v3385_v12 = vmul.f32 %v3980_v18, %v3377_v17 }
 0x9ce   :  { %v7534_v20 = vmax.f32 %v3380_v37, 0.0  ;;  %v7536_v59 = vmax.f32 %v3382_v43, 0.0  ;;  %v7538_v48 = vmax.f32 %v3384_v63, 0.0  ;;  %v7546_v32 = vmax.f32 %v3386_v62, 0.0 }
 0x9cf   :  { %v7540_v0 = vmax.f32 %v3379_v7, 0.0  ;;  %v7542_v33 = vmax.f32 %v3381_v1, 0.0  ;;  %v7544_v8 = vmax.f32 %v3383_v38, 0.0  ;;  %v7554_v30 = vmax.f32 %v3385_v12, 0.0 }
 0x9d0   :  { %v3404_v31 = vadd.f32 %v7536_v59, %v7534_v20  ;;  %v3414_v27 = vmul.f32 %v7534_v20, %v7534_v20  ;;  %v3416_v10 = vmul.f32 %v7536_v59, %v7536_v59  ;;  %v3418_v26 = vmul.f32 %v7538_v48, %v7538_v48 }
 0x9d1   :  { %v3395_v52 = vadd.f32 %v7542_v33, %v7540_v0  ;;  %v3413_v15 = vmul.f32 %v7540_v0, %v7540_v0  ;;  %v3415_v11 = vmul.f32 %v7542_v33, %v7542_v33  ;;  %v3417_v49 = vmul.f32 %v7544_v8, %v7544_v8 }
 0x9d2   :  { %v3405_v6 = vadd.f32 %v3404_v31, %v7538_v48  ;;  %v3430_v45 = vadd.f32 %v3416_v10, %v3414_v27  ;;  %v3420_v40 = vmul.f32 %v7546_v32, %v7546_v32  ;;  %v3419_v25 = vmul.f32 %v7554_v30, %v7554_v30 }
 0x9d3   :  { %v3396_v9 = vadd.f32 %v3395_v52, %v7544_v8  ;;  %v3421_v34 = vadd.f32 %v3415_v11, %v3413_v15 }
 0x9d4   :  { %v3406_v28 = vadd.f32 %v3405_v6, %v7546_v32  ;;  %v3431_v5 = vadd.f32 %v3430_v45, %v3418_v26 }
 0x9d5   :  { %v3397_v35 = vadd.f32 %v3396_v9, %v7554_v30  ;;  %v3422_v29 = vadd.f32 %v3421_v34, %v3417_v49 }
 0x9d6   :  { %v3407_v60 = vrot.slane %v3406_v28, 4  ;;  %v3432_v4 = vadd.f32 %v3431_v5, %v3420_v40 }
 0x9d7   :  { %v3398_v57 = vrot.slane %v3397_v35, 4  ;;  %v3423_v22 = vadd.f32 %v3422_v29, %v3419_v25 }
 0x9d8   :  { %v3408_v55 = vadd.f32 %v3407_v60, %v3406_v28  ;;  %v3433_v50 = vrot.slane %v3432_v4, 4 }
 0x9d9   :  { %v3399_v46 = vadd.f32 %v3398_v57, %v3397_v35  ;;  %v3424_v21 = vrot.slane %v3423_v22, 4 }
 0x9da   :  { %v3409_v44 = vrot.slane %v3408_v55, 2  ;;  %v3434_v16 = vadd.f32 %v3433_v50, %v3432_v4 }
 0x9db   :  { %v3400_v13 = vrot.slane %v3399_v46, 2  ;;  %v3425_v3 = vadd.f32 %v3424_v21, %v3423_v22 }
 0x9dc   :  { %v3410_v14 = vadd.f32 %v3409_v44, %v3408_v55  ;;  %v3435_v23 = vrot.slane %v3434_v16, 2 }
 0x9dd   :  { %v3401_v24 = vadd.f32 %v3400_v13, %v3399_v46  ;;  %v3426_v53 = vrot.slane %v3425_v3, 2 }
 0x9de   :  { %v3411_v17 = vrot.slane %v3410_v14, 1  ;;  %v3436_v56 = vadd.f32 %v3435_v23, %v3434_v16 }
 0x9df   :  { %v3402_v37 = vrot.slane %v3401_v24, 1  ;;  %v3427_v51 = vadd.f32 %v3426_v53, %v3425_v3 }
 0x9e0   :  { %v3412_v43 = vadd.f32 %v3411_v17, %v3410_v14  ;;  %v3437_v36 = vrot.slane %v3436_v56, 1 }
 0x9e1   :  { %v3403_v63 = vadd.f32 %v3402_v37, %v3401_v24  ;;  %v3428_v47 = vrot.slane %v3427_v51, 1 }
 0x9e2   :  { %3503 = vmatprep.mubr.f32.mxu0 %v3412_v43  ;;  %v3438_v62 = vadd.f32 %v3437_v36, %v3436_v56 }
 0x9e3   :  { %3504 = vmatmul.mubr.f32.vlgmr.msra.gmra.mxu0 %v3403_v63  ;;  %v3429_v42 = vadd.f32 %v3428_v47, %v3427_v51 }
 0x9e4   :  { %3574 = vmatprep.mubr.f32.mxu1 %v3438_v62 }
 0x9e5   :  { %3575 = vmatmul.mubr.f32.vlgmr.msra.gmra.mxu1 %v3429_v42 }
 0xaa3   :  { %v3505_v7 = vpop.f32.mrf.mxu0 }
 0xaa4   :  { %v3581_v41 = vmul.f32 %v3505_v7, %v3505_v7 }
 0xaa5   :  { %v3507_v1 = vpop.f32.mrf.mxu0  ;;  %v3576_v19 = vpop.f32.mrf.mxu1 }
 0xaa6   :  { %v3582_v38 = vmul.f32 %v3507_v1, %v3507_v1  ;;  %v3583_v18 = vsub.f32 %v3576_v19, %v3581_v41 }
 0xaa7   :  { %v3578_v12 = vpop.f32.mrf.mxu1 }
 0xaa8   :  { %v3585_v31 = vadd.f32 1e-05, %v3583_v18  ;;  %v3584_v27 = vsub.f32 %v3578_v12, %v3582_v38 }
 0xaaa   :  { %v3586_v10 = vadd.f32 1e-05, %v3584_v27  ;;  %3773 = vrsqrt.f32 %v3585_v31 }
 0xaac   :  { %3775 = vrsqrt.f32 %v3586_v10 }
 0xab7   :  { %v3774_v52 = vpop.eup %3773 }
 0xab9   :  { %v3776_v15 = vpop.eup %3775 }
 0xaba   :  { %v3591_v11 = vcombine.low %v3774_v52, %v3776_v15 }
 0xabc   :  { %v3598_v6 = vrot.slane %v3591_v11, %v8223_v61 }
 0xabe   :  { %v3605_v26 = vrot.slane %v3598_v6, %v8223_v61 }
 0xac0   :  { %v3607_v45 = vmul.f32 %v8224_v58, %v3605_v26 }
 0xac2   :  { %v3612_v9 = vrot.slane %v3607_v45, %v8225_v2  ;;  %v3616_v49 = vrot.slane %v3607_v45, %v8226_v39 }
 0xac4   :  { %v3619_v34 = vmul.f32 %v3612_v9, %v3505_v7  ;;  %v3620_v28 = vmul.f32 %v3616_v49, %v3507_v1  ;;  %v3640_v29 = vmul.f32 %v3612_v9, %v7540_v0  ;;  %v3641_v60 = vmul.f32 %v3616_v49, %v7534_v20 }
 0xac5   :  { %v3642_v4 = vmul.f32 %v3612_v9, %v7542_v33  ;;  %v3643_v58 = vmul.f32 %v3616_v49, %v7536_v59  ;;  %v3644_v55 = vmul.f32 %v3612_v9, %v7544_v8  ;;  %v3645_v50 = vmul.f32 %v3616_v49, %v7538_v48 }
 0xac6   :  { %v3623_v40 = vcombine.low %v3619_v34, %v3620_v28 }
 0xac8   :  { %v3630_v5 = vrot.slane %v3623_v40, %v8223_v61 }
 0xaca   :  { %v3637_v35 = vrot.slane %v3630_v5, %v8223_v61  ;;  %v3646_v61 = vmul.f32 %v3612_v9, %v7554_v30 }
 0xacc   :  { %v3639_v25 = vsub.f32 %v8227_v54, %v3637_v35  ;;  %v3647_v54 = vmul.f32 %v3616_v49, %v7546_v32 }
 0xace   :  { %v3652_v57 = vrot.slane %v3639_v25, %v8225_v2  ;;  %v3656_v22 = vrot.slane %v3639_v25, %v8226_v39 }
 0xad0   :  { %v3659_v46 = vadd.f32 %v3652_v57, %v3640_v29  ;;  %v3660_v0 = vadd.f32 %v3656_v22, %v3641_v60  ;;  %v3661_v21 = vadd.f32 %v3652_v57, %v3642_v4  ;;  %v3662_v20 = vadd.f32 %v3656_v22, %v3643_v58 }
 0xad1   :  { %v3663_v44 = vadd.f32 %v3652_v57, %v3644_v55  ;;  %v3664_v33 = vadd.f32 %v3656_v22, %v3645_v50  ;;  %v3665_v16 = vadd.f32 %v3652_v57, %v3646_v61  ;;  %v3666_v59 = vadd.f32 %v3656_v22, %v3647_v54 }
 0xad2   :  { %3667 = vst [vmem:[%s7632_s16] sm:$0xff] %v3659_v46  ;;  %3668 = vst [vmem:[%s7632_s16 + $0x8] sm:$0xff] %v3660_v0 }
 0xad3   :  { %3669 = vst [vmem:[%s7632_s16 + $0x10] sm:$0xff] %v3661_v21  ;;  %3670 = vst [vmem:[%s7632_s16 + $0x18] sm:$0xff] %v3662_v20 }
 0xad4   :  { %3671 = vst [vmem:[%s7632_s16 + $0x20] sm:$0xff] %v3663_v44  ;;  %3672 = vst [vmem:[%s7632_s16 + $0x28] sm:$0xff] %v3664_v33 }
 0xad5   :  { %3673 = vst [vmem:[%s7632_s16 + $0x30] sm:$0xff] %v3665_v16  ;;  %3674 = vst [vmem:[%s7632_s16 + $0x38] sm:$0xff] %v3666_v59 }

</bundles_post_ra>
